<compile_context>
chip_gen: v6e
topology: v6e:2x2x1
jax: 0.10.0
libtpu: 0.0.40
codegen_flags: <defaults>
</compile_context>

<pallas_src>
import math

import jax
import jax.numpy as jnp
from jax.experimental import pallas as pl
from jax.experimental.pallas import tpu as pltpu

D_VIS = 1024          # Perceiver hidden size (frame features)
D_TXT = 768           # BERT pooler size (question / option features)
NUM_CLASSES = 3
EPS_L2 = 1e-12        # torch.nn.functional.normalize eps
EPS_IN = 1e-5         # nn.InstanceNorm1d eps


def _l2_normalize(x):
    # F.normalize(x, p=2, dim=-1): x / max(||x||_2, eps)
    n = jnp.sqrt(jnp.sum(x * x, axis=-1, keepdims=True))
    return x / jnp.maximum(n, EPS_L2)


def _dot_nt(x, w):
    # x @ w.T on the MXU, accumulating in f32.  The activation is cast to the
    # weight dtype (bf16 for the big weights) so the MXU runs at native width.
    return jax.lax.dot_general(
        x.astype(w.dtype), w, (((1,), (1,)), ((), ())),
        preferred_element_type=jnp.float32)


def vqa_kernel(q_ref, opt_ref, xvis_ref, vtail_ref, v_ref, w_head_ref,
               fc1_w_ref, fc1_b_ref, cls_w_ref, cls_b_ref, logits_ref):
    # ---- text branch ----------------------------------------------------
    x_text = _l2_normalize(q_ref[...]) + _l2_normalize(opt_ref[...])        # (TQ, 768)
    x_text = _dot_nt(x_text, v_ref[...])                                    # (TQ, 768)

    # ---- gated fusion (pad-free) ----------------------------------------
    # Padded columns 768..1023 have gate sigmoid(0)=0.5; their contribution
    # to the W matmul is the precomputed per-video row in vtail_ref.
    xvt_head = xvis_ref[...] * jax.nn.sigmoid(x_text)                       # (TQ, 768)
    xvt = jnp.maximum(
        _dot_nt(xvt_head, w_head_ref[...]) + vtail_ref[...], 0.0)           # (TQ, 1024)

    # fc1: 1024 -> 768
    xvt = _dot_nt(xvt, fc1_w_ref[...]) + fc1_b_ref[...]                     # (TQ, 768)

    # nn.InstanceNorm1d(768) on a (1, 768) input == per-row normalization
    # over the 768 features (biased variance, no affine).
    mu = jnp.mean(xvt, axis=-1, keepdims=True)
    var = jnp.mean(jnp.square(xvt - mu), axis=-1, keepdims=True)
    xvt = (xvt - mu) * jax.lax.rsqrt(var + EPS_IN)

    # dropout1: identity at inference time
    logits_ref[...] = _dot_nt(xvt, cls_w_ref[...]) + cls_b_ref[...]         # (TQ, 3)


@jax.jit
def vqa_perceiver_forward(frame_embs, q_feats, opt_feats, params):
    """frame_embs: (B, F*S, 1024); q_feats / opt_feats: (B, Q, 768).
    Returns logits (B*Q, 3) from a single fused pallas_call."""
    B, Q = q_feats.shape[0], q_feats.shape[1]
    rows = B * Q

    # --- wrapper-side per-VIDEO prep (hoisted out of the per-question path) --
    # running frame average == mean over all (frame, token) rows, then L2 norm.
    x_visual = _l2_normalize(jnp.mean(frame_embs, axis=1))                  # (B, 1024)

    # bf16 weights: halves the dominant weight DMA; matmuls accumulate in f32.
    v_bf16 = params["V"].astype(jnp.bfloat16)                               # (768, 768)
    w_bf16 = params["W"].astype(jnp.bfloat16)                               # (1024, 1024)
    fc1_w_bf16 = params["fc1_w"].astype(jnp.bfloat16)                       # (768, 1024)
    w_head = w_bf16[:, :D_TXT]                                              # (1024, 768)
    w_tail_f32 = w_bf16[:, D_TXT:].astype(jnp.float32)                      # (1024, 256)

    # padded-column contribution to the W matmul: one row per video (f32).
    vis_tail = (0.5 * x_visual[:, D_TXT:]) @ w_tail_f32.T                   # (B, 1024)

    # flatten the B x Q question loops of the torch forward into rows
    q_rows = q_feats.reshape(rows, D_TXT)
    opt_rows = opt_feats.reshape(rows, D_TXT)
    xvis_rows = jnp.repeat(x_visual[:, :D_TXT], Q, axis=0)                  # (rows, 768)
    vtail_rows = jnp.repeat(vis_tail, Q, axis=0)                            # (rows, 1024)

    # one big question tile; pad the row count up to the tile size
    rows8 = ((rows + 7) // 8) * 8
    tq = min(128, rows8)
    rows_p = ((rows + tq - 1) // tq) * tq
    pad = rows_p - rows
    if pad:
        q_rows = jnp.pad(q_rows, ((0, pad), (0, 0)))
        opt_rows = jnp.pad(opt_rows, ((0, pad), (0, 0)))
        xvis_rows = jnp.pad(xvis_rows, ((0, pad), (0, 0)))
        vtail_rows = jnp.pad(vtail_rows, ((0, pad), (0, 0)))

    fc1_b = params["fc1_b"].reshape(1, D_TXT)
    cls_b = params["cls_b"].reshape(1, NUM_CLASSES)

    def row_spec(d):
        return pl.BlockSpec((tq, d), lambda i: (i, 0))

    def const_spec(shape):
        return pl.BlockSpec(shape, lambda i: (0, 0))

    logits = pl.pallas_call(
        vqa_kernel,
        out_shape=jax.ShapeDtypeStruct((rows_p, NUM_CLASSES), jnp.float32),
        grid=(rows_p // tq,),
        in_specs=[
            row_spec(D_TXT),                   # question rows
            row_spec(D_TXT),                   # option rows (mean of 3 options)
            row_spec(D_TXT),                   # per-row x_visual[:, :768]
            row_spec(D_VIS),                   # per-row padded-gate tail term
            const_spec((D_TXT, D_TXT)),        # V  (bf16)
            const_spec((D_VIS, D_TXT)),        # W[:, :768]  (bf16)
            const_spec((D_TXT, D_VIS)),        # fc1 weight  (bf16)
            const_spec((1, D_TXT)),            # fc1 bias
            const_spec((NUM_CLASSES, D_TXT)),  # classifier weight (f32, tiny)
            const_spec((1, NUM_CLASSES)),      # classifier bias
        ],
        out_specs=pl.BlockSpec((tq, NUM_CLASSES), lambda i: (i, 0)),
        compiler_params=pltpu.CompilerParams(
            # keep this DMA-bound kernel on one TensorCore (megacore sharding
            # would duplicate the weight DMA) and well under v7x's 64 MiB VMEM.
            dimension_semantics=("arbitrary",),
            vmem_limit_bytes=32 << 20),
    )(q_rows, opt_rows, xvis_rows, vtail_rows, v_bf16, w_head, fc1_w_bf16,
      fc1_b, params["cls_w"], cls_b)

    return logits[:rows]


def init_params(key):
    """Deterministic init matching the module's shapes (kaiming_uniform a=sqrt(5)
    => uniform(+-1/sqrt(fan_in)); linear biases use the same bound)."""
    ks = jax.random.split(key, 6)

    def ku(k, shape, fan_in):
        bound = 1.0 / math.sqrt(fan_in)
        return jax.random.uniform(k, shape, jnp.float32, -bound, bound)

    return dict(
        V=ku(ks[0], (D_TXT, D_TXT), D_TXT),
        W=ku(ks[1], (D_VIS, D_VIS), D_VIS),
        fc1_w=ku(ks[2], (D_TXT, D_VIS), D_VIS),
        fc1_b=ku(ks[3], (D_TXT,), D_VIS),
        cls_w=ku(ks[4], (NUM_CLASSES, D_TXT), D_TXT),
        cls_b=ku(ks[5], (NUM_CLASSES,), D_TXT),
    )
    # note: self.U (1024x1024) is unused in the PyTorch forward, so it is omitted.


def reference(frame_embs, q_feats, opt_feats, params):
    """Pure-JAX reference of the same math.  Uses the bf16-rounded big weights
    (same quantization the kernel sees) with f32 activations, so the check
    isolates kernel correctness from the intentional weight quantization."""
    vq = params["V"].astype(jnp.bfloat16).astype(jnp.float32)
    wq = params["W"].astype(jnp.bfloat16).astype(jnp.float32)
    fq = params["fc1_w"].astype(jnp.bfloat16).astype(jnp.float32)
    outs = []
    for b in range(frame_embs.shape[0]):
        xv = _l2_normalize(jnp.mean(frame_embs[b], axis=0, keepdims=True))
        xt = _l2_normalize(q_feats[b]) + _l2_normalize(opt_feats[b])
        xt = xt @ vq.T
        xt = jnp.pad(xt, ((0, 0), (0, D_VIS - D_TXT)))
        xvt = xv * jax.nn.sigmoid(xt)
        xvt = jnp.maximum(xvt @ wq.T, 0.0)
        xvt = xvt @ fq.T + params["fc1_b"]
        mu = jnp.mean(xvt, axis=-1, keepdims=True)
        var = jnp.mean((xvt - mu) ** 2, axis=-1, keepdims=True)
        xvt = (xvt - mu) / jnp.sqrt(var + EPS_IN)
        outs.append(xvt @ params["cls_w"].T + params["cls_b"])
    return jnp.concatenate(outs, axis=0)


if __name__ == "__main__":
    key = jax.random.PRNGKey(0)
    pkey, dkey = jax.random.split(key)
    params = init_params(pkey)

    # Small, module-consistent shapes: 2 videos, 4 frames x 16 tokens of
    # 1024-d Perceiver features, 8 questions with 768-d BERT features,
    # 3 option embeddings per question.
    B, F_FRAMES, S_TOK, Q = 2, 4, 16, 8
    dks = jax.random.split(dkey, 3)
    # TODO(synk): Perceiver image encoder + BERT text encoder (pretrained
    # transformers) are stood in by synthetic embeddings below.
    frame_embs = jax.random.normal(dks[0], (B, F_FRAMES * S_TOK, D_VIS), jnp.float32)
    q_feats = jax.random.normal(dks[1], (B, Q, D_TXT), jnp.float32)
    opt_feats3 = jax.random.normal(dks[2], (B, Q, 3, D_TXT), jnp.float32)
    opt_feats = jnp.mean(opt_feats3, axis=2)   # mean over the 3 options (glue)

    logits_tensor = vqa_perceiver_forward(frame_embs, q_feats, opt_feats, params)
    logits_tensor = jax.block_until_ready(logits_tensor)

    ref = reference(frame_embs, q_feats, opt_feats, params)
    assert logits_tensor.shape == (B * Q, NUM_CLASSES)
    max_err = float(jnp.max(jnp.abs(logits_tensor - ref)))
    assert jnp.allclose(logits_tensor, ref, atol=2e-2, rtol=2e-2), max_err

    print("KERNEL_OK")
</pallas_src>

<mosaic_0001>
module attributes {stable_mosaic.version = 11 : i64} {
  func.func @vqa_kernel(%arg0: i32, %arg1: memref<16x768xf32, #tpu.memory_space<vmem>>, %arg2: memref<16x768xf32, #tpu.memory_space<vmem>>, %arg3: memref<16x768xf32, #tpu.memory_space<vmem>>, %arg4: memref<16x1024xf32, #tpu.memory_space<vmem>>, %arg5: memref<768x768xbf16, #tpu.memory_space<vmem>>, %arg6: memref<1024x768xbf16, #tpu.memory_space<vmem>>, %arg7: memref<768x1024xbf16, #tpu.memory_space<vmem>>, %arg8: memref<1x768xf32, #tpu.memory_space<vmem>>, %arg9: memref<3x768xf32, #tpu.memory_space<vmem>>, %arg10: memref<1x3xf32, #tpu.memory_space<vmem>>, %arg11: memref<16x3xf32, #tpu.memory_space<vmem>>) attributes {dimension_semantics = [#tpu.dimension_semantics<arbitrary>], iteration_bounds = array<i64: 1>, scalar_prefetch = 0 : i64, scratch_operands = 0 : i64, tpu.core_type = #tpu.core_type<tc>, window_params = [{transform_indices = @transform_0, window_bounds = array<i64: 16, 768>}, {transform_indices = @transform_1, window_bounds = array<i64: 16, 768>}, {transform_indices = @transform_2, window_bounds = array<i64: 16, 768>}, {transform_indices = @transform_3, window_bounds = array<i64: 16, 1024>}, {pipeline_mode = #tpu.pipeline_mode<synchronous>, transform_indices = @transform_4, window_bounds = array<i64: 768, 768>}, {pipeline_mode = #tpu.pipeline_mode<synchronous>, transform_indices = @transform_5, window_bounds = array<i64: 1024, 768>}, {pipeline_mode = #tpu.pipeline_mode<synchronous>, transform_indices = @transform_6, window_bounds = array<i64: 768, 1024>}, {pipeline_mode = #tpu.pipeline_mode<synchronous>, transform_indices = @transform_7, window_bounds = array<i64: 1, 768>}, {pipeline_mode = #tpu.pipeline_mode<synchronous>, transform_indices = @transform_8, window_bounds = array<i64: 3, 768>}, {pipeline_mode = #tpu.pipeline_mode<synchronous>, transform_indices = @transform_9, window_bounds = array<i64: 1, 3>}, {transform_indices = @transform_10, window_bounds = array<i64: 16, 3>}]} {
    %c0 = arith.constant 0 : index
    %c0_0 = arith.constant 0 : index
    %0 = vector.load %arg1[%c0, %c0_0] : memref<16x768xf32, #tpu.memory_space<vmem>>, vector<16x768xf32>
    %1 = arith.mulf %0, %0 : vector<16x768xf32>
    %cst = arith.constant dense<0.000000e+00> : vector<16xf32>
    %2 = vector.multi_reduction <add>, %1, %cst [1] : vector<16x768xf32> to vector<16xf32>
    %3 = vector.shape_cast %2 : vector<16xf32> to vector<16x1xf32>
    %4 = math.sqrt %3 : vector<16x1xf32>
    %cst_1 = arith.constant 9.99999996E-13 : f32
    %5 = vector.broadcast %cst_1 : f32 to vector<16x1xf32>
    %6 = arith.maximumf %4, %5 : vector<16x1xf32>
    %7 = vector.broadcast %6 : vector<16x1xf32> to vector<16x768xf32>
    %8 = arith.divf %0, %7 : vector<16x768xf32>
    %c0_2 = arith.constant 0 : index
    %c0_3 = arith.constant 0 : index
    %9 = vector.load %arg2[%c0_2, %c0_3] : memref<16x768xf32, #tpu.memory_space<vmem>>, vector<16x768xf32>
    %10 = arith.mulf %9, %9 : vector<16x768xf32>
    %cst_4 = arith.constant dense<0.000000e+00> : vector<16xf32>
    %11 = vector.multi_reduction <add>, %10, %cst_4 [1] : vector<16x768xf32> to vector<16xf32>
    %12 = vector.shape_cast %11 : vector<16xf32> to vector<16x1xf32>
    %13 = math.sqrt %12 : vector<16x1xf32>
    %cst_5 = arith.constant 9.99999996E-13 : f32
    %14 = vector.broadcast %cst_5 : f32 to vector<16x1xf32>
    %15 = arith.maximumf %13, %14 : vector<16x1xf32>
    %16 = vector.broadcast %15 : vector<16x1xf32> to vector<16x768xf32>
    %17 = arith.divf %9, %16 : vector<16x768xf32>
    %18 = arith.addf %8, %17 : vector<16x768xf32>
    %c0_6 = arith.constant 0 : index
    %c0_7 = arith.constant 0 : index
    %19 = vector.load %arg5[%c0_6, %c0_7] : memref<768x768xbf16, #tpu.memory_space<vmem>>, vector<768x768xbf16>
    %20 = arith.truncf %18 : vector<16x768xf32> to vector<16x768xbf16>
    %cst_8 = arith.constant dense<0.000000e+00> : vector<16x768xf32>
    %21 = tpu.matmul %20, %19, %cst_8 {dimension_numbers = #tpu.dot_dimension_numbers<[1], [1], [0], [0], [0, 0, 1, 0], [], []>} : vector<16x768xbf16>, vector<768x768xbf16>, vector<16x768xf32> -> vector<16x768xf32>
    %c0_9 = arith.constant 0 : index
    %c0_10 = arith.constant 0 : index
    %22 = vector.load %arg3[%c0_9, %c0_10] : memref<16x768xf32, #tpu.memory_space<vmem>>, vector<16x768xf32>
    %23 = arith.negf %21 : vector<16x768xf32>
    %24 = math.exp %23 : vector<16x768xf32>
    %cst_11 = arith.constant 1.000000e+00 : f32
    %25 = vector.broadcast %cst_11 : f32 to vector<16x768xf32>
    %26 = arith.addf %25, %24 : vector<16x768xf32>
    %27 = arith.divf %25, %26 : vector<16x768xf32>
    %28 = arith.mulf %22, %27 : vector<16x768xf32>
    %c0_12 = arith.constant 0 : index
    %c0_13 = arith.constant 0 : index
    %29 = vector.load %arg6[%c0_12, %c0_13] : memref<1024x768xbf16, #tpu.memory_space<vmem>>, vector<1024x768xbf16>
    %30 = arith.truncf %28 : vector<16x768xf32> to vector<16x768xbf16>
    %cst_14 = arith.constant dense<0.000000e+00> : vector<16x1024xf32>
    %31 = tpu.matmul %30, %29, %cst_14 {dimension_numbers = #tpu.dot_dimension_numbers<[1], [1], [0], [0], [0, 0, 1, 0], [], []>} : vector<16x768xbf16>, vector<1024x768xbf16>, vector<16x1024xf32> -> vector<16x1024xf32>
    %c0_15 = arith.constant 0 : index
    %c0_16 = arith.constant 0 : index
    %32 = vector.load %arg4[%c0_15, %c0_16] : memref<16x1024xf32, #tpu.memory_space<vmem>>, vector<16x1024xf32>
    %33 = arith.addf %31, %32 : vector<16x1024xf32>
    %cst_17 = arith.constant 0.000000e+00 : f32
    %34 = vector.broadcast %cst_17 : f32 to vector<16x1024xf32>
    %35 = arith.maximumf %33, %34 : vector<16x1024xf32>
    %c0_18 = arith.constant 0 : index
    %c0_19 = arith.constant 0 : index
    %36 = vector.load %arg7[%c0_18, %c0_19] : memref<768x1024xbf16, #tpu.memory_space<vmem>>, vector<768x1024xbf16>
    %37 = arith.truncf %35 : vector<16x1024xf32> to vector<16x1024xbf16>
    %cst_20 = arith.constant dense<0.000000e+00> : vector<16x768xf32>
    %38 = tpu.matmul %37, %36, %cst_20 {dimension_numbers = #tpu.dot_dimension_numbers<[1], [1], [0], [0], [0, 0, 1, 0], [], []>} : vector<16x1024xbf16>, vector<768x1024xbf16>, vector<16x768xf32> -> vector<16x768xf32>
    %c0_21 = arith.constant 0 : index
    %c0_22 = arith.constant 0 : index
    %39 = vector.load %arg8[%c0_21, %c0_22] : memref<1x768xf32, #tpu.memory_space<vmem>>, vector<1x768xf32>
    %40 = vector.broadcast %39 : vector<1x768xf32> to vector<16x768xf32>
    %41 = arith.addf %38, %40 : vector<16x768xf32>
    %cst_23 = arith.constant dense<0.000000e+00> : vector<16xf32>
    %42 = vector.multi_reduction <add>, %41, %cst_23 [1] : vector<16x768xf32> to vector<16xf32>
    %43 = vector.shape_cast %42 : vector<16xf32> to vector<16x1xf32>
    %cst_24 = arith.constant 7.680000e+02 : f32
    %44 = vector.broadcast %cst_24 : f32 to vector<16x1xf32>
    %45 = arith.divf %43, %44 : vector<16x1xf32>
    %46 = vector.broadcast %45 : vector<16x1xf32> to vector<16x768xf32>
    %47 = arith.subf %41, %46 : vector<16x768xf32>
    %48 = arith.mulf %47, %47 : vector<16x768xf32>
    %cst_25 = arith.constant dense<0.000000e+00> : vector<16xf32>
    %49 = vector.multi_reduction <add>, %48, %cst_25 [1] : vector<16x768xf32> to vector<16xf32>
    %50 = vector.shape_cast %49 : vector<16xf32> to vector<16x1xf32>
    %cst_26 = arith.constant 7.680000e+02 : f32
    %51 = vector.broadcast %cst_26 : f32 to vector<16x1xf32>
    %52 = arith.divf %50, %51 : vector<16x1xf32>
    %53 = vector.broadcast %45 : vector<16x1xf32> to vector<16x768xf32>
    %54 = arith.subf %41, %53 : vector<16x768xf32>
    %cst_27 = arith.constant 9.99999974E-6 : f32
    %55 = vector.broadcast %cst_27 : f32 to vector<16x1xf32>
    %56 = arith.addf %52, %55 : vector<16x1xf32>
    %57 = math.rsqrt %56 : vector<16x1xf32>
    %58 = vector.broadcast %57 : vector<16x1xf32> to vector<16x768xf32>
    %59 = arith.mulf %54, %58 : vector<16x768xf32>
    %c0_28 = arith.constant 0 : index
    %c0_29 = arith.constant 0 : index
    %60 = vector.load %arg9[%c0_28, %c0_29] : memref<3x768xf32, #tpu.memory_space<vmem>>, vector<3x768xf32>
    %cst_30 = arith.constant dense<0.000000e+00> : vector<16x3xf32>
    %61 = tpu.matmul %59, %60, %cst_30 {dimension_numbers = #tpu.dot_dimension_numbers<[1], [1], [0], [0], [0, 0, 1, 0], [], []>} : vector<16x768xf32>, vector<3x768xf32>, vector<16x3xf32> -> vector<16x3xf32>
    %c0_31 = arith.constant 0 : index
    %c0_32 = arith.constant 0 : index
    %62 = vector.load %arg10[%c0_31, %c0_32] : memref<1x3xf32, #tpu.memory_space<vmem>>, vector<1x3xf32>
    %63 = vector.broadcast %62 : vector<1x3xf32> to vector<16x3xf32>
    %64 = arith.addf %61, %63 : vector<16x3xf32>
    %c0_33 = arith.constant 0 : index
    %c0_34 = arith.constant 0 : index
    %65 = vector.load %arg11[%c0_33, %c0_34] : memref<16x3xf32, #tpu.memory_space<vmem>>, vector<16x3xf32>
    tpu.vector_store %arg11[%c0_33, %c0_34], %64 {strides = array<i32>} : memref<16x3xf32, #tpu.memory_space<vmem>>, vector<16x3xf32>,
    return
  }
  func.func @transform_0(%arg0: i32) -> (i32, i32) {
    %c0_i32 = arith.constant 0 : i32
    %c0_i32_0 = arith.constant 0 : i32
    return %arg0, %c0_i32 : i32, i32
  }
  func.func @transform_1(%arg0: i32) -> (i32, i32) {
    %c0_i32 = arith.constant 0 : i32
    %c0_i32_0 = arith.constant 0 : i32
    return %arg0, %c0_i32 : i32, i32
  }
  func.func @transform_2(%arg0: i32) -> (i32, i32) {
    %c0_i32 = arith.constant 0 : i32
    %c0_i32_0 = arith.constant 0 : i32
    return %arg0, %c0_i32 : i32, i32
  }
  func.func @transform_3(%arg0: i32) -> (i32, i32) {
    %c0_i32 = arith.constant 0 : i32
    %c0_i32_0 = arith.constant 0 : i32
    return %arg0, %c0_i32 : i32, i32
  }
  func.func @transform_4(%arg0: i32) -> (i32, i32) {
    %c0_i32 = arith.constant 0 : i32
    %c0_i32_0 = arith.constant 0 : i32
    %c0_i32_1 = arith.constant 0 : i32
    return %c0_i32, %c0_i32_0 : i32, i32
  }
  func.func @transform_5(%arg0: i32) -> (i32, i32) {
    %c0_i32 = arith.constant 0 : i32
    %c0_i32_0 = arith.constant 0 : i32
    %c0_i32_1 = arith.constant 0 : i32
    return %c0_i32, %c0_i32_0 : i32, i32
  }
  func.func @transform_6(%arg0: i32) -> (i32, i32) {
    %c0_i32 = arith.constant 0 : i32
    %c0_i32_0 = arith.constant 0 : i32
    %c0_i32_1 = arith.constant 0 : i32
    return %c0_i32, %c0_i32_0 : i32, i32
  }
  func.func @transform_7(%arg0: i32) -> (i32, i32) {
    %c0_i32 = arith.constant 0 : i32
    %c0_i32_0 = arith.constant 0 : i32
    %c0_i32_1 = arith.constant 0 : i32
    return %c0_i32, %c0_i32_0 : i32, i32
  }
  func.func @transform_8(%arg0: i32) -> (i32, i32) {
    %c0_i32 = arith.constant 0 : i32
    %c0_i32_0 = arith.constant 0 : i32
    %c0_i32_1 = arith.constant 0 : i32
    return %c0_i32, %c0_i32_0 : i32, i32
  }
  func.func @transform_9(%arg0: i32) -> (i32, i32) {
    %c0_i32 = arith.constant 0 : i32
    %c0_i32_0 = arith.constant 0 : i32
    %c0_i32_1 = arith.constant 0 : i32
    return %c0_i32, %c0_i32_0 : i32, i32
  }
  func.func @transform_10(%arg0: i32) -> (i32, i32) {
    %c0_i32 = arith.constant 0 : i32
    %c0_i32_0 = arith.constant 0 : i32
    return %arg0, %c0_i32 : i32, i32
  }
}

</mosaic_0001>

<bundles_post_ra>
// kernel: vqa_perceiver_forward.1
= control target key start
LH: loop header
LB: loop body
LE: loop exit
PB: predicated region body
PF: predicated region fallthrough
CT: control target
= control target key end

     0   :  { %vm8435_vm8 = vcmask 23552   ;;  %s14310_s1 = inlined_call_operand.vmem [shape: f32[16,768], index: 1, kind: input, shape index: {}]   ;;  %s14311_s0 = inlined_call_operand.vmem [shape: f32[16,768], index: 0, kind: input, shape index: {}]   ;;  %s14312_s4 = inlined_call_operand.vmem [shape: bf16[768,768], index: 4, kind: input, shape index: {}]   ;;  %s14313_s5 = inlined_call_operand.vmem [shape: bf16[1024,768], index: 5, kind: input, shape index: {}]   ;;  %s14314_s2 = inlined_call_operand.vmem [shape: f32[16,768], index: 2, kind: input, shape index: {}]   ;;  %s14315_s3 = inlined_call_operand.vmem [shape: f32[16,1024], index: 3, kind: input, shape index: {}]   ;;  %s14316_s6 = inlined_call_operand.vmem [shape: bf16[768,1024], index: 6, kind: input, shape index: {}]   ;;  %s14317_s7 = inlined_call_operand.vmem [shape: f32[1,768], index: 7, kind: input, shape index: {}]   ;;  %s14318_s8 = inlined_call_operand.vmem [shape: f32[3,768], index: 8, kind: input, shape index: {}]   ;;  %s14319_s9 = inlined_call_operand.vmem [shape: f32[1,3], index: 9, kind: input, shape index: {}]   ;;  %s14320_s10 = inlined_call_operand.vmem [shape: f32[16,3], index: 10, kind: output, shape index: {}]  }
   0x1   :  { %v103_v0 = vld [vmem:[%s14310_s1] sm:$0xff]  ;;  %v104_v1 = vld [vmem:[%s14310_s1 + $0x8] sm:$0xff]  ;;  %v105_v2 = vld [vmem:[%s14310_s1 + $0x10] sm:$0xff] }
   0x2   :  { %v106_v3 = vld [vmem:[%s14310_s1 + $0x18] sm:$0xff]  ;;  %v107_v4 = vld [vmem:[%s14310_s1 + $0x20] sm:$0xff]  ;;  %v115_v5 = vmul.f32 %v103_v0, %v103_v0  ;;  %v116_v6 = vmul.f32 %v104_v1, %v104_v1  ;;  %v117_v7 = vmul.f32 %v105_v2, %v105_v2  ;;  %v36_v10 = vld [vmem:[%s14311_s0 + $0x8] sm:$0xff] }
   0x3   :  { %v118_v8 = vmul.f32 %v106_v3, %v106_v3  ;;  %v35_v9 = vld [vmem:[%s14311_s0] sm:$0xff]  ;;  %v37_v11 = vld [vmem:[%s14311_s0 + $0x10] sm:$0xff]  ;;  %v108_v12 = vld [vmem:[%s14310_s1 + $0x28] sm:$0xff]  ;;  %v48_v17 = vmul.f32 %v36_v10, %v36_v10  ;;  %v119_v19 = vmul.f32 %v107_v4, %v107_v4 }
   0x4   :  { %v127_v13 = vadd.f32 %v116_v6, %v115_v5  ;;  %v38_v14 = vld [vmem:[%s14311_s0 + $0x18] sm:$0xff]  ;;  %v39_v15 = vld [vmem:[%s14311_s0 + $0x20] sm:$0xff]  ;;  %v47_v16 = vmul.f32 %v35_v9, %v35_v9  ;;  %v49_v18 = vmul.f32 %v37_v11, %v37_v11  ;;  %v109_v21 = vld [vmem:[%s14310_s1 + $0x30] sm:$0xff]  ;;  %v120_v31 = vmul.f32 %v108_v12, %v108_v12 }
   0x5   :  { %v50_v20 = vmul.f32 %v38_v14, %v38_v14  ;;  %v110_v22 = vld [vmem:[%s14310_s1 + $0x38] sm:$0xff]  ;;  %v111_v23 = vld [vmem:[%s14310_s1 + $0x40] sm:$0xff]  ;;  %v40_v25 = vld [vmem:[%s14311_s0 + $0x28] sm:$0xff]  ;;  %v121_v29 = vmul.f32 %v109_v21, %v109_v21  ;;  %v51_v32 = vmul.f32 %v39_v15, %v39_v15 }
   0x6   :  { %v128_v24 = vadd.f32 %v127_v13, %v117_v7  ;;  %v59_v26 = vadd.f32 %v48_v17, %v47_v16  ;;  %v112_v27 = vld [vmem:[%s14310_s1 + $0x48] sm:$0xff]  ;;  %v113_v28 = vld [vmem:[%s14310_s1 + $0x50] sm:$0xff]  ;;  %v122_v30 = vmul.f32 %v110_v22, %v110_v22  ;;  %v123_v33 = vmul.f32 %v111_v23, %v111_v23  ;;  %v42_v36 = vld [vmem:[%s14311_s0 + $0x38] sm:$0xff] }
   0x7   :  { %v124_v34 = vmul.f32 %v112_v27, %v112_v27  ;;  %v41_v35 = vld [vmem:[%s14311_s0 + $0x30] sm:$0xff]  ;;  %v43_v37 = vld [vmem:[%s14311_s0 + $0x40] sm:$0xff]  ;;  %v114_v40 = vld [vmem:[%s14310_s1 + $0x58] sm:$0xff]  ;;  %v52_v45 = vmul.f32 %v40_v25, %v40_v25  ;;  %v54_v46 = vmul.f32 %v42_v36, %v42_v36  ;;  %v125_v51 = vmul.f32 %v113_v28, %v113_v28 }
   0x8   :  { %v129_v38 = vadd.f32 %v128_v24, %v118_v8  ;;  %v60_v39 = vadd.f32 %v59_v26, %v49_v18  ;;  %v134_v41 = vadd.f32 %v122_v30, %v121_v29  ;;  %v44_v42 = vld [vmem:[%s14311_s0 + $0x48] sm:$0xff]  ;;  %v45_v43 = vld [vmem:[%s14311_s0 + $0x50] sm:$0xff]  ;;  %v53_v44 = vmul.f32 %v41_v35, %v41_v35  ;;  %v46_v53 = vld [vmem:[%s14311_s0 + $0x58] sm:$0xff] }
   0x9   :  { %v55_v47 = vmul.f32 %v43_v37, %v43_v37  ;;  %v9511_v48 = vld [vmem:[%s14312_s4 + $0x154] ss:$24 sps:$4 sm:$0xff]   ;;  %v56_v55 = vmul.f32 %v44_v42, %v44_v42  ;;  %v9515_v57 = vld [vmem:[%s14312_s4 + $0x150] ss:$24 sps:$4 sm:$0xff]   ;;  %v126_v61 = vmul.f32 %v114_v40, %v114_v40  ;;  %v9517_v63 = vld [vmem:[%s14312_s4 + $0x124] ss:$24 sps:$4 sm:$0xff]   ;;  %v57_v0 = vmul.f32 %v45_v43, %v45_v43 }
   0xa   :  { %v130_v49 = vadd.f32 %v129_v38, %v119_v19  ;;  %v61_v50 = vadd.f32 %v60_v39, %v50_v20  ;;  %v135_v52 = vadd.f32 %v134_v41, %v123_v33  ;;  %v9513_v54 = vld [vmem:[%s14312_s4 + $0x15c] ss:$24 sps:$4 sm:$0xff]   ;;  %v66_v56 = vadd.f32 %v54_v46, %v53_v44  ;;  %1917 = vmatprep.subr.bf16.mxu0 %v9511_v48  ;;  %v9516_v58 = vld [vmem:[%s14312_s4 + $0x158] ss:$24 sps:$4 sm:$0xff]   ;;  %v9519_v2 = vld [vmem:[%s14312_s4 + $0x12c] ss:$24 sps:$4 sm:$0xff]  }
   0xb   :  { %1960 = vmatprep.subr.bf16.mxu1 %v9513_v54  ;;  %1918 = vmatpush1.bf16.xpose.msra.mxu0 %v9515_v57  ;;  %v58_v5 = vmul.f32 %v46_v53, %v46_v53  ;;  %v9521_v8 = vld [vmem:[%s14312_s4 + $0x120] ss:$24 sps:$4 sm:$0xff]   ;;  %v9523_v11 = vld [vmem:[%s14312_s4 + $0xf4] ss:$24 sps:$4 sm:$0xff]   ;;  %v9527_v14 = vld [vmem:[%s14312_s4 + $0xf0] ss:$24 sps:$4 sm:$0xff]  }
   0xc   :  { %v131_v59 = vadd.f32 %v130_v49, %v120_v31  ;;  %v62_v60 = vadd.f32 %v61_v50, %v51_v32  ;;  %v136_v62 = vadd.f32 %v135_v52, %v124_v34  ;;  %v67_v1 = vadd.f32 %v66_v56, %v55_v47  ;;  %1961 = vmatpush1.bf16.xpose.msra.mxu1 %v9516_v58  ;;  %v9522_v10 = vld [vmem:[%s14312_s4 + $0x128] ss:$24 sps:$4 sm:$0xff]   ;;  %v9525_v13 = vld [vmem:[%s14312_s4 + $0xfc] ss:$24 sps:$4 sm:$0xff]   ;;  %v9528_v15 = vld [vmem:[%s14312_s4 + $0xf8] ss:$24 sps:$4 sm:$0xff]  }
   0xd   :  { %1919 = vmatprep.subr.bf16.mxu0 %v9517_v63  ;;  %1962 = vmatprep.subr.bf16.mxu1 %v9519_v2  ;;  %v9529_v16 = vld [vmem:[%s14312_s4 + $0xc4] ss:$24 sps:$4 sm:$0xff]   ;;  %v9533_v18 = vld [vmem:[%s14312_s4 + $0xc0] ss:$24 sps:$4 sm:$0xff]   ;;  %v9535_v20 = vld [vmem:[%s14312_s4 + $0x94] ss:$24 sps:$4 sm:$0xff]  }
   0xe   :  { %132 = vadd.xlane.f32.xlu1 %v131_v59  ;;  %v63_v3 = vadd.f32 %v62_v60, %v52_v45  ;;  %v137_v4 = vadd.f32 %v136_v62, %v125_v51  ;;  %v68_v6 = vadd.f32 %v67_v1, %v56_v55  ;;  %v9531_v17 = vld [vmem:[%s14312_s4 + $0xcc] ss:$24 sps:$4 sm:$0xff]   ;;  %v9534_v19 = vld [vmem:[%s14312_s4 + $0xc8] ss:$24 sps:$4 sm:$0xff]   ;;  %v9537_v21 = vld [vmem:[%s14312_s4 + $0x9c] ss:$24 sps:$4 sm:$0xff]  }
   0xf   :  { %v9539_v22 = vld [vmem:[%s14312_s4 + $0x90] ss:$24 sps:$4 sm:$0xff]   ;;  %v9541_v24 = vld [vmem:[%s14312_s4 + $0x64] ss:$24 sps:$4 sm:$0xff]   ;;  %v9545_v26 = vld [vmem:[%s14312_s4 + $0x60] ss:$24 sps:$4 sm:$0xff]  }
  0x10   :  { %64 = vadd.xlane.f32.xlu0 %v63_v3  ;;  %v138_v7 = vadd.f32 %v137_v4, %v126_v61  ;;  %v69_v9 = vadd.f32 %v68_v6, %v57_v0  ;;  %v9540_v23 = vld [vmem:[%s14312_s4 + $0x98] ss:$24 sps:$4 sm:$0xff]   ;;  %v9543_v25 = vld [vmem:[%s14312_s4 + $0x6c] ss:$24 sps:$4 sm:$0xff]   ;;  %v9546_v27 = vld [vmem:[%s14312_s4 + $0x68] ss:$24 sps:$4 sm:$0xff]  }
  0x11   :  { %v9547_v28 = vld [vmem:[%s14312_s4 + $0x34] ss:$24 sps:$4 sm:$0xff]   ;;  %v9551_v30 = vld [vmem:[%s14312_s4 + $0x30] ss:$24 sps:$4 sm:$0xff]   ;;  %v9553_v32 = vld [vmem:[%s14312_s4 + $0x4] ss:$24 sps:$4 sm:$0xff]  }
  0x12   :  { %139 = vadd.xlane.f32.xlu1 %v138_v7  ;;  %v70_v12 = vadd.f32 %v69_v9, %v58_v5  ;;  %v9549_v29 = vld [vmem:[%s14312_s4 + $0x3c] ss:$24 sps:$4 sm:$0xff]   ;;  %v9552_v31 = vld [vmem:[%s14312_s4 + $0x38] ss:$24 sps:$4 sm:$0xff]   ;;  %v9555_v33 = vld [vmem:[%s14312_s4 + $0xc] ss:$24 sps:$4 sm:$0xff]  }
  0x13   :  { %1920 = vmatpush1.bf16.xpose.msra.mxu0 %v9521_v8  ;;  %v9557_v34 = vld [vmem:[%s14312_s4] ss:$24 sps:$4 sm:$0xff]   ;;  %v9559_v36 = vld [vmem:[%s14312_s4 + $0x2d4] ss:$24 sps:$4 sm:$0xff]   ;;  %v9563_v38 = vld [vmem:[%s14312_s4 + $0x2d0] ss:$24 sps:$4 sm:$0xff]  }
  0x14   :  { %71 = vadd.xlane.f32.xlu0 %v70_v12  ;;  %1963 = vmatpush1.bf16.xpose.msra.mxu1 %v9522_v10  ;;  %v9558_v35 = vld [vmem:[%s14312_s4 + $0x8] ss:$24 sps:$4 sm:$0xff]   ;;  %v9561_v37 = vld [vmem:[%s14312_s4 + $0x2dc] ss:$24 sps:$4 sm:$0xff]   ;;  %v9564_v39 = vld [vmem:[%s14312_s4 + $0x2d8] ss:$24 sps:$4 sm:$0xff]  }
  0x15   :  { %1921 = vmatprep.subr.bf16.mxu0 %v9523_v11  ;;  %1964 = vmatprep.subr.bf16.mxu1 %v9525_v13  ;;  %v9565_v40 = vld [vmem:[%s14312_s4 + $0x2a4] ss:$24 sps:$4 sm:$0xff]   ;;  %v9569_v42 = vld [vmem:[%s14312_s4 + $0x2a0] ss:$24 sps:$4 sm:$0xff]   ;;  %v9571_v44 = vld [vmem:[%s14312_s4 + $0x274] ss:$24 sps:$4 sm:$0xff]  }
  0x16   :  { %v9567_v41 = vld [vmem:[%s14312_s4 + $0x2ac] ss:$24 sps:$4 sm:$0xff]   ;;  %v9570_v43 = vld [vmem:[%s14312_s4 + $0x2a8] ss:$24 sps:$4 sm:$0xff]   ;;  %v9573_v45 = vld [vmem:[%s14312_s4 + $0x27c] ss:$24 sps:$4 sm:$0xff]  }
  0x17   :  { %v9575_v46 = vld [vmem:[%s14312_s4 + $0x270] ss:$24 sps:$4 sm:$0xff]   ;;  %v9577_v48 = vld [vmem:[%s14312_s4 + $0x244] ss:$24 sps:$4 sm:$0xff]   ;;  %v9581_v50 = vld [vmem:[%s14312_s4 + $0x240] ss:$24 sps:$4 sm:$0xff]  }
  0x18   :  { %v9576_v47 = vld [vmem:[%s14312_s4 + $0x278] ss:$24 sps:$4 sm:$0xff]   ;;  %v9579_v49 = vld [vmem:[%s14312_s4 + $0x24c] ss:$24 sps:$4 sm:$0xff]   ;;  %v9582_v51 = vld [vmem:[%s14312_s4 + $0x248] ss:$24 sps:$4 sm:$0xff]  }
  0x19   :  { %v9583_v52 = vld [vmem:[%s14312_s4 + $0x214] ss:$24 sps:$4 sm:$0xff]   ;;  %v9587_v54 = vld [vmem:[%s14312_s4 + $0x210] ss:$24 sps:$4 sm:$0xff]   ;;  %v9589_v56 = vld [vmem:[%s14312_s4 + $0x1e4] ss:$24 sps:$4 sm:$0xff]  }
  0x1a   :  { %v9585_v53 = vld [vmem:[%s14312_s4 + $0x21c] ss:$24 sps:$4 sm:$0xff]   ;;  %v9588_v55 = vld [vmem:[%s14312_s4 + $0x218] ss:$24 sps:$4 sm:$0xff]   ;;  %v9591_v57 = vld [vmem:[%s14312_s4 + $0x1ec] ss:$24 sps:$4 sm:$0xff]  }
  0x1b   :  { %1922 = vmatpush1.bf16.xpose.msra.mxu0 %v9527_v14  ;;  %v9593_v58 = vld [vmem:[%s14312_s4 + $0x1e0] ss:$24 sps:$4 sm:$0xff]   ;;  %v9595_v60 = vld [vmem:[%s14312_s4 + $0x1b4] ss:$24 sps:$4 sm:$0xff]   ;;  %v9599_v62 = vld [vmem:[%s14312_s4 + $0x1b0] ss:$24 sps:$4 sm:$0xff]  }
  0x1c   :  { %1965 = vmatpush1.bf16.xpose.msra.mxu1 %v9528_v15  ;;  %1923 = vmatprep.subr.bf16.mxu0 %v9529_v16  ;;  %v9594_v59 = vld [vmem:[%s14312_s4 + $0x1e8] ss:$24 sps:$4 sm:$0xff]   ;;  %v9597_v61 = vld [vmem:[%s14312_s4 + $0x1bc] ss:$24 sps:$4 sm:$0xff]   ;;  %v9600_v63 = vld [vmem:[%s14312_s4 + $0x1b8] ss:$24 sps:$4 sm:$0xff]  }
  0x1d   :  { %1966 = vmatprep.subr.bf16.mxu1 %v9531_v17  ;;  %v9601_v0 = vld [vmem:[%s14312_s4 + $0x184] ss:$24 sps:$4 sm:$0xff]   ;;  %v9605_v2 = vld [vmem:[%s14312_s4 + $0x180] ss:$24 sps:$4 sm:$0xff]   ;;  %v9612_v5 = vld [vmem:[%s14312_s4 + $0x454] ss:$24 sps:$4 sm:$0xff]  }
  0x1e   :  { %v9603_v1 = vld [vmem:[%s14312_s4 + $0x18c] ss:$24 sps:$4 sm:$0xff]   ;;  %v9606_v3 = vld [vmem:[%s14312_s4 + $0x188] ss:$24 sps:$4 sm:$0xff]  }
  0x1f   :  { %v9609_v4 = vld [vmem:[%s14312_s4 + $0x164] ss:$24 sps:$4 sm:$0xff]  }
  0x23   :  { %1924 = vmatpush1.bf16.xpose.msra.mxu0 %v9533_v18 }
  0x24   :  { %1967 = vmatpush1.bf16.xpose.msra.mxu1 %v9534_v19  ;;  %1925 = vmatprep.subr.bf16.mxu0 %v9535_v20 }
  0x25   :  { %1968 = vmatprep.subr.bf16.mxu1 %v9537_v21 }
  0x2b   :  { %1926 = vmatpush1.bf16.xpose.msra.mxu0 %v9539_v22 }
  0x2c   :  { %1969 = vmatpush1.bf16.xpose.msra.mxu1 %v9540_v23  ;;  %1927 = vmatprep.subr.bf16.mxu0 %v9541_v24 }
  0x2d   :  { %1970 = vmatprep.subr.bf16.mxu1 %v9543_v25 }
  0x33   :  { %1928 = vmatpush1.bf16.xpose.msra.mxu0 %v9545_v26 }
  0x34   :  { %1971 = vmatpush1.bf16.xpose.msra.mxu1 %v9546_v27  ;;  %1929 = vmatprep.subr.bf16.mxu0 %v9547_v28 }
  0x35   :  { %1972 = vmatprep.subr.bf16.mxu1 %v9549_v29 }
  0x3b   :  { %1930 = vmatpush1.bf16.xpose.msra.mxu0 %v9551_v30 }
  0x3c   :  { %1973 = vmatpush1.bf16.xpose.msra.mxu1 %v9552_v31  ;;  %1931 = vmatprep.subr.bf16.mxu0 %v9553_v32 }
  0x3d   :  { %1974 = vmatprep.subr.bf16.mxu1 %v9555_v33 }
  0x43   :  { %1932 = vmatpush1.bf16.xpose.msra.mxu0 %v9557_v34 }
  0x44   :  { %1975 = vmatpush1.bf16.xpose.msra.mxu1 %v9558_v35  ;;  %1933 = vmatprep.subr.bf16.mxu0 %v9559_v36  ;;  %v10590_v36 = vld [vmem:[%s14310_s1 + $0x8] sm:$0xff] }
  0x45   :  { %1976 = vmatprep.subr.bf16.mxu1 %v9561_v37 }
  0x4b   :  { %1934 = vmatpush2.bf16.xpose.msra.mxu0 %v9563_v38  ;;  %v10591_v38 = vld [vmem:[%s14311_s0 + $0x8] sm:$0xff] }
  0x4c   :  { %1977 = vmatpush2.bf16.xpose.msra.mxu1 %v9564_v39  ;;  %1935 = vmatprep.subr.bf16.mxu0 %v9565_v40  ;;  %v10592_v40 = vld [vmem:[%s14311_s0 + $0x18] sm:$0xff] }
  0x4d   :  { %1978 = vmatprep.subr.bf16.mxu1 %v9567_v41 }
  0x53   :  { %1936 = vmatpush2.bf16.xpose.msra.mxu0 %v9569_v42  ;;  %v10593_v42 = vld [vmem:[%s14310_s1 + $0x18] sm:$0xff] }
  0x54   :  { %1979 = vmatpush2.bf16.xpose.msra.mxu1 %v9570_v43  ;;  %1937 = vmatprep.subr.bf16.mxu0 %v9571_v44  ;;  %v10594_v44 = vld [vmem:[%s14310_s1 + $0x20] sm:$0xff] }
  0x55   :  { %1980 = vmatprep.subr.bf16.mxu1 %v9573_v45 }
  0x5b   :  { %1938 = vmatpush2.bf16.xpose.msra.mxu0 %v9575_v46 }
  0x5c   :  { %1981 = vmatpush2.bf16.xpose.msra.mxu1 %v9576_v47  ;;  %1939 = vmatprep.subr.bf16.mxu0 %v9577_v48  ;;  %v10595_v47 = vld [vmem:[%s14310_s1] sm:$0xff] }
  0x5d   :  { %1982 = vmatprep.subr.bf16.mxu1 %v9579_v49  ;;  %v10596_v49 = vld [vmem:[%s14310_s1 + $0x10] sm:$0xff] }
  0x63   :  { %1940 = vmatpush2.bf16.xpose.msra.mxu0 %v9581_v50 }
  0x64   :  { %1983 = vmatpush2.bf16.xpose.msra.mxu1 %v9582_v51  ;;  %1941 = vmatprep.subr.bf16.mxu0 %v9583_v52  ;;  %v10597_v51 = vld [vmem:[%s14310_s1 + $0x28] sm:$0xff] }
  0x65   :  { %1984 = vmatprep.subr.bf16.mxu1 %v9585_v53  ;;  %v10598_v53 = vld [vmem:[%s14311_s0 + $0x20] sm:$0xff] }
  0x6b   :  { %1942 = vmatpush2.bf16.xpose.msra.mxu0 %v9587_v54 }
  0x6c   :  { %1985 = vmatpush2.bf16.xpose.msra.mxu1 %v9588_v55  ;;  %1943 = vmatprep.subr.bf16.mxu0 %v9589_v56  ;;  %v10599_v55 = vld [vmem:[%s14310_s1 + $0x38] sm:$0xff] }
  0x6d   :  { %1986 = vmatprep.subr.bf16.mxu1 %v9591_v57  ;;  %v10600_v57 = vld [vmem:[%s14311_s0] sm:$0xff] }
  0x73   :  { %1944 = vmatpush2.bf16.xpose.msra.mxu0 %v9593_v58 }
  0x74   :  { %1987 = vmatpush2.bf16.xpose.msra.mxu1 %v9594_v59  ;;  %1945 = vmatprep.subr.bf16.mxu0 %v9595_v60  ;;  %v10601_v59 = vld [vmem:[%s14311_s0 + $0x10] sm:$0xff] }
  0x75   :  { %1988 = vmatprep.subr.bf16.mxu1 %v9597_v61  ;;  %v10602_v61 = vld [vmem:[%s14311_s0 + $0x28] sm:$0xff] }
  0x7b   :  { %1946 = vmatpush2.bf16.xpose.msra.mxu0 %v9599_v62 }
  0x7c   :  { %1989 = vmatpush2.bf16.xpose.msra.mxu1 %v9600_v63  ;;  %1947 = vmatprep.subr.bf16.mxu0 %v9601_v0  ;;  %v10603_v0 = vld [vmem:[%s14310_s1 + $0x48] sm:$0xff] }
  0x7d   :  { %1990 = vmatprep.subr.bf16.mxu1 %v9603_v1 }
  0x83   :  { %1948 = vmatpush2.bf16.xpose.msra.mxu0 %v9605_v2  ;;  %v10604_v2 = vld [vmem:[%s14310_s1 + $0x30] sm:$0xff] }
  0x84   :  { %1991 = vmatpush2.bf16.xpose.msra.mxu1 %v9606_v3  ;;  %2003 = vmatprep.subr.bf16.mxu0 %v9609_v4  ;;  %v10605_v4 = vld [vmem:[%s14310_s1 + $0x40] sm:$0xff] }
  0x85   :  { %2046 = vmatprep.subr.bf16.mxu1 %v9612_v5 }
  0x97   :  { %v133_v6 = vpop.xlane.xlu1 %132 }
  0x98   :  { %10522 = vrsqrt.f32 %v133_v6  ;;  %vm143_vm0 = vcmp.eq.f32.partialorder %v133_v6, inf  ;;  %v146_v13 = vand.u32 2147483648, %v133_v6  ;;  %vm145_vm1 = vcmp.eq.f32.partialorder %v133_v6, 0.0 }
  0x99   :  { %v65_v7 = vpop.xlane.xlu0 %64 }
  0x9a   :  { %10524 = vrsqrt.f32 %v65_v7  ;;  %vm75_vm2 = vcmp.eq.f32.partialorder %v65_v7, inf  ;;  %v78_v18 = vand.u32 2147483648, %v65_v7  ;;  %vm77_vm3 = vcmp.eq.f32.partialorder %v65_v7, 0.0 }
  0x9b   :  { %v140_v8 = vpop.xlane.xlu1 %139 }
  0x9c   :  { %10526 = vrsqrt.f32 %v140_v8  ;;  %vm150_vm4 = vcmp.eq.f32.partialorder %v140_v8, inf  ;;  %v153_v23 = vand.u32 2147483648, %v140_v8  ;;  %vm152_vm5 = vcmp.eq.f32.partialorder %v140_v8, 0.0 }
  0x9d   :  { %v72_v9 = vpop.xlane.xlu0 %71 }
  0x9e   :  { %10528 = vrsqrt.f32 %v72_v9  ;;  %vm82_vm6 = vcmp.eq.f32.partialorder %v72_v9, inf  ;;  %v85_v30 = vand.u32 2147483648, %v72_v9  ;;  %vm84_vm7 = vcmp.eq.f32.partialorder %v72_v9, 0.0 }
  0xa5   :  { %v10523_v10 = vpop.eup %10522 }
  0xa6   :  { %v142_v11 = vmul.f32 %v10523_v10, %v133_v6  ;;  %v10607_v10 = vld [vmem:[%s14310_s1 + $0x50] sm:$0xff] }
  0xa7   :  { %v10525_v12 = vpop.eup %10524 }
  0xa8   :  { %v144_v14 = vsel %vm143_vm0, %v133_v6, %v142_v11  ;;  %v74_v15 = vmul.f32 %v10525_v12, %v65_v7 }
  0xa9   :  { %v10527_v16 = vpop.eup %10526  ;;  %v147_v17 = vsel %vm145_vm1, %v146_v13, %v144_v14  ;;  %v10608_v13 = vld [vmem:[%s14311_s0 + $0x38] sm:$0xff] }
  0xaa   :  { %v155_v19 = vmax.f32 %v147_v17, 1e-12  ;;  %v76_v20 = vsel %vm75_vm2, %v65_v7, %v74_v15  ;;  %v149_v21 = vmul.f32 %v10527_v16, %v140_v8  ;;  %v10609_v15 = vld [vmem:[%s14311_s0 + $0x48] sm:$0xff]  ;;  %v10610_v17 = vld [vmem:[%s14311_s0 + $0x30] sm:$0xff] }
  0xab   :  { %v79_v22 = vsel %vm77_vm3, %v78_v18, %v76_v20  ;;  %v10529_v24 = vpop.eup %10528 }
  0xac   :  { %10530 = vrcp.f32 %v155_v19  ;;  %v87_v25 = vmax.f32 %v79_v22, 1e-12  ;;  %v151_v26 = vsel %vm150_vm4, %v140_v8, %v149_v21  ;;  %v81_v28 = vmul.f32 %v10529_v24, %v72_v9  ;;  %v10606_v8 = vld [vmem:[%s14310_s1 + $0x58] sm:$0xff]  ;;  %v10611_v19 = vld [vmem:[%s14311_s0 + $0x40] sm:$0xff] }
  0xad   :  { %v154_v27 = vsel %vm152_vm5, %v153_v23, %v151_v26  ;;  %v10612_v23 = vld [vmem:[%s14311_s0 + $0x58] sm:$0xff] }
  0xae   :  { %10532 = vrcp.f32 %v87_v25  ;;  %v156_v29 = vmax.f32 %v154_v27, 1e-12  ;;  %v83_v31 = vsel %vm82_vm6, %v72_v9, %v81_v28  ;;  %v10613_v25 = vld [vmem:[%s14311_s0 + $0x50] sm:$0xff] }
  0xaf   :  { %v86_v32 = vsel %vm84_vm7, %v85_v30, %v83_v31 }
  0xb0   :  { %10534 = vrcp.f32 %v156_v29  ;;  %v88_v33 = vmax.f32 %v86_v32, 1e-12 }
  0xb2   :  { %10536 = vrcp.f32 %v88_v33 }
  0xb9   :  { %v10531_v34 = vpop.eup %10530 }
  0xba   :  { %v159_v37 = vmul.f32 %v10590_v36, %v10531_v34  ;;  %v161_v43 = vmul.f32 %v10593_v42, %v10531_v34  ;;  %v162_v45 = vmul.f32 %v10594_v44, %v10531_v34  ;;  %v158_v48 = vmul.f32 %v10595_v47, %v10531_v34  ;;  %v9610_v36 = vld [vmem:[%s14312_s4 + $0x450] ss:$24 sps:$4 sm:$0xff]   ;;  %v9618_v42 = vld [vmem:[%s14312_s4 + $0x424] ss:$24 sps:$4 sm:$0xff]   ;;  %v9624_v47 = vld [vmem:[%s14312_s4 + $0x3f4] ss:$24 sps:$4 sm:$0xff]  }
  0xbb   :  { %v10533_v35 = vpop.eup %10532  ;;  %v160_v50 = vmul.f32 %v10596_v49, %v10531_v34  ;;  %v163_v52 = vmul.f32 %v10597_v51, %v10531_v34  ;;  %v9613_v44 = vld [vmem:[%s14312_s4 + $0x130] ss:$24 sps:$4 sm:$0xff]   ;;  %v9630_v51 = vld [vmem:[%s14312_s4 + $0x3c4] ss:$24 sps:$4 sm:$0xff]  }
  0xbc   :  { %v91_v39 = vmul.f32 %v10591_v38, %v10533_v35  ;;  %v93_v41 = vmul.f32 %v10592_v40, %v10533_v35  ;;  %v94_v54 = vmul.f32 %v10598_v53, %v10533_v35  ;;  %v90_v58 = vmul.f32 %v10600_v57, %v10533_v35  ;;  %v9622_v49 = vld [vmem:[%s14312_s4 + $0x3f0] ss:$24 sps:$4 sm:$0xff]   ;;  %v9628_v53 = vld [vmem:[%s14312_s4 + $0x3c0] ss:$24 sps:$4 sm:$0xff]  }
  0xbd   :  { %v10535_v46 = vpop.eup %10534  ;;  %v92_v60 = vmul.f32 %v10601_v59, %v10533_v35  ;;  %v95_v62 = vmul.f32 %v10602_v61, %v10533_v35  ;;  %v9607_v35 = vld [vmem:[%s14312_s4 + $0x160] ss:$24 sps:$4 sm:$0xff]   ;;  %v9634_v57 = vld [vmem:[%s14312_s4 + $0x390] ss:$24 sps:$4 sm:$0xff]   ;;  %v9642_v59 = vld [vmem:[%s14312_s4 + $0x364] ss:$24 sps:$4 sm:$0xff]  }
  0xbe   :  { %v166_v56 = vmul.f32 %v10599_v55, %v10535_v46  ;;  %v172_v63 = vadd.f32 %v159_v37, %v91_v39  ;;  %v168_v1 = vmul.f32 %v10603_v0, %v10535_v46  ;;  %v165_v3 = vmul.f32 %v10604_v2, %v10535_v46  ;;  %v9636_v55 = vld [vmem:[%s14312_s4 + $0x394] ss:$24 sps:$4 sm:$0xff]   ;;  %v9640_v61 = vld [vmem:[%s14312_s4 + $0x360] ss:$24 sps:$4 sm:$0xff]  }
  0xbf   :  { %v167_v5 = vmul.f32 %v10605_v4, %v10535_v46  ;;  %v10537_v6 = vpop.eup %10536  ;;  %v174_v7 = vadd.f32 %v161_v43, %v93_v41  ;;  %v170_v9 = vmul.f32 %v10606_v8, %v10535_v46  ;;  %v169_v11 = vmul.f32 %v10607_v10, %v10535_v46  ;;  %v9615_v41 = vld [vmem:[%s14312_s4 + $0x134] ss:$24 sps:$4 sm:$0xff]   ;;  %v9621_v46 = vld [vmem:[%s14312_s4 + $0x104] ss:$24 sps:$4 sm:$0xff]   ;;  %v9643_v0 = vld [vmem:[%s14312_s4 + $0x40] ss:$24 sps:$4 sm:$0xff]  }
  0xc0   :  { %v175_v12 = vadd.f32 %v162_v45, %v94_v54  ;;  %v98_v14 = vmul.f32 %v10608_v13, %v10537_v6  ;;  %v100_v16 = vmul.f32 %v10609_v15, %v10537_v6  ;;  %v97_v18 = vmul.f32 %v10610_v17, %v10537_v6  ;;  %v9616_v45 = vld [vmem:[%s14312_s4 + $0x420] ss:$24 sps:$4 sm:$0xff]   ;;  %v9633_v54 = vld [vmem:[%s14312_s4 + $0xa4] ss:$24 sps:$4 sm:$0xff]   ;;  %v9651_v2 = vld [vmem:[%s14312_s4 + $0x14] ss:$24 sps:$4 sm:$0xff]  }
  0xc1   :  { %v99_v20 = vmul.f32 %v10611_v19, %v10537_v6  ;;  %v171_v21 = vadd.f32 %v158_v48, %v90_v58  ;;  %v173_v22 = vadd.f32 %v160_v50, %v92_v60  ;;  %v102_v24 = vmul.f32 %v10612_v23, %v10537_v6  ;;  %v9619_v48 = vld [vmem:[%s14312_s4 + $0x100] ss:$24 sps:$4 sm:$0xff]   ;;  %v9627_v50 = vld [vmem:[%s14312_s4 + $0xd4] ss:$24 sps:$4 sm:$0xff]   ;;  %v9637_v60 = vld [vmem:[%s14312_s4 + $0x70] ss:$24 sps:$4 sm:$0xff]  }
  0xc2   :  { %v101_v26 = vmul.f32 %v10613_v25, %v10537_v6  ;;  %v178_v27 = vadd.f32 %v166_v56, %v98_v14  ;;  %v180_v28 = vadd.f32 %v168_v1, %v100_v16  ;;  %v177_v29 = vadd.f32 %v165_v3, %v97_v18  ;;  %v9631_v56 = vld [vmem:[%s14312_s4 + $0xa0] ss:$24 sps:$4 sm:$0xff]   ;;  %v9639_v58 = vld [vmem:[%s14312_s4 + $0x74] ss:$24 sps:$4 sm:$0xff]   ;;  %v9646_v1 = vld [vmem:[%s14312_s4 + $0x330] ss:$24 sps:$4 sm:$0xff]  }
  0xc3   :  { %v179_v30 = vadd.f32 %v167_v5, %v99_v20  ;;  %v182_v31 = vadd.f32 %v170_v9, %v102_v24  ;;  %v176_v39 = vadd.f32 %v163_v52, %v95_v62  ;;  %v9625_v52 = vld [vmem:[%s14312_s4 + $0xd0] ss:$24 sps:$4 sm:$0xff]   ;;  %v9645_v62 = vld [vmem:[%s14312_s4 + $0x44] ss:$24 sps:$4 sm:$0xff]   ;;  %v9652_v5 = vld [vmem:[%s14312_s4 + $0x300] ss:$24 sps:$4 sm:$0xff]  }
  0xc4   :  { %v181_v32 = vadd.f32 %v169_v11, %v101_v26  ;;  %v11011_v33 = vpack.c.bf16 %v178_v27, %v172_v63  ;;  %v11013_v34 = vpack.c.bf16 %v180_v28, %v174_v7  ;;  %v11021_v37 = vpack.c.bf16 %v177_v29, %v171_v21  ;;  %v9648_v63 = vld [vmem:[%s14312_s4 + $0x334] ss:$24 sps:$4 sm:$0xff]   ;;  %v9654_v3 = vld [vmem:[%s14312_s4 + $0x304] ss:$24 sps:$4 sm:$0xff]   ;;  %v9649_v4 = vld [vmem:[%s14312_s4 + $0x10] ss:$24 sps:$4 sm:$0xff]  }
  0xc5   :  { %v11023_v38 = vpack.c.bf16 %v179_v30, %v173_v22  ;;  %v11037_v43 = vpack.c.bf16 %v182_v31, %v176_v39  ;;  %v9657_v6 = vld [vmem:[%s14312_s4 + $0x2e4] ss:$24 sps:$4 sm:$0xff]   ;;  %v9660_v7 = vld [vmem:[%s14312_s4 + $0x5d4] ss:$24 sps:$4 sm:$0xff]   ;;  %v9655_v8 = vld [vmem:[%s14312_s4 + $0x2e0] ss:$24 sps:$4 sm:$0xff]  }
  0xc6   :  { %v11025_v40 = vpack.c.bf16 %v181_v32, %v175_v12  ;;  %1949 = vmatprep.mubr.bf16.mxu0 %v11011_v33  ;;  %1992 = vmatprep.mubr.bf16.mxu1 %v11013_v34  ;;  %v9658_v9 = vld [vmem:[%s14312_s4 + $0x5d0] ss:$24 sps:$4 sm:$0xff]   ;;  %v9663_v10 = vld [vmem:[%s14312_s4 + $0x2b4] ss:$24 sps:$4 sm:$0xff]   ;;  %v9666_v11 = vld [vmem:[%s14312_s4 + $0x5a4] ss:$24 sps:$4 sm:$0xff]  }
  0xc7   :  { %1950 = vmatmul.mubr.bf16.vlgmr.msra.gmra.mxu0 %v11021_v37  ;;  %1993 = vmatmul.mubr.bf16.vlgmr.msra.gmra.mxu1 %v11023_v38  ;;  %v9661_v12 = vld [vmem:[%s14312_s4 + $0x2b0] ss:$24 sps:$4 sm:$0xff]   ;;  %v9664_v13 = vld [vmem:[%s14312_s4 + $0x5a0] ss:$24 sps:$4 sm:$0xff]   ;;  %v9669_v14 = vld [vmem:[%s14312_s4 + $0x284] ss:$24 sps:$4 sm:$0xff]  }
  0xc8   :  { %2004 = vmatpush1.bf16.xpose.msra.mxu0 %v9607_v35  ;;  %2047 = vmatpush1.bf16.xpose.msra.mxu1 %v9610_v36  ;;  %v9672_v15 = vld [vmem:[%s14312_s4 + $0x574] ss:$24 sps:$4 sm:$0xff]   ;;  %v9667_v16 = vld [vmem:[%s14312_s4 + $0x280] ss:$24 sps:$4 sm:$0xff]   ;;  %v9670_v17 = vld [vmem:[%s14312_s4 + $0x570] ss:$24 sps:$4 sm:$0xff]  }
  0xc9   :  { %2035 = vmatprep.mubr.bf16.mxu0 %v11037_v43  ;;  %2078 = vmatprep.mubr.bf16.mxu1 %v11011_v33  ;;  %v9675_v18 = vld [vmem:[%s14312_s4 + $0x254] ss:$24 sps:$4 sm:$0xff]   ;;  %v9678_v19 = vld [vmem:[%s14312_s4 + $0x544] ss:$24 sps:$4 sm:$0xff]   ;;  %v9673_v20 = vld [vmem:[%s14312_s4 + $0x250] ss:$24 sps:$4 sm:$0xff]  }
  0xca   :  { %2005 = vmatprep.subr.bf16.mxu0 %v9615_v41  ;;  %2048 = vmatprep.subr.bf16.mxu1 %v9618_v42  ;;  %v9676_v21 = vld [vmem:[%s14312_s4 + $0x540] ss:$24 sps:$4 sm:$0xff]   ;;  %v9681_v22 = vld [vmem:[%s14312_s4 + $0x224] ss:$24 sps:$4 sm:$0xff]   ;;  %v9684_v23 = vld [vmem:[%s14312_s4 + $0x514] ss:$24 sps:$4 sm:$0xff]  }
  0xcb   :  { %v9679_v24 = vld [vmem:[%s14312_s4 + $0x220] ss:$24 sps:$4 sm:$0xff]   ;;  %v9682_v25 = vld [vmem:[%s14312_s4 + $0x510] ss:$24 sps:$4 sm:$0xff]   ;;  %v9687_v26 = vld [vmem:[%s14312_s4 + $0x1f4] ss:$24 sps:$4 sm:$0xff]  }
  0xcc   :  { %v9690_v27 = vld [vmem:[%s14312_s4 + $0x4e4] ss:$24 sps:$4 sm:$0xff]   ;;  %v9685_v28 = vld [vmem:[%s14312_s4 + $0x1f0] ss:$24 sps:$4 sm:$0xff]   ;;  %v9688_v29 = vld [vmem:[%s14312_s4 + $0x4e0] ss:$24 sps:$4 sm:$0xff]  }
  0xcd   :  { %v9693_v30 = vld [vmem:[%s14312_s4 + $0x1c4] ss:$24 sps:$4 sm:$0xff]   ;;  %v9696_v31 = vld [vmem:[%s14312_s4 + $0x4b4] ss:$24 sps:$4 sm:$0xff]   ;;  %v9691_v32 = vld [vmem:[%s14312_s4 + $0x1c0] ss:$24 sps:$4 sm:$0xff]  }
  0xce   :  { %v9694_v35 = vld [vmem:[%s14312_s4 + $0x4b0] ss:$24 sps:$4 sm:$0xff]   ;;  %v9699_v36 = vld [vmem:[%s14312_s4 + $0x194] ss:$24 sps:$4 sm:$0xff]   ;;  %v9702_v39 = vld [vmem:[%s14312_s4 + $0x484] ss:$24 sps:$4 sm:$0xff]  }
  0xcf   :  { %v9697_v41 = vld [vmem:[%s14312_s4 + $0x190] ss:$24 sps:$4 sm:$0xff]   ;;  %v9700_v42 = vld [vmem:[%s14312_s4 + $0x480] ss:$24 sps:$4 sm:$0xff]  }
  0xd0   :  { %2006 = vmatpush1.bf16.xpose.msra.mxu0 %v9613_v44  ;;  %2049 = vmatpush1.bf16.xpose.msra.mxu1 %v9616_v45  ;;  %v9705_v44 = vld [vmem:[%s14312_s4 + $0x45c] ss:$24 sps:$4 sm:$0xff]  }
  0xd1   :  { %2007 = vmatprep.subr.bf16.mxu0 %v9621_v46  ;;  %2050 = vmatprep.subr.bf16.mxu1 %v9624_v47  ;;  %v9708_v45 = vld [vmem:[%s14312_s4 + $0x464] ss:$24 sps:$4 sm:$0xff]   ;;  %v9703_v46 = vld [vmem:[%s14312_s4 + $0x458] ss:$24 sps:$4 sm:$0xff]  }
  0xd2   :  { %v9706_v47 = vld [vmem:[%s14312_s4 + $0x460] ss:$24 sps:$4 sm:$0xff]  }
  0xd8   :  { %2008 = vmatpush1.bf16.xpose.msra.mxu0 %v9619_v48  ;;  %2051 = vmatpush1.bf16.xpose.msra.mxu1 %v9622_v49  ;;  %v9711_v48 = vld [vmem:[%s14312_s4 + $0x42c] ss:$24 sps:$4 sm:$0xff]  }
  0xd9   :  { %2009 = vmatprep.subr.bf16.mxu0 %v9627_v50  ;;  %2052 = vmatprep.subr.bf16.mxu1 %v9630_v51  ;;  %v9714_v49 = vld [vmem:[%s14312_s4 + $0x434] ss:$24 sps:$4 sm:$0xff]   ;;  %v9709_v50 = vld [vmem:[%s14312_s4 + $0x428] ss:$24 sps:$4 sm:$0xff]  }
  0xda   :  { %v9712_v51 = vld [vmem:[%s14312_s4 + $0x430] ss:$24 sps:$4 sm:$0xff]  }
  0xe0   :  { %2010 = vmatpush1.bf16.xpose.msra.mxu0 %v9625_v52  ;;  %2053 = vmatpush1.bf16.xpose.msra.mxu1 %v9628_v53  ;;  %v9717_v52 = vld [vmem:[%s14312_s4 + $0x3fc] ss:$24 sps:$4 sm:$0xff]  }
  0xe1   :  { %2011 = vmatprep.subr.bf16.mxu0 %v9633_v54  ;;  %2054 = vmatprep.subr.bf16.mxu1 %v9636_v55  ;;  %v9720_v53 = vld [vmem:[%s14312_s4 + $0x404] ss:$24 sps:$4 sm:$0xff]   ;;  %v9715_v54 = vld [vmem:[%s14312_s4 + $0x3f8] ss:$24 sps:$4 sm:$0xff]  }
  0xe2   :  { %v9718_v55 = vld [vmem:[%s14312_s4 + $0x400] ss:$24 sps:$4 sm:$0xff]  }
  0xe8   :  { %2012 = vmatpush1.bf16.xpose.msra.mxu0 %v9631_v56  ;;  %2055 = vmatpush1.bf16.xpose.msra.mxu1 %v9634_v57  ;;  %v9723_v56 = vld [vmem:[%s14312_s4 + $0x3cc] ss:$24 sps:$4 sm:$0xff]  }
  0xe9   :  { %2013 = vmatprep.subr.bf16.mxu0 %v9639_v58  ;;  %2056 = vmatprep.subr.bf16.mxu1 %v9642_v59  ;;  %v9726_v57 = vld [vmem:[%s14312_s4 + $0x3d4] ss:$24 sps:$4 sm:$0xff]   ;;  %v9721_v58 = vld [vmem:[%s14312_s4 + $0x3c8] ss:$24 sps:$4 sm:$0xff]  }
  0xea   :  { %v9724_v59 = vld [vmem:[%s14312_s4 + $0x3d0] ss:$24 sps:$4 sm:$0xff]  }
  0xf0   :  { %2014 = vmatpush1.bf16.xpose.msra.mxu0 %v9637_v60  ;;  %2057 = vmatpush1.bf16.xpose.msra.mxu1 %v9640_v61  ;;  %v9729_v60 = vld [vmem:[%s14312_s4 + $0x39c] ss:$24 sps:$4 sm:$0xff]  }
  0xf1   :  { %2015 = vmatprep.subr.bf16.mxu0 %v9645_v62  ;;  %2058 = vmatprep.subr.bf16.mxu1 %v9648_v63  ;;  %v9732_v61 = vld [vmem:[%s14312_s4 + $0x3a4] ss:$24 sps:$4 sm:$0xff]   ;;  %v9727_v62 = vld [vmem:[%s14312_s4 + $0x398] ss:$24 sps:$4 sm:$0xff]  }
  0xf2   :  { %v9730_v63 = vld [vmem:[%s14312_s4 + $0x3a0] ss:$24 sps:$4 sm:$0xff]  }
  0xf8   :  { %2016 = vmatpush1.bf16.xpose.msra.mxu0 %v9643_v0  ;;  %2059 = vmatpush1.bf16.xpose.msra.mxu1 %v9646_v1  ;;  %v9735_v0 = vld [vmem:[%s14312_s4 + $0x36c] ss:$24 sps:$4 sm:$0xff]  }
  0xf9   :  { %2017 = vmatprep.subr.bf16.mxu0 %v9651_v2  ;;  %2060 = vmatprep.subr.bf16.mxu1 %v9654_v3  ;;  %v9738_v1 = vld [vmem:[%s14312_s4 + $0x374] ss:$24 sps:$4 sm:$0xff]   ;;  %v9733_v2 = vld [vmem:[%s14312_s4 + $0x368] ss:$24 sps:$4 sm:$0xff]  }
  0xfa   :  { %v9736_v3 = vld [vmem:[%s14312_s4 + $0x370] ss:$24 sps:$4 sm:$0xff]  }
 0x100   :  { %2018 = vmatpush1.bf16.xpose.msra.mxu0 %v9649_v4  ;;  %2061 = vmatpush1.bf16.xpose.msra.mxu1 %v9652_v5  ;;  %v9741_v4 = vld [vmem:[%s14312_s4 + $0x33c] ss:$24 sps:$4 sm:$0xff]  }
 0x101   :  { %2019 = vmatprep.subr.bf16.mxu0 %v9657_v6  ;;  %2062 = vmatprep.subr.bf16.mxu1 %v9660_v7  ;;  %v9744_v5 = vld [vmem:[%s14312_s4 + $0x344] ss:$24 sps:$4 sm:$0xff]   ;;  %v9739_v6 = vld [vmem:[%s14312_s4 + $0x338] ss:$24 sps:$4 sm:$0xff]  }
 0x102   :  { %v9742_v7 = vld [vmem:[%s14312_s4 + $0x340] ss:$24 sps:$4 sm:$0xff]  }
 0x108   :  { %2020 = vmatpush2.bf16.xpose.msra.mxu0 %v9655_v8  ;;  %2063 = vmatpush2.bf16.xpose.msra.mxu1 %v9658_v9  ;;  %v9747_v8 = vld [vmem:[%s14312_s4 + $0x30c] ss:$24 sps:$4 sm:$0xff]  }
 0x109   :  { %2021 = vmatprep.subr.bf16.mxu0 %v9663_v10  ;;  %2064 = vmatprep.subr.bf16.mxu1 %v9666_v11  ;;  %v9750_v9 = vld [vmem:[%s14312_s4 + $0x314] ss:$24 sps:$4 sm:$0xff]   ;;  %v9745_v10 = vld [vmem:[%s14312_s4 + $0x308] ss:$24 sps:$4 sm:$0xff]  }
 0x10a   :  { %v9748_v11 = vld [vmem:[%s14312_s4 + $0x310] ss:$24 sps:$4 sm:$0xff]  }
 0x110   :  { %2022 = vmatpush2.bf16.xpose.msra.mxu0 %v9661_v12  ;;  %2065 = vmatpush2.bf16.xpose.msra.mxu1 %v9664_v13  ;;  %v9753_v12 = vld [vmem:[%s14312_s4 + $0x5dc] ss:$24 sps:$4 sm:$0xff]  }
 0x111   :  { %2023 = vmatprep.subr.bf16.mxu0 %v9669_v14  ;;  %2066 = vmatprep.subr.bf16.mxu1 %v9672_v15  ;;  %v9756_v13 = vld [vmem:[%s14312_s4 + $0x5e4] ss:$24 sps:$4 sm:$0xff]   ;;  %v9751_v14 = vld [vmem:[%s14312_s4 + $0x5d8] ss:$24 sps:$4 sm:$0xff]  }
 0x112   :  { %v9754_v15 = vld [vmem:[%s14312_s4 + $0x5e0] ss:$24 sps:$4 sm:$0xff]  }
 0x118   :  { %2024 = vmatpush2.bf16.xpose.msra.mxu0 %v9667_v16  ;;  %2067 = vmatpush2.bf16.xpose.msra.mxu1 %v9670_v17  ;;  %v9759_v16 = vld [vmem:[%s14312_s4 + $0x5ac] ss:$24 sps:$4 sm:$0xff]  }
 0x119   :  { %2025 = vmatprep.subr.bf16.mxu0 %v9675_v18  ;;  %2068 = vmatprep.subr.bf16.mxu1 %v9678_v19  ;;  %v9762_v17 = vld [vmem:[%s14312_s4 + $0x5b4] ss:$24 sps:$4 sm:$0xff]  }
 0x120   :  { %2026 = vmatpush2.bf16.xpose.msra.mxu0 %v9673_v20  ;;  %2069 = vmatpush2.bf16.xpose.msra.mxu1 %v9676_v21 }
 0x121   :  { %2027 = vmatprep.subr.bf16.mxu0 %v9681_v22  ;;  %2070 = vmatprep.subr.bf16.mxu1 %v9684_v23 }
 0x128   :  { %2028 = vmatpush2.bf16.xpose.msra.mxu0 %v9679_v24  ;;  %2071 = vmatpush2.bf16.xpose.msra.mxu1 %v9682_v25 }
 0x129   :  { %2029 = vmatprep.subr.bf16.mxu0 %v9687_v26  ;;  %2072 = vmatprep.subr.bf16.mxu1 %v9690_v27  ;;  %v9757_v26 = vld [vmem:[%s14312_s4 + $0x5a8] ss:$24 sps:$4 sm:$0xff]  }
 0x12a   :  { %v9760_v27 = vld [vmem:[%s14312_s4 + $0x5b0] ss:$24 sps:$4 sm:$0xff]  }
 0x130   :  { %2030 = vmatpush2.bf16.xpose.msra.mxu0 %v9685_v28  ;;  %2073 = vmatpush2.bf16.xpose.msra.mxu1 %v9688_v29  ;;  %v9765_v28 = vld [vmem:[%s14312_s4 + $0x57c] ss:$24 sps:$4 sm:$0xff]  }
 0x131   :  { %2031 = vmatprep.subr.bf16.mxu0 %v9693_v30  ;;  %2074 = vmatprep.subr.bf16.mxu1 %v9696_v31  ;;  %v9768_v29 = vld [vmem:[%s14312_s4 + $0x584] ss:$24 sps:$4 sm:$0xff]   ;;  %v9763_v30 = vld [vmem:[%s14312_s4 + $0x578] ss:$24 sps:$4 sm:$0xff]  }
 0x132   :  { %v9766_v31 = vld [vmem:[%s14312_s4 + $0x580] ss:$24 sps:$4 sm:$0xff]  }
 0x138   :  { %2032 = vmatpush2.bf16.xpose.msra.mxu0 %v9691_v32  ;;  %2075 = vmatpush2.bf16.xpose.msra.mxu1 %v9694_v35  ;;  %v9771_v32 = vld [vmem:[%s14312_s4 + $0x54c] ss:$24 sps:$4 sm:$0xff]  }
 0x139   :  { %2033 = vmatprep.subr.bf16.mxu0 %v9699_v36  ;;  %2076 = vmatprep.subr.bf16.mxu1 %v9702_v39  ;;  %v9774_v35 = vld [vmem:[%s14312_s4 + $0x554] ss:$24 sps:$4 sm:$0xff]   ;;  %v9769_v36 = vld [vmem:[%s14312_s4 + $0x548] ss:$24 sps:$4 sm:$0xff]  }
 0x13a   :  { %v9772_v39 = vld [vmem:[%s14312_s4 + $0x550] ss:$24 sps:$4 sm:$0xff]  }
 0x140   :  { %2034 = vmatpush2.bf16.xpose.msra.mxu0 %v9697_v41  ;;  %2077 = vmatpush2.bf16.xpose.msra.mxu1 %v9700_v42  ;;  %v9777_v41 = vld [vmem:[%s14312_s4 + $0x51c] ss:$24 sps:$4 sm:$0xff]  }
 0x141   :  { %2089 = vmatprep.subr.bf16.mxu0 %v9705_v44  ;;  %2132 = vmatprep.subr.bf16.mxu1 %v9708_v45  ;;  %v9780_v42 = vld [vmem:[%s14312_s4 + $0x524] ss:$24 sps:$4 sm:$0xff]   ;;  %v9775_v44 = vld [vmem:[%s14312_s4 + $0x518] ss:$24 sps:$4 sm:$0xff]  }
 0x142   :  { %v9778_v45 = vld [vmem:[%s14312_s4 + $0x520] ss:$24 sps:$4 sm:$0xff]  }
 0x147   :  { %2036 = vmatmul.mubr.bf16.vlgmr.msra.gmra.mxu0 %v11025_v40  ;;  %2079 = vmatmul.mubr.bf16.vlgmr.msra.gmra.mxu1 %v11021_v37 }
 0x148   :  { %2090 = vmatpush1.bf16.xpose.msra.mxu0 %v9703_v46  ;;  %2121 = vmatprep.mubr.bf16.mxu0 %v11013_v34  ;;  %v9783_v46 = vld [vmem:[%s14312_s4 + $0x4ec] ss:$24 sps:$4 sm:$0xff]  }
 0x149   :  { %2133 = vmatpush1.bf16.xpose.msra.mxu1 %v9706_v47  ;;  %2164 = vmatprep.mubr.bf16.mxu1 %v11037_v43  ;;  %v9786_v47 = vld [vmem:[%s14312_s4 + $0x4f4] ss:$24 sps:$4 sm:$0xff]  }
 0x14a   :  { %2091 = vmatprep.subr.bf16.mxu0 %v9711_v48  ;;  %2134 = vmatprep.subr.bf16.mxu1 %v9714_v49  ;;  %v9781_v48 = vld [vmem:[%s14312_s4 + $0x4e8] ss:$24 sps:$4 sm:$0xff]  }
 0x14b   :  { %v9784_v49 = vld [vmem:[%s14312_s4 + $0x4f0] ss:$24 sps:$4 sm:$0xff]  }
 0x150   :  { %2092 = vmatpush1.bf16.xpose.msra.mxu0 %v9709_v50  ;;  %v9789_v50 = vld [vmem:[%s14312_s4 + $0x4bc] ss:$24 sps:$4 sm:$0xff]  }
 0x151   :  { %2135 = vmatpush1.bf16.xpose.msra.mxu1 %v9712_v51  ;;  %2093 = vmatprep.subr.bf16.mxu0 %v9717_v52  ;;  %v9792_v51 = vld [vmem:[%s14312_s4 + $0x4c4] ss:$24 sps:$4 sm:$0xff]   ;;  %v9787_v52 = vld [vmem:[%s14312_s4 + $0x4b8] ss:$24 sps:$4 sm:$0xff]  }
 0x152   :  { %2136 = vmatprep.subr.bf16.mxu1 %v9720_v53  ;;  %v9790_v53 = vld [vmem:[%s14312_s4 + $0x4c0] ss:$24 sps:$4 sm:$0xff]  }
 0x158   :  { %2094 = vmatpush1.bf16.xpose.msra.mxu0 %v9715_v54  ;;  %v9795_v54 = vld [vmem:[%s14312_s4 + $0x48c] ss:$24 sps:$4 sm:$0xff]  }
 0x159   :  { %2137 = vmatpush1.bf16.xpose.msra.mxu1 %v9718_v55  ;;  %2095 = vmatprep.subr.bf16.mxu0 %v9723_v56  ;;  %v9798_v55 = vld [vmem:[%s14312_s4 + $0x494] ss:$24 sps:$4 sm:$0xff]   ;;  %v9793_v56 = vld [vmem:[%s14312_s4 + $0x488] ss:$24 sps:$4 sm:$0xff]  }
 0x15a   :  { %2138 = vmatprep.subr.bf16.mxu1 %v9726_v57  ;;  %v9796_v57 = vld [vmem:[%s14312_s4 + $0x490] ss:$24 sps:$4 sm:$0xff]  }
 0x160   :  { %2096 = vmatpush1.bf16.xpose.msra.mxu0 %v9721_v58  ;;  %v9801_v58 = vld [vmem:[%s14312_s4 + $0x754] ss:$24 sps:$4 sm:$0xff]  }
 0x161   :  { %2139 = vmatpush1.bf16.xpose.msra.mxu1 %v9724_v59  ;;  %2097 = vmatprep.subr.bf16.mxu0 %v9729_v60  ;;  %v9804_v59 = vld [vmem:[%s14312_s4 + $0x75c] ss:$24 sps:$4 sm:$0xff]   ;;  %v9799_v60 = vld [vmem:[%s14312_s4 + $0x750] ss:$24 sps:$4 sm:$0xff]  }
 0x162   :  { %2140 = vmatprep.subr.bf16.mxu1 %v9732_v61  ;;  %v9802_v61 = vld [vmem:[%s14312_s4 + $0x758] ss:$24 sps:$4 sm:$0xff]  }
 0x168   :  { %2098 = vmatpush1.bf16.xpose.msra.mxu0 %v9727_v62  ;;  %v9807_v62 = vld [vmem:[%s14312_s4 + $0x724] ss:$24 sps:$4 sm:$0xff]  }
 0x169   :  { %2141 = vmatpush1.bf16.xpose.msra.mxu1 %v9730_v63  ;;  %2099 = vmatprep.subr.bf16.mxu0 %v9735_v0  ;;  %v9810_v63 = vld [vmem:[%s14312_s4 + $0x72c] ss:$24 sps:$4 sm:$0xff]   ;;  %v9805_v0 = vld [vmem:[%s14312_s4 + $0x720] ss:$24 sps:$4 sm:$0xff]  }
 0x16a   :  { %2142 = vmatprep.subr.bf16.mxu1 %v9738_v1  ;;  %v9808_v1 = vld [vmem:[%s14312_s4 + $0x728] ss:$24 sps:$4 sm:$0xff]  }
 0x170   :  { %2100 = vmatpush1.bf16.xpose.msra.mxu0 %v9733_v2  ;;  %v9813_v2 = vld [vmem:[%s14312_s4 + $0x6f4] ss:$24 sps:$4 sm:$0xff]  }
 0x171   :  { %2143 = vmatpush1.bf16.xpose.msra.mxu1 %v9736_v3  ;;  %2101 = vmatprep.subr.bf16.mxu0 %v9741_v4  ;;  %v9814_v3 = vld [vmem:[%s14312_s4 + $0x6f8] ss:$24 sps:$4 sm:$0xff]   ;;  %v9819_v4 = vld [vmem:[%s14312_s4 + $0x6c4] ss:$24 sps:$4 sm:$0xff]  }
 0x172   :  { %2144 = vmatprep.subr.bf16.mxu1 %v9744_v5  ;;  %v9822_v5 = vld [vmem:[%s14312_s4 + $0x6cc] ss:$24 sps:$4 sm:$0xff]  }
 0x178   :  { %2102 = vmatpush1.bf16.xpose.msra.mxu0 %v9739_v6  ;;  %v9817_v6 = vld [vmem:[%s14312_s4 + $0x6c0] ss:$24 sps:$4 sm:$0xff]  }
 0x179   :  { %2145 = vmatpush1.bf16.xpose.msra.mxu1 %v9742_v7  ;;  %2103 = vmatprep.subr.bf16.mxu0 %v9747_v8  ;;  %v9820_v7 = vld [vmem:[%s14312_s4 + $0x6c8] ss:$24 sps:$4 sm:$0xff]   ;;  %v9825_v8 = vld [vmem:[%s14312_s4 + $0x694] ss:$24 sps:$4 sm:$0xff]  }
 0x17a   :  { %2146 = vmatprep.subr.bf16.mxu1 %v9750_v9  ;;  %v9828_v9 = vld [vmem:[%s14312_s4 + $0x69c] ss:$24 sps:$4 sm:$0xff]  }
 0x180   :  { %2104 = vmatpush1.bf16.xpose.msra.mxu0 %v9745_v10  ;;  %v9823_v10 = vld [vmem:[%s14312_s4 + $0x690] ss:$24 sps:$4 sm:$0xff]  }
 0x181   :  { %2147 = vmatpush1.bf16.xpose.msra.mxu1 %v9748_v11  ;;  %2105 = vmatprep.subr.bf16.mxu0 %v9753_v12  ;;  %v9826_v11 = vld [vmem:[%s14312_s4 + $0x698] ss:$24 sps:$4 sm:$0xff]   ;;  %v9831_v12 = vld [vmem:[%s14312_s4 + $0x664] ss:$24 sps:$4 sm:$0xff]  }
 0x182   :  { %2148 = vmatprep.subr.bf16.mxu1 %v9756_v13  ;;  %v9834_v13 = vld [vmem:[%s14312_s4 + $0x66c] ss:$24 sps:$4 sm:$0xff]  }
 0x187   :  { %v1951_v18 = vpop.f32.mrf.mxu0  ;;  %v1994_v19 = vpop.f32.mrf.mxu1 }
 0x188   :  { %v11333_v20 = vadd.f32 %v1994_v19, %v1951_v18  ;;  %2106 = vmatpush2.bf16.xpose.msra.mxu0 %v9751_v14  ;;  %v9829_v14 = vld [vmem:[%s14312_s4 + $0x660] ss:$24 sps:$4 sm:$0xff]   ;;  %v9835_v18 = vld [vmem:[%s14312_s4 + $0x630] ss:$24 sps:$4 sm:$0xff]  }
 0x189   :  { %2149 = vmatpush2.bf16.xpose.msra.mxu1 %v9754_v15  ;;  %v11335_v21 = vpop.f32.mrf.mxu0  ;;  %v11337_v22 = vpop.f32.mrf.mxu1  ;;  %2107 = vmatprep.subr.bf16.mxu0 %v9759_v16  ;;  %v9832_v15 = vld [vmem:[%s14312_s4 + $0x668] ss:$24 sps:$4 sm:$0xff]   ;;  %v9837_v16 = vld [vmem:[%s14312_s4 + $0x634] ss:$24 sps:$4 sm:$0xff]   ;;  %v9838_v19 = vld [vmem:[%s14312_s4 + $0x638] ss:$24 sps:$4 sm:$0xff]  }
 0x18a   :  { %2150 = vmatprep.subr.bf16.mxu1 %v9762_v17  ;;  %v9840_v17 = vld [vmem:[%s14312_s4 + $0x63c] ss:$24 sps:$4 sm:$0xff]  }
 0x18b   :  { %v1955_v23 = vpop.f32.mrf.mxu0  ;;  %v1998_v24 = vpop.f32.mrf.mxu1 }
 0x18c   :  { %v11339_v25 = vadd.f32 %v1998_v24, %v1955_v23  ;;  %v9843_v23 = vld [vmem:[%s14312_s4 + $0x604] ss:$24 sps:$4 sm:$0xff]  }
 0x18d   :  { %v9846_v24 = vld [vmem:[%s14312_s4 + $0x60c] ss:$24 sps:$4 sm:$0xff]  }
 0x190   :  { %2108 = vmatpush2.bf16.xpose.msra.mxu0 %v9757_v26  ;;  %v9841_v26 = vld [vmem:[%s14312_s4 + $0x600] ss:$24 sps:$4 sm:$0xff]  }
 0x191   :  { %2151 = vmatpush2.bf16.xpose.msra.mxu1 %v9760_v27  ;;  %2109 = vmatprep.subr.bf16.mxu0 %v9765_v28  ;;  %v9844_v27 = vld [vmem:[%s14312_s4 + $0x608] ss:$24 sps:$4 sm:$0xff]   ;;  %v9849_v28 = vld [vmem:[%s14312_s4 + $0x8d4] ss:$24 sps:$4 sm:$0xff]  }
 0x192   :  { %2152 = vmatprep.subr.bf16.mxu1 %v9768_v29  ;;  %v9852_v29 = vld [vmem:[%s14312_s4 + $0x8dc] ss:$24 sps:$4 sm:$0xff]  }
 0x198   :  { %2110 = vmatpush2.bf16.xpose.msra.mxu0 %v9763_v30  ;;  %v9847_v30 = vld [vmem:[%s14312_s4 + $0x8d0] ss:$24 sps:$4 sm:$0xff]  }
 0x199   :  { %2153 = vmatpush2.bf16.xpose.msra.mxu1 %v9766_v31  ;;  %2111 = vmatprep.subr.bf16.mxu0 %v9771_v32  ;;  %v9850_v31 = vld [vmem:[%s14312_s4 + $0x8d8] ss:$24 sps:$4 sm:$0xff]   ;;  %v9855_v32 = vld [vmem:[%s14312_s4 + $0x8a4] ss:$24 sps:$4 sm:$0xff]  }
 0x19a   :  { %2154 = vmatprep.subr.bf16.mxu1 %v9774_v35  ;;  %v9858_v35 = vld [vmem:[%s14312_s4 + $0x8ac] ss:$24 sps:$4 sm:$0xff]  }
 0x1a0   :  { %2112 = vmatpush2.bf16.xpose.msra.mxu0 %v9769_v36  ;;  %v1957_v36 = vpop.f32.mrf.mxu0 }
 0x1a1   :  { %2155 = vmatpush2.bf16.xpose.msra.mxu1 %v9772_v39  ;;  %2113 = vmatprep.subr.bf16.mxu0 %v9777_v41 }
 0x1a2   :  { %2156 = vmatprep.subr.bf16.mxu1 %v9780_v42 }
 0x1a8   :  { %2114 = vmatpush2.bf16.xpose.msra.mxu0 %v9775_v44 }
 0x1a9   :  { %2157 = vmatpush2.bf16.xpose.msra.mxu1 %v9778_v45  ;;  %2115 = vmatprep.subr.bf16.mxu0 %v9783_v46  ;;  %v9853_v45 = vld [vmem:[%s14312_s4 + $0x8a0] ss:$24 sps:$4 sm:$0xff]  }
 0x1aa   :  { %2158 = vmatprep.subr.bf16.mxu1 %v9786_v47  ;;  %v9856_v47 = vld [vmem:[%s14312_s4 + $0x8a8] ss:$24 sps:$4 sm:$0xff]  }
 0x1b0   :  { %2116 = vmatpush2.bf16.xpose.msra.mxu0 %v9781_v48  ;;  %v9861_v48 = vld [vmem:[%s14312_s4 + $0x874] ss:$24 sps:$4 sm:$0xff]  }
 0x1b1   :  { %2159 = vmatpush2.bf16.xpose.msra.mxu1 %v9784_v49  ;;  %2117 = vmatprep.subr.bf16.mxu0 %v9789_v50  ;;  %v9864_v49 = vld [vmem:[%s14312_s4 + $0x87c] ss:$24 sps:$4 sm:$0xff]  }
 0x1b2   :  { %2160 = vmatprep.subr.bf16.mxu1 %v9792_v51  ;;  %v2000_v51 = vpop.f32.mrf.mxu1 }
 0x1b8   :  { %2118 = vmatpush2.bf16.xpose.msra.mxu0 %v9787_v52  ;;  %v9859_v52 = vld [vmem:[%s14312_s4 + $0x870] ss:$24 sps:$4 sm:$0xff]  }
 0x1b9   :  { %2161 = vmatpush2.bf16.xpose.msra.mxu1 %v9790_v53  ;;  %2119 = vmatprep.subr.bf16.mxu0 %v9795_v54  ;;  %v9862_v53 = vld [vmem:[%s14312_s4 + $0x878] ss:$24 sps:$4 sm:$0xff]  }
 0x1ba   :  { %2162 = vmatprep.subr.bf16.mxu1 %v9798_v55  ;;  %v9870_v55 = vld [vmem:[%s14312_s4 + $0x84c] ss:$24 sps:$4 sm:$0xff]  }
 0x1c0   :  { %2120 = vmatpush2.bf16.xpose.msra.mxu0 %v9793_v56  ;;  %v2001_v56 = vadd.f32 %v2000_v51, %v1957_v36  ;;  %v9910_v51 = vld [vmem:[%s14313_s5 + $0xf0] ss:$24 sps:$4 sm:$0xff]  }
 0x1c1   :  { %2163 = vmatpush2.bf16.xpose.msra.mxu1 %v9796_v57  ;;  %2175 = vmatprep.subr.bf16.mxu0 %v9801_v58  ;;  %v1997_v58 = vadd.f32 %v11337_v22, %v11335_v21  ;;  %v9873_v21 = vld [vmem:[%s14312_s4 + $0x814] ss:$24 sps:$4 sm:$0xff]  }
 0x1c2   :  { %2218 = vmatprep.subr.bf16.mxu1 %v9804_v59  ;;  %v9876_v22 = vld [vmem:[%s14312_s4 + $0x81c] ss:$24 sps:$4 sm:$0xff]  }
 0x1c7   :  { %2122 = vmatmul.mubr.bf16.vlgmr.msra.gmra.mxu0 %v11023_v38 }
 0x1c8   :  { %2165 = vmatmul.mubr.bf16.vlgmr.msra.gmra.mxu1 %v11025_v40  ;;  %2176 = vmatpush1.bf16.xpose.msra.mxu0 %v9799_v60 }
 0x1c9   :  { %2207 = vmatprep.mubr.bf16.mxu0 %v11011_v33  ;;  %2219 = vmatpush1.bf16.xpose.msra.mxu1 %v9802_v61  ;;  %v9816_v33 = vld [vmem:[%s14312_s4 + $0x6fc] ss:$24 sps:$4 sm:$0xff]  }
 0x1ca   :  { %2250 = vmatprep.mubr.bf16.mxu1 %v11013_v34  ;;  %2177 = vmatprep.subr.bf16.mxu0 %v9807_v62  ;;  %v9811_v34 = vld [vmem:[%s14312_s4 + $0x6f0] ss:$24 sps:$4 sm:$0xff]   ;;  %v9865_v62 = vld [vmem:[%s14312_s4 + $0x840] ss:$24 sps:$4 sm:$0xff]  }
 0x1cb   :  { %2220 = vmatprep.subr.bf16.mxu1 %v9810_v63 }
 0x1d0   :  { %2178 = vmatpush1.bf16.xpose.msra.mxu0 %v9805_v0  ;;  %v9868_v0 = vld [vmem:[%s14312_s4 + $0x848] ss:$24 sps:$4 sm:$0xff]  }
 0x1d1   :  { %2221 = vmatpush1.bf16.xpose.msra.mxu1 %v9808_v1  ;;  %2179 = vmatprep.subr.bf16.mxu0 %v9813_v2 }
 0x1d2   :  { %2222 = vmatprep.subr.bf16.mxu1 %v9816_v33 }
 0x1d8   :  { %2180 = vmatpush1.bf16.xpose.msra.mxu0 %v9811_v34  ;;  %v9871_v34 = vld [vmem:[%s14312_s4 + $0x810] ss:$24 sps:$4 sm:$0xff]  }
 0x1d9   :  { %2223 = vmatpush1.bf16.xpose.msra.mxu1 %v9814_v3  ;;  %2181 = vmatprep.subr.bf16.mxu0 %v9819_v4  ;;  %v9874_v3 = vld [vmem:[%s14312_s4 + $0x818] ss:$24 sps:$4 sm:$0xff]   ;;  %v9879_v4 = vld [vmem:[%s14312_s4 + $0x7e4] ss:$24 sps:$4 sm:$0xff]  }
 0x1da   :  { %2224 = vmatprep.subr.bf16.mxu1 %v9822_v5  ;;  %v9882_v5 = vld [vmem:[%s14312_s4 + $0x7ec] ss:$24 sps:$4 sm:$0xff]  }
 0x1e0   :  { %2182 = vmatpush1.bf16.xpose.msra.mxu0 %v9817_v6  ;;  %v2304_v6 = vld [vmem:[%s14314_s2] sm:$0xff] }
 0x1e1   :  { %2225 = vmatpush1.bf16.xpose.msra.mxu1 %v9820_v7  ;;  %2183 = vmatprep.subr.bf16.mxu0 %v9825_v8  ;;  %v9877_v7 = vld [vmem:[%s14312_s4 + $0x7e0] ss:$24 sps:$4 sm:$0xff]   ;;  %v2310_v8 = vld [vmem:[%s14314_s2 + $0x30] sm:$0xff] }
 0x1e2   :  { %2226 = vmatprep.subr.bf16.mxu1 %v9828_v9 }
 0x1e8   :  { %2184 = vmatpush1.bf16.xpose.msra.mxu0 %v9823_v10  ;;  %v9880_v10 = vld [vmem:[%s14312_s4 + $0x7e8] ss:$24 sps:$4 sm:$0xff]  }
 0x1e9   :  { %2227 = vmatpush1.bf16.xpose.msra.mxu1 %v9826_v11  ;;  %2185 = vmatprep.subr.bf16.mxu0 %v9831_v12  ;;  %v9885_v11 = vld [vmem:[%s14312_s4 + $0x7b4] ss:$24 sps:$4 sm:$0xff]  }
 0x1ea   :  { %2228 = vmatprep.subr.bf16.mxu1 %v9834_v13 }
 0x1f0   :  { %2186 = vmatpush1.bf16.xpose.msra.mxu0 %v9829_v14  ;;  %v9888_v14 = vld [vmem:[%s14312_s4 + $0x7bc] ss:$24 sps:$4 sm:$0xff]  }
 0x1f1   :  { %2229 = vmatpush1.bf16.xpose.msra.mxu1 %v9832_v15  ;;  %2187 = vmatprep.subr.bf16.mxu0 %v9837_v16 }
 0x1f2   :  { %2230 = vmatprep.subr.bf16.mxu1 %v9840_v17 }
 0x1f8   :  { %2188 = vmatpush1.bf16.xpose.msra.mxu0 %v9835_v18 }
 0x1f9   :  { %2231 = vmatpush1.bf16.xpose.msra.mxu1 %v9838_v19  ;;  %2189 = vmatprep.subr.bf16.mxu0 %v9843_v23 }
 0x1fa   :  { %2232 = vmatprep.subr.bf16.mxu1 %v9846_v24  ;;  %v9883_v24 = vld [vmem:[%s14312_s4 + $0x7b0] ss:$24 sps:$4 sm:$0xff]  }
 0x200   :  { %2190 = vmatpush1.bf16.xpose.msra.mxu0 %v9841_v26  ;;  %v9886_v26 = vld [vmem:[%s14312_s4 + $0x7b8] ss:$24 sps:$4 sm:$0xff]  }
 0x201   :  { %2233 = vmatpush1.bf16.xpose.msra.mxu1 %v9844_v27  ;;  %2191 = vmatprep.subr.bf16.mxu0 %v9849_v28  ;;  %v9891_v27 = vld [vmem:[%s14312_s4 + $0x784] ss:$24 sps:$4 sm:$0xff]  }
 0x202   :  { %2234 = vmatprep.subr.bf16.mxu1 %v9852_v29  ;;  %v9894_v28 = vld [vmem:[%s14312_s4 + $0x78c] ss:$24 sps:$4 sm:$0xff]   ;;  %v9889_v29 = vld [vmem:[%s14312_s4 + $0x780] ss:$24 sps:$4 sm:$0xff]  }
 0x207   :  { %v2037_v39 = vpop.f32.mrf.mxu0 }
 0x208   :  { %v2038_v41 = vadd.f32 %v2037_v39, %v11333_v20  ;;  %2192 = vmatpush2.bf16.xpose.msra.mxu0 %v9847_v30  ;;  %v9892_v30 = vld [vmem:[%s14312_s4 + $0x788] ss:$24 sps:$4 sm:$0xff]  }
 0x209   :  { %2235 = vmatpush2.bf16.xpose.msra.mxu1 %v9850_v31  ;;  %v2039_v42 = vpop.f32.mrf.mxu0  ;;  %2193 = vmatprep.subr.bf16.mxu0 %v9855_v32  ;;  %v9897_v31 = vld [vmem:[%s14312_s4 + $0x764] ss:$24 sps:$4 sm:$0xff]   ;;  %v9900_v32 = vld [vmem:[%s14313_s5 + $0x154] ss:$24 sps:$4 sm:$0xff]  }
 0x20a   :  { %v8730_v44 = vmul.f32 -1.442695, %v2038_v41  ;;  %2236 = vmatprep.subr.bf16.mxu1 %v9858_v35  ;;  %v2040_v61 = vadd.f32 %v2039_v42, %v1997_v58  ;;  %v2311_v35 = vld [vmem:[%s14314_s2 + $0x38] sm:$0xff]  ;;  %v2305_v39 = vld [vmem:[%s14314_s2 + $0x8] sm:$0xff] }
 0x20b   :  { %v2041_v46 = vpop.f32.mrf.mxu0  ;;  %v9895_v41 = vld [vmem:[%s14312_s4 + $0x760] ss:$24 sps:$4 sm:$0xff]   ;;  %v9922_v58 = vld [vmem:[%s14313_s5 + $0x90] ss:$24 sps:$4 sm:$0xff]  }
 0x20c   :  { %10538 = vpow2.f32 %v8730_v44  ;;  %v2042_v20 = vadd.f32 %v2041_v46, %v11339_v25  ;;  %v9867_v25 = vld [vmem:[%s14312_s4 + $0x844] ss:$24 sps:$4 sm:$0xff]   ;;  %v8731_v2 = vmul.f32 -1.442695, %v2040_v61  ;;  %v9898_v44 = vld [vmem:[%s14313_s5 + $0x150] ss:$24 sps:$4 sm:$0xff]  }
 0x20d   :  { %v2043_v54 = vpop.f32.mrf.mxu0  ;;  %v9903_v46 = vld [vmem:[%s14312_s4 + $0x734] ss:$24 sps:$4 sm:$0xff]   ;;  %v9925_v61 = vld [vmem:[%s14312_s4 + $0x670] ss:$24 sps:$4 sm:$0xff]  }
 0x20e   :  { %v8736_v50 = vmul.f32 -1.442695, %v2042_v20  ;;  %v2044_v57 = vadd.f32 %v2043_v54, %v2001_v56  ;;  %v9916_v54 = vld [vmem:[%s14313_s5 + $0xc0] ss:$24 sps:$4 sm:$0xff]   ;;  %v9924_v56 = vld [vmem:[%s14313_s5 + $0x94] ss:$24 sps:$4 sm:$0xff]  }
 0x210   :  { %10540 = vpow2.f32 %v8736_v50  ;;  %2194 = vmatpush2.bf16.xpose.msra.mxu0 %v9853_v45  ;;  %v8737_v63 = vmul.f32 -1.442695, %v2044_v57  ;;  %v9907_v50 = vld [vmem:[%s14312_s4 + $0x700] ss:$24 sps:$4 sm:$0xff]  }
 0x211   :  { %2237 = vmatpush2.bf16.xpose.msra.mxu1 %v9856_v47  ;;  %2195 = vmatprep.subr.bf16.mxu0 %v9861_v48  ;;  %v9906_v48 = vld [vmem:[%s14313_s5 + $0x124] ss:$24 sps:$4 sm:$0xff]   ;;  %v9919_v57 = vld [vmem:[%s14312_s4 + $0x6a0] ss:$24 sps:$4 sm:$0xff]  }
 0x212   :  { %2238 = vmatprep.subr.bf16.mxu1 %v9864_v49  ;;  %v9901_v49 = vld [vmem:[%s14312_s4 + $0x730] ss:$24 sps:$4 sm:$0xff]  }
 0x218   :  { %2196 = vmatpush2.bf16.xpose.msra.mxu0 %v9859_v52  ;;  %v9915_v52 = vld [vmem:[%s14312_s4 + $0x6d4] ss:$24 sps:$4 sm:$0xff]  }
 0x219   :  { %v10539_v59 = vpop.eup %10538  ;;  %2239 = vmatpush2.bf16.xpose.msra.mxu1 %v9862_v53  ;;  %2197 = vmatprep.subr.bf16.mxu0 %v9867_v25  ;;  %v9918_v53 = vld [vmem:[%s14313_s5 + $0xc4] ss:$24 sps:$4 sm:$0xff]   ;;  %v9913_v25 = vld [vmem:[%s14312_s4 + $0x6d0] ss:$24 sps:$4 sm:$0xff]  }
 0x21a   :  { %v2352_v60 = vadd.f32 1.0, %v10539_v59  ;;  %2240 = vmatprep.subr.bf16.mxu1 %v9870_v55  ;;  %v9921_v55 = vld [vmem:[%s14312_s4 + $0x6a4] ss:$24 sps:$4 sm:$0xff]   ;;  %v9927_v59 = vld [vmem:[%s14312_s4 + $0x674] ss:$24 sps:$4 sm:$0xff]  }
 0x21c   :  { %10542 = vrcp.f32 %v2352_v60  ;;  %v9930_v60 = vld [vmem:[%s14313_s5 + $0x64] ss:$24 sps:$4 sm:$0xff]  }
 0x21d   :  { %v10541_v1 = vpop.eup %10540  ;;  %10544 = vpow2.f32 %v8737_v63  ;;  %v9933_v63 = vld [vmem:[%s14312_s4 + $0x644] ss:$24 sps:$4 sm:$0xff]  }
 0x21e   :  { %v2358_v33 = vadd.f32 1.0, %v10541_v1  ;;  %v9939_v1 = vld [vmem:[%s14312_s4 + $0x614] ss:$24 sps:$4 sm:$0xff]  }
 0x220   :  { %10546 = vrcp.f32 %v2358_v33  ;;  %2198 = vmatpush2.bf16.xpose.msra.mxu0 %v9865_v62  ;;  %v9928_v62 = vld [vmem:[%s14313_s5 + $0x60] ss:$24 sps:$4 sm:$0xff]   ;;  %v2080_v33 = vpop.f32.mrf.mxu1 }
 0x221   :  { %2241 = vmatpush2.bf16.xpose.msra.mxu1 %v9868_v0  ;;  %2199 = vmatprep.subr.bf16.mxu0 %v9873_v21  ;;  %10548 = vpow2.f32 %v8731_v2  ;;  %v9936_v0 = vld [vmem:[%s14313_s5 + $0x34] ss:$24 sps:$4 sm:$0xff]   ;;  %v9931_v21 = vld [vmem:[%s14312_s4 + $0x640] ss:$24 sps:$4 sm:$0xff]   ;;  %v9942_v2 = vld [vmem:[%s14313_s5 + $0x4] ss:$24 sps:$4 sm:$0xff]  }
 0x222   :  { %2242 = vmatprep.subr.bf16.mxu1 %v9876_v22  ;;  %v9934_v22 = vld [vmem:[%s14313_s5 + $0x30] ss:$24 sps:$4 sm:$0xff]  }
 0x228   :  { %2200 = vmatpush2.bf16.xpose.msra.mxu0 %v9871_v34  ;;  %v9937_v34 = vld [vmem:[%s14312_s4 + $0x610] ss:$24 sps:$4 sm:$0xff]  }
 0x229   :  { %2243 = vmatpush2.bf16.xpose.msra.mxu1 %v9874_v3  ;;  %2201 = vmatprep.subr.bf16.mxu0 %v9879_v4  ;;  %v10543_v9 = vpop.eup %10542  ;;  %v9940_v3 = vld [vmem:[%s14313_s5] ss:$24 sps:$4 sm:$0xff]   ;;  %v9945_v4 = vld [vmem:[%s14312_s4 + $0x8e4] ss:$24 sps:$4 sm:$0xff]  }
 0x22a   :  { %2244 = vmatprep.subr.bf16.mxu1 %v9882_v5  ;;  %v10545_v12 = vpop.eup %10544  ;;  %v2388_v15 = vmul.f32 %v10543_v9, %v2304_v6  ;;  %v2082_v5 = vpop.f32.mrf.mxu1  ;;  %v9948_v6 = vld [vmem:[%s14313_s5 + $0x2d4] ss:$24 sps:$4 sm:$0xff]   ;;  %v9946_v9 = vld [vmem:[%s14313_s5 + $0x2d0] ss:$24 sps:$4 sm:$0xff]  }
 0x22b   :  { %v2359_v18 = vadd.f32 1.0, %v10545_v12  ;;  %v9954_v12 = vld [vmem:[%s14313_s5 + $0x2a4] ss:$24 sps:$4 sm:$0xff]  }
 0x22d   :  { %v10547_v13 = vpop.eup %10546  ;;  %10550 = vrcp.f32 %v2359_v18 }
 0x22e   :  { %v2394_v16 = vmul.f32 %v10547_v13, %v2310_v8  ;;  %v10549_v17 = vpop.eup %10548  ;;  %v9943_v8 = vld [vmem:[%s14312_s4 + $0x8e0] ss:$24 sps:$4 sm:$0xff]  }
 0x22f   :  { %v2353_v23 = vadd.f32 1.0, %v10549_v17 }
 0x230   :  { %2202 = vmatpush2.bf16.xpose.msra.mxu0 %v9877_v7  ;;  %v11607_v19 = vpack.c.bf16 %v2394_v16, %v2388_v15  ;;  %v2084_v7 = vpop.f32.mrf.mxu1 }
 0x231   :  { %2245 = vmatpush2.bf16.xpose.msra.mxu1 %v9880_v10  ;;  %2203 = vmatprep.subr.bf16.mxu0 %v9885_v11  ;;  %10552 = vrcp.f32 %v2353_v23  ;;  %v9951_v10 = vld [vmem:[%s14312_s4 + $0x8b4] ss:$24 sps:$4 sm:$0xff]  }
 0x232   :  { %2246 = vmatprep.subr.bf16.mxu1 %v9888_v14  ;;  %v2086_v11 = vpop.f32.mrf.mxu1 }
 0x238   :  { %2204 = vmatpush2.bf16.xpose.msra.mxu0 %v9883_v24 }
 0x239   :  { %2247 = vmatpush2.bf16.xpose.msra.mxu1 %v9886_v26  ;;  %2205 = vmatprep.subr.bf16.mxu0 %v9891_v27  ;;  %v9949_v27 = vld [vmem:[%s14312_s4 + $0x8b0] ss:$24 sps:$4 sm:$0xff]  }
 0x23a   :  { %2248 = vmatprep.subr.bf16.mxu1 %v9894_v28  ;;  %v10551_v36 = vpop.eup %10550 }
 0x23b   :  { %v2395_v45 = vmul.f32 %v10551_v36, %v2311_v35 }
 0x23e   :  { %v10553_v42 = vpop.eup %10552 }
 0x23f   :  { %v2389_v47 = vmul.f32 %v10553_v42, %v2305_v39 }
 0x240   :  { %2206 = vmatpush2.bf16.xpose.msra.mxu0 %v9889_v29  ;;  %v9952_v29 = vld [vmem:[%s14313_s5 + $0x2a0] ss:$24 sps:$4 sm:$0xff]  }
 0x241   :  { %2249 = vmatpush2.bf16.xpose.msra.mxu1 %v9892_v30  ;;  %2261 = vmatprep.subr.bf16.mxu0 %v9897_v31  ;;  %v11653_v20 = vpack.c.bf16 %v2395_v45, %v2389_v47  ;;  %v9957_v30 = vld [vmem:[%s14312_s4 + $0x884] ss:$24 sps:$4 sm:$0xff]   ;;  %v9963_v45 = vld [vmem:[%s14312_s4 + $0x854] ss:$24 sps:$4 sm:$0xff]  }
 0x242   :  { %4726 = vmatprep.subr.bf16.mxu1 %v9900_v32  ;;  %v9960_v32 = vld [vmem:[%s14313_s5 + $0x274] ss:$24 sps:$4 sm:$0xff]   ;;  %v9966_v47 = vld [vmem:[%s14313_s5 + $0x244] ss:$24 sps:$4 sm:$0xff]  }
 0x247   :  { %2208 = vmatmul.mubr.bf16.vlgmr.msra.gmra.mxu0 %v11021_v37  ;;  %v9904_v37 = vld [vmem:[%s14313_s5 + $0x120] ss:$24 sps:$4 sm:$0xff]  }
 0x248   :  { %2251 = vmatmul.mubr.bf16.vlgmr.msra.gmra.mxu1 %v11023_v38  ;;  %2262 = vmatpush1.bf16.xpose.msra.mxu0 %v9895_v41  ;;  %v9909_v38 = vld [vmem:[%s14312_s4 + $0x704] ss:$24 sps:$4 sm:$0xff]   ;;  %v9955_v41 = vld [vmem:[%s14312_s4 + $0x880] ss:$24 sps:$4 sm:$0xff]  }
 0x249   :  { %2293 = vmatprep.mubr.bf16.mxu0 %v11037_v43  ;;  %4727 = vmatpush1.bf16.xpose.msra.mxu1 %v9898_v44  ;;  %v9912_v43 = vld [vmem:[%s14313_s5 + $0xf4] ss:$24 sps:$4 sm:$0xff]   ;;  %v9958_v44 = vld [vmem:[%s14313_s5 + $0x270] ss:$24 sps:$4 sm:$0xff]  }
 0x24a   :  { %4758 = vmatprep.mubr.bf16.mxu1 %v11653_v20  ;;  %2263 = vmatprep.subr.bf16.mxu0 %v9903_v46 }
 0x24b   :  { %4728 = vmatprep.subr.bf16.mxu1 %v9906_v48 }
 0x250   :  { %2264 = vmatpush1.bf16.xpose.msra.mxu0 %v9901_v49 }
 0x251   :  { %4729 = vmatpush1.bf16.xpose.msra.mxu1 %v9904_v37  ;;  %2265 = vmatprep.subr.bf16.mxu0 %v9909_v38 }
 0x252   :  { %4730 = vmatprep.subr.bf16.mxu1 %v9912_v43 }
 0x258   :  { %2266 = vmatpush1.bf16.xpose.msra.mxu0 %v9907_v50  ;;  %v9961_v50 = vld [vmem:[%s14312_s4 + $0x850] ss:$24 sps:$4 sm:$0xff]  }
 0x259   :  { %4731 = vmatpush1.bf16.xpose.msra.mxu1 %v9910_v51  ;;  %2267 = vmatprep.subr.bf16.mxu0 %v9915_v52  ;;  %v9964_v52 = vld [vmem:[%s14313_s5 + $0x240] ss:$24 sps:$4 sm:$0xff]  }
 0x25a   :  { %4732 = vmatprep.subr.bf16.mxu1 %v9918_v53  ;;  %v9969_v53 = vld [vmem:[%s14312_s4 + $0x824] ss:$24 sps:$4 sm:$0xff]  }
 0x260   :  { %2268 = vmatpush1.bf16.xpose.msra.mxu0 %v9913_v25  ;;  %v9972_v25 = vld [vmem:[%s14313_s5 + $0x214] ss:$24 sps:$4 sm:$0xff]  }
 0x261   :  { %4733 = vmatpush1.bf16.xpose.msra.mxu1 %v9916_v54  ;;  %2269 = vmatprep.subr.bf16.mxu0 %v9921_v55 }
 0x262   :  { %4734 = vmatprep.subr.bf16.mxu1 %v9924_v56  ;;  %v9967_v56 = vld [vmem:[%s14312_s4 + $0x820] ss:$24 sps:$4 sm:$0xff]  }
 0x268   :  { %2270 = vmatpush1.bf16.xpose.msra.mxu0 %v9919_v57  ;;  %v9970_v57 = vld [vmem:[%s14313_s5 + $0x210] ss:$24 sps:$4 sm:$0xff]  }
 0x269   :  { %4735 = vmatpush1.bf16.xpose.msra.mxu1 %v9922_v58  ;;  %2271 = vmatprep.subr.bf16.mxu0 %v9927_v59  ;;  %v9975_v58 = vld [vmem:[%s14312_s4 + $0x7f4] ss:$24 sps:$4 sm:$0xff]   ;;  %v9978_v59 = vld [vmem:[%s14313_s5 + $0x1e4] ss:$24 sps:$4 sm:$0xff]  }
 0x26a   :  { %4736 = vmatprep.subr.bf16.mxu1 %v9930_v60 }
 0x270   :  { %2272 = vmatpush1.bf16.xpose.msra.mxu0 %v9925_v61  ;;  %v9973_v61 = vld [vmem:[%s14312_s4 + $0x7f0] ss:$24 sps:$4 sm:$0xff]  }
 0x271   :  { %4737 = vmatpush1.bf16.xpose.msra.mxu1 %v9928_v62  ;;  %2273 = vmatprep.subr.bf16.mxu0 %v9933_v63  ;;  %v9976_v62 = vld [vmem:[%s14313_s5 + $0x1e0] ss:$24 sps:$4 sm:$0xff]  }
 0x272   :  { %4738 = vmatprep.subr.bf16.mxu1 %v9936_v0  ;;  %v9981_v0 = vld [vmem:[%s14312_s4 + $0x7c4] ss:$24 sps:$4 sm:$0xff]  }
 0x278   :  { %2274 = vmatpush1.bf16.xpose.msra.mxu0 %v9931_v21  ;;  %v2306_v21 = vld [vmem:[%s14314_s2 + $0x10] sm:$0xff] }
 0x279   :  { %4739 = vmatpush1.bf16.xpose.msra.mxu1 %v9934_v22  ;;  %2275 = vmatprep.subr.bf16.mxu0 %v9939_v1  ;;  %v2312_v22 = vld [vmem:[%s14314_s2 + $0x40] sm:$0xff] }
 0x27a   :  { %4740 = vmatprep.subr.bf16.mxu1 %v9942_v2  ;;  %v9984_v2 = vld [vmem:[%s14313_s5 + $0x1b4] ss:$24 sps:$4 sm:$0xff]  }
 0x280   :  { %2276 = vmatpush1.bf16.xpose.msra.mxu0 %v9937_v34 }
 0x281   :  { %4741 = vmatpush1.bf16.xpose.msra.mxu1 %v9940_v3  ;;  %2277 = vmatprep.subr.bf16.mxu0 %v9945_v4 }
 0x282   :  { %4742 = vmatprep.subr.bf16.mxu1 %v9948_v6 }
 0x287   :  { %v2123_v13 = vpop.f32.mrf.mxu0 }
 0x288   :  { %v2124_v14 = vadd.f32 %v2123_v13, %v2080_v33  ;;  %v2166_v15 = vpop.f32.mrf.mxu1  ;;  %2278 = vmatpush2.bf16.xpose.msra.mxu0 %v9943_v8  ;;  %v9982_v8 = vld [vmem:[%s14313_s5 + $0x1b0] ss:$24 sps:$4 sm:$0xff]   ;;  %v9993_v13 = vld [vmem:[%s14313_s5 + $0x15c] ss:$24 sps:$4 sm:$0xff]  }
 0x289   :  { %4743 = vmatpush2.bf16.xpose.msra.mxu1 %v9946_v9  ;;  %v2125_v16 = vpop.f32.mrf.mxu0  ;;  %2279 = vmatprep.subr.bf16.mxu0 %v9951_v10  ;;  %v9987_v9 = vld [vmem:[%s14312_s4 + $0x794] ss:$24 sps:$4 sm:$0xff]   ;;  %v9990_v10 = vld [vmem:[%s14313_s5 + $0x184] ss:$24 sps:$4 sm:$0xff]  }
 0x28a   :  { %v2167_v17 = vadd.f32 %v2166_v15, %v2124_v14  ;;  %v2168_v18 = vpop.f32.mrf.mxu1  ;;  %4744 = vmatprep.subr.bf16.mxu1 %v9954_v12  ;;  %v2126_v42 = vadd.f32 %v2125_v16, %v2082_v5  ;;  %v9988_v12 = vld [vmem:[%s14313_s5 + $0x180] ss:$24 sps:$4 sm:$0xff]   ;;  %v10035_v14 = vld [vmem:[%s14313_s5 + $0x164] ss:$24 sps:$4 sm:$0xff]   ;;  %v2313_v16 = vld [vmem:[%s14314_s2 + $0x48] sm:$0xff] }
 0x28b   :  { %v2127_v23 = vpop.f32.mrf.mxu0 }
 0x28c   :  { %v8732_v24 = vmul.f32 -1.442695, %v2167_v17  ;;  %v2128_v26 = vadd.f32 %v2127_v23, %v2084_v7  ;;  %v2170_v28 = vpop.f32.mrf.mxu1  ;;  %v2169_v49 = vadd.f32 %v2168_v18, %v2126_v42  ;;  %v9979_v7 = vld [vmem:[%s14312_s4 + $0x7c0] ss:$24 sps:$4 sm:$0xff]   ;;  %v10053_v42 = vld [vmem:[%s14313_s5 + $0xd4] ss:$24 sps:$4 sm:$0xff]  }
 0x28d   :  { %v2129_v36 = vpop.f32.mrf.mxu0  ;;  %v2307_v18 = vld [vmem:[%s14314_s2 + $0x18] sm:$0xff] }
 0x28e   :  { %10554 = vpow2.f32 %v8732_v24  ;;  %v2171_v31 = vadd.f32 %v2170_v28, %v2128_v26  ;;  %v2130_v39 = vadd.f32 %v2129_v36, %v2086_v11  ;;  %v2172_v46 = vpop.f32.mrf.mxu1  ;;  %v8733_v51 = vmul.f32 -1.442695, %v2169_v49  ;;  %v9985_v11 = vld [vmem:[%s14312_s4 + $0x790] ss:$24 sps:$4 sm:$0xff]   ;;  %v10033_v28 = vld [vmem:[%s14313_s5 + $0x160] ss:$24 sps:$4 sm:$0xff]  }
 0x28f   :  { %v9991_v24 = vld [vmem:[%s14313_s5 + $0x158] ss:$24 sps:$4 sm:$0xff]   ;;  %v10008_v49 = vld [vmem:[%s14313_s5 + $0x6c] ss:$24 sps:$4 sm:$0xff]  }
 0x290   :  { %v8738_v35 = vmul.f32 -1.442695, %v2171_v31  ;;  %2280 = vmatpush2.bf16.xpose.msra.mxu0 %v9949_v27  ;;  %v2173_v48 = vadd.f32 %v2172_v46, %v2130_v39  ;;  %v9996_v27 = vld [vmem:[%s14313_s5 + $0x12c] ss:$24 sps:$4 sm:$0xff]   ;;  %v9994_v31 = vld [vmem:[%s14313_s5 + $0x128] ss:$24 sps:$4 sm:$0xff]  }
 0x291   :  { %4745 = vmatpush2.bf16.xpose.msra.mxu1 %v9952_v29  ;;  %2281 = vmatprep.subr.bf16.mxu0 %v9957_v30  ;;  %v10041_v30 = vld [vmem:[%s14313_s5 + $0x134] ss:$24 sps:$4 sm:$0xff]   ;;  %v9997_v36 = vld [vmem:[%s14313_s5 + $0xf8] ss:$24 sps:$4 sm:$0xff]  }
 0x292   :  { %10556 = vpow2.f32 %v8738_v35  ;;  %4746 = vmatprep.subr.bf16.mxu1 %v9960_v32  ;;  %v8739_v38 = vmul.f32 -1.442695, %v2173_v48  ;;  %v10039_v32 = vld [vmem:[%s14313_s5 + $0x130] ss:$24 sps:$4 sm:$0xff]   ;;  %v10047_v35 = vld [vmem:[%s14313_s5 + $0x104] ss:$24 sps:$4 sm:$0xff]  }
 0x293   :  { %v10002_v39 = vld [vmem:[%s14313_s5 + $0xcc] ss:$24 sps:$4 sm:$0xff]   ;;  %v10051_v46 = vld [vmem:[%s14313_s5 + $0xd0] ss:$24 sps:$4 sm:$0xff]  }
 0x294   :  { %10558 = vpow2.f32 %v8739_v38  ;;  %v10003_v48 = vld [vmem:[%s14313_s5 + $0x98] ss:$24 sps:$4 sm:$0xff]   ;;  %v10065_v38 = vld [vmem:[%s14313_s5 + $0x74] ss:$24 sps:$4 sm:$0xff]  }
 0x298   :  { %2282 = vmatpush2.bf16.xpose.msra.mxu0 %v9955_v41  ;;  %v10045_v41 = vld [vmem:[%s14313_s5 + $0x100] ss:$24 sps:$4 sm:$0xff]  }
 0x299   :  { %4747 = vmatpush2.bf16.xpose.msra.mxu1 %v9958_v44  ;;  %2283 = vmatprep.subr.bf16.mxu0 %v9963_v45  ;;  %v10000_v44 = vld [vmem:[%s14313_s5 + $0xc8] ss:$24 sps:$4 sm:$0xff]   ;;  %v10005_v45 = vld [vmem:[%s14313_s5 + $0x9c] ss:$24 sps:$4 sm:$0xff]  }
 0x29a   :  { %4748 = vmatprep.subr.bf16.mxu1 %v9966_v47  ;;  %v10059_v47 = vld [vmem:[%s14313_s5 + $0xa4] ss:$24 sps:$4 sm:$0xff]  }
 0x29b   :  { %v10555_v37 = vpop.eup %10554 }
 0x29c   :  { %v2354_v43 = vadd.f32 1.0, %v10555_v37  ;;  %v10057_v37 = vld [vmem:[%s14313_s5 + $0xa0] ss:$24 sps:$4 sm:$0xff]  }
 0x29e   :  { %10560 = vrcp.f32 %v2354_v43  ;;  %v10006_v43 = vld [vmem:[%s14313_s5 + $0x68] ss:$24 sps:$4 sm:$0xff]  }
 0x29f   :  { %v10557_v54 = vpop.eup %10556  ;;  %10562 = vpow2.f32 %v8733_v51  ;;  %v10063_v51 = vld [vmem:[%s14313_s5 + $0x70] ss:$24 sps:$4 sm:$0xff]  }
 0x2a0   :  { %v2360_v55 = vadd.f32 1.0, %v10557_v54  ;;  %2284 = vmatpush2.bf16.xpose.msra.mxu0 %v9961_v50  ;;  %v10011_v50 = vld [vmem:[%s14313_s5 + $0x3c] ss:$24 sps:$4 sm:$0xff]   ;;  %v10069_v54 = vld [vmem:[%s14313_s5 + $0x40] ss:$24 sps:$4 sm:$0xff]  }
 0x2a1   :  { %4749 = vmatpush2.bf16.xpose.msra.mxu1 %v9964_v52  ;;  %2285 = vmatprep.subr.bf16.mxu0 %v9969_v53  ;;  %v10559_v60 = vpop.eup %10558  ;;  %v10071_v52 = vld [vmem:[%s14313_s5 + $0x44] ss:$24 sps:$4 sm:$0xff]   ;;  %v10009_v53 = vld [vmem:[%s14313_s5 + $0x38] ss:$24 sps:$4 sm:$0xff]  }
 0x2a2   :  { %10564 = vrcp.f32 %v2360_v55  ;;  %4750 = vmatprep.subr.bf16.mxu1 %v9972_v25  ;;  %v2361_v34 = vadd.f32 1.0, %v10559_v60  ;;  %v10014_v25 = vld [vmem:[%s14313_s5 + $0xc] ss:$24 sps:$4 sm:$0xff]   ;;  %v10015_v60 = vld [vmem:[%s14313_s5 + $0x2d8] ss:$24 sps:$4 sm:$0xff]  }
 0x2a3   :  { %v10077_v55 = vld [vmem:[%s14313_s5 + $0x14] ss:$24 sps:$4 sm:$0xff]  }
 0x2a4   :  { %10566 = vrcp.f32 %v2361_v34  ;;  %v10093_v34 = vld [vmem:[%s14313_s5 + $0x280] ss:$24 sps:$4 sm:$0xff]  }
 0x2a8   :  { %2286 = vmatpush2.bf16.xpose.msra.mxu0 %v9967_v56  ;;  %v10012_v56 = vld [vmem:[%s14313_s5 + $0x8] ss:$24 sps:$4 sm:$0xff]  }
 0x2a9   :  { %4751 = vmatpush2.bf16.xpose.msra.mxu1 %v9970_v57  ;;  %2287 = vmatprep.subr.bf16.mxu0 %v9975_v58  ;;  %v10017_v57 = vld [vmem:[%s14313_s5 + $0x2dc] ss:$24 sps:$4 sm:$0xff]   ;;  %v10075_v58 = vld [vmem:[%s14313_s5 + $0x10] ss:$24 sps:$4 sm:$0xff]  }
 0x2aa   :  { %4752 = vmatprep.subr.bf16.mxu1 %v9978_v59  ;;  %v10083_v59 = vld [vmem:[%s14313_s5 + $0x2e4] ss:$24 sps:$4 sm:$0xff]  }
 0x2ab   :  { %v10561_v63 = vpop.eup %10560 }
 0x2ac   :  { %v10563_v1 = vpop.eup %10562  ;;  %v2390_v3 = vmul.f32 %v10561_v63, %v2306_v21  ;;  %v10089_v63 = vld [vmem:[%s14313_s5 + $0x2b4] ss:$24 sps:$4 sm:$0xff]  }
 0x2ad   :  { %v2355_v5 = vadd.f32 1.0, %v10563_v1  ;;  %v10023_v21 = vld [vmem:[%s14313_s5 + $0x27c] ss:$24 sps:$4 sm:$0xff]  }
 0x2ae   :  { %v10095_v1 = vld [vmem:[%s14313_s5 + $0x284] ss:$24 sps:$4 sm:$0xff]  }
 0x2af   :  { %v10565_v33 = vpop.eup %10564  ;;  %10568 = vrcp.f32 %v2355_v5  ;;  %v10029_v5 = vld [vmem:[%s14313_s5 + $0x21c] ss:$24 sps:$4 sm:$0xff]  }
 0x2b0   :  { %2288 = vmatpush2.bf16.xpose.msra.mxu0 %v9973_v61  ;;  %v2396_v4 = vmul.f32 %v10565_v33, %v2312_v22  ;;  %v10020_v61 = vld [vmem:[%s14313_s5 + $0x2ac] ss:$24 sps:$4 sm:$0xff]   ;;  %v10087_v22 = vld [vmem:[%s14313_s5 + $0x2b0] ss:$24 sps:$4 sm:$0xff]  }
 0x2b1   :  { %4753 = vmatpush2.bf16.xpose.msra.mxu1 %v9976_v62  ;;  %2289 = vmatprep.subr.bf16.mxu0 %v9981_v0  ;;  %v10567_v15 = vpop.eup %10566  ;;  %v10081_v62 = vld [vmem:[%s14313_s5 + $0x2e0] ss:$24 sps:$4 sm:$0xff]   ;;  %v10026_v33 = vld [vmem:[%s14313_s5 + $0x24c] ss:$24 sps:$4 sm:$0xff]  }
 0x2b2   :  { %4754 = vmatprep.subr.bf16.mxu1 %v9984_v2  ;;  %v11819_v6 = vpack.c.bf16 %v2396_v4, %v2390_v3  ;;  %v2397_v23 = vmul.f32 %v10567_v15, %v2313_v16  ;;  %v10018_v0 = vld [vmem:[%s14313_s5 + $0x2a8] ss:$24 sps:$4 sm:$0xff]   ;;  %v10021_v2 = vld [vmem:[%s14313_s5 + $0x278] ss:$24 sps:$4 sm:$0xff]   ;;  %v10101_v3 = vld [vmem:[%s14313_s5 + $0x254] ss:$24 sps:$4 sm:$0xff]  }
 0x2b3   :  { %v10024_v4 = vld [vmem:[%s14313_s5 + $0x248] ss:$24 sps:$4 sm:$0xff]   ;;  %v10119_v16 = vld [vmem:[%s14313_s5 + $0x1c4] ss:$24 sps:$4 sm:$0xff]  }
 0x2b4   :  { %v10111_v15 = vld [vmem:[%s14313_s5 + $0x1f0] ss:$24 sps:$4 sm:$0xff]  }
 0x2b8   :  { %2290 = vmatpush2.bf16.xpose.msra.mxu0 %v9979_v7  ;;  %v10099_v7 = vld [vmem:[%s14313_s5 + $0x250] ss:$24 sps:$4 sm:$0xff]  }
 0x2b9   :  { %4755 = vmatpush2.bf16.xpose.msra.mxu1 %v9982_v8  ;;  %2291 = vmatprep.subr.bf16.mxu0 %v9987_v9  ;;  %v10107_v8 = vld [vmem:[%s14313_s5 + $0x224] ss:$24 sps:$4 sm:$0xff]   ;;  %v10027_v9 = vld [vmem:[%s14313_s5 + $0x218] ss:$24 sps:$4 sm:$0xff]  }
 0x2ba   :  { %4756 = vmatprep.subr.bf16.mxu1 %v9990_v10  ;;  %v10032_v10 = vld [vmem:[%s14313_s5 + $0x1ec] ss:$24 sps:$4 sm:$0xff]  }
 0x2bc   :  { %v10569_v17 = vpop.eup %10568 }
 0x2bd   :  { %v2391_v26 = vmul.f32 %v10569_v17, %v2307_v18  ;;  %v10036_v17 = vld [vmem:[%s14313_s5 + $0x1b8] ss:$24 sps:$4 sm:$0xff]   ;;  %v10044_v18 = vld [vmem:[%s14313_s5 + $0x18c] ss:$24 sps:$4 sm:$0xff]  }
 0x2bf   :  { %v11861_v29 = vpack.c.bf16 %v2397_v23, %v2391_v26  ;;  %v10117_v23 = vld [vmem:[%s14313_s5 + $0x1c0] ss:$24 sps:$4 sm:$0xff]  }
 0x2c0   :  { %2292 = vmatpush2.bf16.xpose.msra.mxu0 %v9985_v11  ;;  %v10105_v11 = vld [vmem:[%s14313_s5 + $0x220] ss:$24 sps:$4 sm:$0xff]  }
 0x2c1   :  { %4757 = vmatpush2.bf16.xpose.msra.mxu1 %v9988_v12  ;;  %4769 = vmatprep.subr.bf16.mxu0 %v9993_v13  ;;  %v10113_v12 = vld [vmem:[%s14313_s5 + $0x1f4] ss:$24 sps:$4 sm:$0xff]   ;;  %v10030_v13 = vld [vmem:[%s14313_s5 + $0x1e8] ss:$24 sps:$4 sm:$0xff]  }
 0x2c2   :  { %4812 = vmatprep.subr.bf16.mxu1 %v10035_v14  ;;  %v10038_v14 = vld [vmem:[%s14313_s5 + $0x1bc] ss:$24 sps:$4 sm:$0xff]   ;;  %v10042_v26 = vld [vmem:[%s14313_s5 + $0x188] ss:$24 sps:$4 sm:$0xff]  }
 0x2c7   :  { %2294 = vmatmul.mubr.bf16.vlgmr.msra.gmra.mxu0 %v11025_v40  ;;  %v9999_v40 = vld [vmem:[%s14313_s5 + $0xfc] ss:$24 sps:$4 sm:$0xff]  }
 0x2c8   :  { %4759 = vmatmul.mubr.bf16.vlgmr.msra.gmra.mxu1 %v11607_v19  ;;  %4770 = vmatpush1.bf16.xpose.msra.mxu0 %v9991_v24  ;;  %v10125_v24 = vld [vmem:[%s14313_s5 + $0x194] ss:$24 sps:$4 sm:$0xff]  }
 0x2c9   :  { %4801 = vmatprep.mubr.bf16.mxu0 %v11861_v29  ;;  %4771 = vmatprep.subr.bf16.mxu0 %v9996_v27  ;;  %v10050_v27 = vld [vmem:[%s14313_s5 + $0x454] ss:$24 sps:$4 sm:$0xff]  }
 0x2ca   :  { %4813 = vmatpush1.bf16.xpose.msra.mxu1 %v10033_v28  ;;  %v10123_v28 = vld [vmem:[%s14313_s5 + $0x190] ss:$24 sps:$4 sm:$0xff]  }
 0x2cb   :  { %4814 = vmatprep.subr.bf16.mxu1 %v10041_v30  ;;  %v10131_v30 = vld [vmem:[%s14313_s5 + $0x45c] ss:$24 sps:$4 sm:$0xff]  }
 0x2d0   :  { %4772 = vmatpush1.bf16.xpose.msra.mxu0 %v9994_v31  ;;  %v10048_v31 = vld [vmem:[%s14313_s5 + $0x450] ss:$24 sps:$4 sm:$0xff]  }
 0x2d1   :  { %4773 = vmatprep.subr.bf16.mxu0 %v9999_v40  ;;  %v10056_v40 = vld [vmem:[%s14313_s5 + $0x424] ss:$24 sps:$4 sm:$0xff]  }
 0x2d2   :  { %4815 = vmatpush1.bf16.xpose.msra.mxu1 %v10039_v32  ;;  %v10054_v32 = vld [vmem:[%s14313_s5 + $0x420] ss:$24 sps:$4 sm:$0xff]  }
 0x2d3   :  { %4816 = vmatprep.subr.bf16.mxu1 %v10047_v35  ;;  %v10062_v35 = vld [vmem:[%s14313_s5 + $0x3f4] ss:$24 sps:$4 sm:$0xff]  }
 0x2d8   :  { %4774 = vmatpush1.bf16.xpose.msra.mxu0 %v9997_v36  ;;  %v10060_v36 = vld [vmem:[%s14313_s5 + $0x3f0] ss:$24 sps:$4 sm:$0xff]  }
 0x2d9   :  { %4775 = vmatprep.subr.bf16.mxu0 %v10002_v39  ;;  %v10068_v39 = vld [vmem:[%s14313_s5 + $0x3c4] ss:$24 sps:$4 sm:$0xff]  }
 0x2da   :  { %4817 = vmatpush1.bf16.xpose.msra.mxu1 %v10045_v41  ;;  %v10066_v41 = vld [vmem:[%s14313_s5 + $0x3c0] ss:$24 sps:$4 sm:$0xff]  }
 0x2db   :  { %4818 = vmatprep.subr.bf16.mxu1 %v10053_v42  ;;  %v10074_v42 = vld [vmem:[%s14313_s5 + $0x394] ss:$24 sps:$4 sm:$0xff]  }
 0x2e0   :  { %4776 = vmatpush1.bf16.xpose.msra.mxu0 %v10000_v44  ;;  %v10072_v44 = vld [vmem:[%s14313_s5 + $0x390] ss:$24 sps:$4 sm:$0xff]  }
 0x2e1   :  { %4777 = vmatprep.subr.bf16.mxu0 %v10005_v45  ;;  %v10080_v45 = vld [vmem:[%s14313_s5 + $0x364] ss:$24 sps:$4 sm:$0xff]  }
 0x2e2   :  { %4819 = vmatpush1.bf16.xpose.msra.mxu1 %v10051_v46  ;;  %v10078_v46 = vld [vmem:[%s14313_s5 + $0x360] ss:$24 sps:$4 sm:$0xff]  }
 0x2e3   :  { %4820 = vmatprep.subr.bf16.mxu1 %v10059_v47  ;;  %v10086_v47 = vld [vmem:[%s14313_s5 + $0x334] ss:$24 sps:$4 sm:$0xff]  }
 0x2e8   :  { %4778 = vmatpush1.bf16.xpose.msra.mxu0 %v10003_v48  ;;  %v10084_v48 = vld [vmem:[%s14313_s5 + $0x330] ss:$24 sps:$4 sm:$0xff]  }
 0x2e9   :  { %4779 = vmatprep.subr.bf16.mxu0 %v10008_v49  ;;  %v10092_v49 = vld [vmem:[%s14313_s5 + $0x304] ss:$24 sps:$4 sm:$0xff]  }
 0x2ea   :  { %4821 = vmatpush1.bf16.xpose.msra.mxu1 %v10057_v37 }
 0x2eb   :  { %4822 = vmatprep.subr.bf16.mxu1 %v10065_v38  ;;  %v10090_v38 = vld [vmem:[%s14313_s5 + $0x300] ss:$24 sps:$4 sm:$0xff]  }
 0x2f0   :  { %4780 = vmatpush1.bf16.xpose.msra.mxu0 %v10006_v43 }
 0x2f1   :  { %4781 = vmatprep.subr.bf16.mxu0 %v10011_v50 }
 0x2f2   :  { %4823 = vmatpush1.bf16.xpose.msra.mxu1 %v10063_v51  ;;  %v10098_v51 = vld [vmem:[%s14313_s5 + $0x5d4] ss:$24 sps:$4 sm:$0xff]  }
 0x2f3   :  { %4824 = vmatprep.subr.bf16.mxu1 %v10071_v52 }
 0x2f8   :  { %4782 = vmatpush1.bf16.xpose.msra.mxu0 %v10009_v53 }
 0x2f9   :  { %4783 = vmatprep.subr.bf16.mxu0 %v10014_v25  ;;  %v10096_v25 = vld [vmem:[%s14313_s5 + $0x5d0] ss:$24 sps:$4 sm:$0xff]  }
 0x2fa   :  { %4825 = vmatpush1.bf16.xpose.msra.mxu1 %v10069_v54 }
 0x2fb   :  { %4826 = vmatprep.subr.bf16.mxu1 %v10077_v55 }
 0x300   :  { %4784 = vmatpush1.bf16.xpose.msra.mxu0 %v10012_v56  ;;  %v10104_v56 = vld [vmem:[%s14313_s5 + $0x5a4] ss:$24 sps:$4 sm:$0xff]  }
 0x301   :  { %4785 = vmatprep.subr.bf16.mxu0 %v10017_v57 }
 0x302   :  { %4827 = vmatpush1.bf16.xpose.msra.mxu1 %v10075_v58 }
 0x303   :  { %4828 = vmatprep.subr.bf16.mxu1 %v10083_v59 }
 0x307   :  { %v2209_v37 = vpop.f32.mrf.mxu0 }
 0x308   :  { %4786 = vmatpush2.bf16.xpose.msra.mxu0 %v10015_v60  ;;  %v2252_v43 = vpop.f32.mrf.mxu1 }
 0x309   :  { %4787 = vmatprep.subr.bf16.mxu0 %v10020_v61  ;;  %v2211_v50 = vpop.f32.mrf.mxu0  ;;  %v2253_v57 = vadd.f32 %v2252_v43, %v2209_v37  ;;  %v10132_v43 = vld [vmem:[%s14313_s5 + $0x4b0] ss:$24 sps:$4 sm:$0xff]  }
 0x30a   :  { %4829 = vmatpush2.bf16.xpose.msra.mxu1 %v10081_v62  ;;  %v2254_v52 = vpop.f32.mrf.mxu1 }
 0x30b   :  { %4830 = vmatprep.subr.bf16.mxu1 %v10089_v63  ;;  %v2213_v53 = vpop.f32.mrf.mxu0  ;;  %v2255_v59 = vadd.f32 %v2254_v52, %v2211_v50  ;;  %v10140_v50 = vld [vmem:[%s14313_s5 + $0x484] ss:$24 sps:$4 sm:$0xff]  }
 0x30c   :  { %v2256_v54 = vpop.f32.mrf.mxu1  ;;  %v10143_v52 = vld [vmem:[%s14313_s5 + $0x3fc] ss:$24 sps:$4 sm:$0xff]  }
 0x30d   :  { %v2215_v55 = vpop.f32.mrf.mxu0  ;;  %v2257_v63 = vadd.f32 %v2256_v54, %v2213_v53  ;;  %v10138_v53 = vld [vmem:[%s14313_s5 + $0x480] ss:$24 sps:$4 sm:$0xff]  }
 0x30e   :  { %v2258_v61 = vpop.f32.mrf.mxu1  ;;  %v10141_v54 = vld [vmem:[%s14313_s5 + $0x3f8] ss:$24 sps:$4 sm:$0xff]  }
 0x310   :  { %4788 = vmatpush2.bf16.xpose.msra.mxu0 %v10018_v0 }
 0x311   :  { %4789 = vmatprep.subr.bf16.mxu0 %v10023_v21 }
 0x312   :  { %4831 = vmatpush2.bf16.xpose.msra.mxu1 %v10087_v22 }
 0x313   :  { %4832 = vmatprep.subr.bf16.mxu1 %v10095_v1  ;;  %v2259_v1 = vadd.f32 %v2258_v61, %v2215_v55  ;;  %v10149_v55 = vld [vmem:[%s14313_s5 + $0x3cc] ss:$24 sps:$4 sm:$0xff]  }
 0x314   :  { %v10158_v61 = vld [vmem:[%s14313_s5 + $0x404] ss:$24 sps:$4 sm:$0xff]  }
 0x318   :  { %4790 = vmatpush2.bf16.xpose.msra.mxu0 %v10021_v2 }
 0x319   :  { %4791 = vmatprep.subr.bf16.mxu0 %v10026_v33 }
 0x31a   :  { %4833 = vmatpush2.bf16.xpose.msra.mxu1 %v10093_v34  ;;  %v10102_v34 = vld [vmem:[%s14313_s5 + $0x5a0] ss:$24 sps:$4 sm:$0xff]  }
 0x31b   :  { %4834 = vmatprep.subr.bf16.mxu1 %v10101_v3 }
 0x320   :  { %4792 = vmatpush2.bf16.xpose.msra.mxu0 %v10024_v4  ;;  %v10110_v4 = vld [vmem:[%s14313_s5 + $0x574] ss:$24 sps:$4 sm:$0xff]  }
 0x321   :  { %4793 = vmatprep.subr.bf16.mxu0 %v10029_v5 }
 0x322   :  { %4835 = vmatpush2.bf16.xpose.msra.mxu1 %v10099_v7 }
 0x323   :  { %4836 = vmatprep.subr.bf16.mxu1 %v10107_v8 }
 0x328   :  { %4794 = vmatpush2.bf16.xpose.msra.mxu0 %v10027_v9  ;;  %v10108_v9 = vld [vmem:[%s14313_s5 + $0x570] ss:$24 sps:$4 sm:$0xff]  }
 0x329   :  { %4795 = vmatprep.subr.bf16.mxu0 %v10032_v10  ;;  %v10116_v10 = vld [vmem:[%s14313_s5 + $0x544] ss:$24 sps:$4 sm:$0xff]  }
 0x32a   :  { %4837 = vmatpush2.bf16.xpose.msra.mxu1 %v10105_v11 }
 0x32b   :  { %4838 = vmatprep.subr.bf16.mxu1 %v10113_v12 }
 0x330   :  { %4796 = vmatpush2.bf16.xpose.msra.mxu0 %v10030_v13 }
 0x331   :  { %4797 = vmatprep.subr.bf16.mxu0 %v10038_v14  ;;  %v10114_v14 = vld [vmem:[%s14313_s5 + $0x540] ss:$24 sps:$4 sm:$0xff]  }
 0x332   :  { %4839 = vmatpush2.bf16.xpose.msra.mxu1 %v10111_v15 }
 0x333   :  { %4840 = vmatprep.subr.bf16.mxu1 %v10119_v16 }
 0x338   :  { %4798 = vmatpush2.bf16.xpose.msra.mxu0 %v10036_v17  ;;  %v10122_v17 = vld [vmem:[%s14313_s5 + $0x514] ss:$24 sps:$4 sm:$0xff]  }
 0x339   :  { %4799 = vmatprep.subr.bf16.mxu0 %v10044_v18 }
 0x33a   :  { %4841 = vmatpush2.bf16.xpose.msra.mxu1 %v10117_v23 }
 0x33b   :  { %4842 = vmatprep.subr.bf16.mxu1 %v10125_v24 }
 0x340   :  { %4800 = vmatpush2.bf16.xpose.msra.mxu0 %v10042_v26  ;;  %v10120_v26 = vld [vmem:[%s14313_s5 + $0x510] ss:$24 sps:$4 sm:$0xff]  }
 0x341   :  { %4855 = vmatprep.subr.bf16.mxu0 %v10050_v27  ;;  %v10128_v27 = vld [vmem:[%s14313_s5 + $0x4e4] ss:$24 sps:$4 sm:$0xff]  }
 0x342   :  { %4843 = vmatpush2.bf16.xpose.msra.mxu1 %v10123_v28 }
 0x343   :  { %4898 = vmatprep.subr.bf16.mxu1 %v10131_v30  ;;  %v10126_v30 = vld [vmem:[%s14313_s5 + $0x4e0] ss:$24 sps:$4 sm:$0xff]  }
 0x347   :  { %4802 = vmatmul.mubr.bf16.vlgmr.msra.gmra.mxu0 %v11819_v6 }
 0x348   :  { %4856 = vmatpush1.bf16.xpose.msra.mxu0 %v10048_v31  ;;  %4887 = vmatprep.mubr.bf16.mxu0 %v11653_v20  ;;  %v2314_v31 = vld [vmem:[%s14314_s2 + $0x50] sm:$0xff] }
 0x349   :  { %4857 = vmatprep.subr.bf16.mxu0 %v10056_v40 }
 0x350   :  { %4858 = vmatpush1.bf16.xpose.msra.mxu0 %v10054_v32  ;;  %v2309_v32 = vld [vmem:[%s14314_s2 + $0x28] sm:$0xff] }
 0x351   :  { %4859 = vmatprep.subr.bf16.mxu0 %v10062_v35  ;;  %v2315_v35 = vld [vmem:[%s14314_s2 + $0x58] sm:$0xff] }
 0x358   :  { %4860 = vmatpush1.bf16.xpose.msra.mxu0 %v10060_v36  ;;  %v10134_v36 = vld [vmem:[%s14313_s5 + $0x4b4] ss:$24 sps:$4 sm:$0xff]  }
 0x359   :  { %4861 = vmatprep.subr.bf16.mxu0 %v10068_v39 }
 0x360   :  { %4862 = vmatpush1.bf16.xpose.msra.mxu0 %v10066_v41  ;;  %v2308_v41 = vld [vmem:[%s14314_s2 + $0x20] sm:$0xff] }
 0x361   :  { %4863 = vmatprep.subr.bf16.mxu0 %v10074_v42 }
 0x368   :  { %4864 = vmatpush1.bf16.xpose.msra.mxu0 %v10072_v44 }
 0x369   :  { %4865 = vmatprep.subr.bf16.mxu0 %v10080_v45 }
 0x370   :  { %4866 = vmatpush1.bf16.xpose.msra.mxu0 %v10078_v46 }
 0x371   :  { %4867 = vmatprep.subr.bf16.mxu0 %v10086_v47 }
 0x378   :  { %4868 = vmatpush1.bf16.xpose.msra.mxu0 %v10084_v48 }
 0x379   :  { %4869 = vmatprep.subr.bf16.mxu0 %v10092_v49  ;;  %v10129_v49 = vld [vmem:[%s14313_s5 + $0x458] ss:$24 sps:$4 sm:$0xff]  }
 0x380   :  { %4870 = vmatpush1.bf16.xpose.msra.mxu0 %v10090_v38  ;;  %v10137_v38 = vld [vmem:[%s14313_s5 + $0x42c] ss:$24 sps:$4 sm:$0xff]  }
 0x381   :  { %4871 = vmatprep.subr.bf16.mxu0 %v10098_v51  ;;  %v10135_v51 = vld [vmem:[%s14313_s5 + $0x428] ss:$24 sps:$4 sm:$0xff]  }
 0x387   :  { %v2295_v58 = vpop.f32.mrf.mxu0 }
 0x388   :  { %v2296_v60 = vadd.f32 %v2295_v58, %v2253_v57  ;;  %4872 = vmatpush2.bf16.xpose.msra.mxu0 %v10096_v25  ;;  %v10146_v25 = vld [vmem:[%s14313_s5 + $0x464] ss:$24 sps:$4 sm:$0xff]   ;;  %v10152_v57 = vld [vmem:[%s14313_s5 + $0x434] ss:$24 sps:$4 sm:$0xff]   ;;  %v10147_v58 = vld [vmem:[%s14313_s5 + $0x3c8] ss:$24 sps:$4 sm:$0xff]  }
 0x389   :  { %v2297_v62 = vpop.f32.mrf.mxu0  ;;  %4873 = vmatprep.subr.bf16.mxu0 %v10104_v56  ;;  %v10144_v56 = vld [vmem:[%s14313_s5 + $0x460] ss:$24 sps:$4 sm:$0xff]  }
 0x38a   :  { %v8734_v0 = vmul.f32 -1.442695, %v2296_v60  ;;  %v2298_v21 = vadd.f32 %v2297_v62, %v2255_v59  ;;  %v10155_v59 = vld [vmem:[%s14313_s5 + $0x39c] ss:$24 sps:$4 sm:$0xff]   ;;  %v10150_v60 = vld [vmem:[%s14313_s5 + $0x430] ss:$24 sps:$4 sm:$0xff]  }
 0x38b   :  { %v2299_v22 = vpop.f32.mrf.mxu0  ;;  %v10153_v62 = vld [vmem:[%s14313_s5 + $0x398] ss:$24 sps:$4 sm:$0xff]  }
 0x38c   :  { %v8735_v2 = vmul.f32 -1.442695, %v2298_v21  ;;  %v2300_v33 = vadd.f32 %v2299_v22, %v2257_v63  ;;  %10570 = vpow2.f32 %v8734_v0  ;;  %v10161_v63 = vld [vmem:[%s14313_s5 + $0x36c] ss:$24 sps:$4 sm:$0xff]   ;;  %v10156_v0 = vld [vmem:[%s14313_s5 + $0x400] ss:$24 sps:$4 sm:$0xff]  }
 0x38d   :  { %v2301_v3 = vpop.f32.mrf.mxu0  ;;  %v10164_v21 = vld [vmem:[%s14313_s5 + $0x3d4] ss:$24 sps:$4 sm:$0xff]   ;;  %v10159_v22 = vld [vmem:[%s14313_s5 + $0x368] ss:$24 sps:$4 sm:$0xff]  }
 0x38e   :  { %10572 = vpow2.f32 %v8735_v2  ;;  %v8740_v5 = vmul.f32 -1.442695, %v2300_v33  ;;  %v2302_v7 = vadd.f32 %v2301_v3, %v2259_v1  ;;  %v10167_v1 = vld [vmem:[%s14313_s5 + $0x33c] ss:$24 sps:$4 sm:$0xff]   ;;  %v10162_v2 = vld [vmem:[%s14313_s5 + $0x3d0] ss:$24 sps:$4 sm:$0xff]  }
 0x38f   :  { %v10170_v33 = vld [vmem:[%s14313_s5 + $0x3a4] ss:$24 sps:$4 sm:$0xff]  }
 0x390   :  { %10574 = vpow2.f32 %v8740_v5  ;;  %v8741_v8 = vmul.f32 -1.442695, %v2302_v7  ;;  %4874 = vmatpush2.bf16.xpose.msra.mxu0 %v10102_v34  ;;  %v10165_v34 = vld [vmem:[%s14313_s5 + $0x338] ss:$24 sps:$4 sm:$0xff]   ;;  %v10173_v3 = vld [vmem:[%s14313_s5 + $0x30c] ss:$24 sps:$4 sm:$0xff]  }
 0x391   :  { %4875 = vmatprep.subr.bf16.mxu0 %v10110_v4  ;;  %v10168_v4 = vld [vmem:[%s14313_s5 + $0x3a0] ss:$24 sps:$4 sm:$0xff]   ;;  %v10176_v5 = vld [vmem:[%s14313_s5 + $0x374] ss:$24 sps:$4 sm:$0xff]  }
 0x392   :  { %10576 = vpow2.f32 %v8741_v8  ;;  %v10171_v7 = vld [vmem:[%s14313_s5 + $0x308] ss:$24 sps:$4 sm:$0xff]   ;;  %v10179_v8 = vld [vmem:[%s14313_s5 + $0x5dc] ss:$24 sps:$4 sm:$0xff]  }
 0x398   :  { %4876 = vmatpush2.bf16.xpose.msra.mxu0 %v10108_v9  ;;  %v10174_v9 = vld [vmem:[%s14313_s5 + $0x370] ss:$24 sps:$4 sm:$0xff]  }
 0x399   :  { %4877 = vmatprep.subr.bf16.mxu0 %v10116_v10  ;;  %v10571_v11 = vpop.eup %10570  ;;  %v10182_v10 = vld [vmem:[%s14313_s5 + $0x344] ss:$24 sps:$4 sm:$0xff]  }
 0x39a   :  { %v2356_v16 = vadd.f32 1.0, %v10571_v11  ;;  %v10177_v11 = vld [vmem:[%s14313_s5 + $0x5d8] ss:$24 sps:$4 sm:$0xff]  }
 0x39b   :  { %v10573_v12 = vpop.eup %10572 }
 0x39c   :  { %v2357_v13 = vadd.f32 1.0, %v10573_v12  ;;  %v10185_v12 = vld [vmem:[%s14313_s5 + $0x5ac] ss:$24 sps:$4 sm:$0xff]  }
 0x39d   :  { %v10575_v15 = vpop.eup %10574 }
 0x39e   :  { %v2362_v18 = vadd.f32 1.0, %v10575_v15  ;;  %10578 = vrcp.f32 %v2357_v13  ;;  %v10180_v13 = vld [vmem:[%s14313_s5 + $0x340] ss:$24 sps:$4 sm:$0xff]  }
 0x39f   :  { %v10577_v23 = vpop.eup %10576  ;;  %v10183_v15 = vld [vmem:[%s14313_s5 + $0x5a8] ss:$24 sps:$4 sm:$0xff]  }
 0x3a0   :  { %10580 = vrcp.f32 %v2362_v18  ;;  %v2363_v24 = vadd.f32 1.0, %v10577_v23  ;;  %4878 = vmatpush2.bf16.xpose.msra.mxu0 %v10114_v14  ;;  %v10188_v14 = vld [vmem:[%s14313_s5 + $0x314] ss:$24 sps:$4 sm:$0xff]   ;;  %v10194_v18 = vld [vmem:[%s14313_s5 + $0x5e4] ss:$24 sps:$4 sm:$0xff]   ;;  %v4760_v23 = vpop.f32.mrf.mxu1 }
 0x3a1   :  { %10582 = vrcp.f32 %v2356_v16  ;;  %4879 = vmatprep.subr.bf16.mxu0 %v10122_v17  ;;  %v10191_v16 = vld [vmem:[%s14313_s5 + $0x57c] ss:$24 sps:$4 sm:$0xff]   ;;  %v10186_v17 = vld [vmem:[%s14313_s5 + $0x310] ss:$24 sps:$4 sm:$0xff]  }
 0x3a2   :  { %10584 = vrcp.f32 %v2363_v24  ;;  %v10189_v24 = vld [vmem:[%s14313_s5 + $0x578] ss:$24 sps:$4 sm:$0xff]  }
 0x3a8   :  { %4880 = vmatpush2.bf16.xpose.msra.mxu0 %v10120_v26  ;;  %v2790_v26 = vld [vmem:[%s14315_s3] sm:$0xff] }
 0x3a9   :  { %4881 = vmatprep.subr.bf16.mxu0 %v10128_v27  ;;  %v12281_v27 = vpop.f32.mrf.mxu1 }
 0x3ab   :  { %v10579_v28 = vpop.eup %10578 }
 0x3ac   :  { %v2393_v45 = vmul.f32 %v10579_v28, %v2309_v32  ;;  %v10197_v28 = vld [vmem:[%s14313_s5 + $0x54c] ss:$24 sps:$4 sm:$0xff]  }
 0x3ad   :  { %v10581_v40 = vpop.eup %10580  ;;  %v2798_v32 = vld [vmem:[%s14315_s3 + $0x40] sm:$0xff] }
 0x3ae   :  { %v10583_v39 = vpop.eup %10582  ;;  %v2398_v44 = vmul.f32 %v10581_v40, %v2314_v31  ;;  %v10200_v31 = vld [vmem:[%s14313_s5 + $0x5b4] ss:$24 sps:$4 sm:$0xff]   ;;  %v4761_v40 = vadd.f32 %v4760_v23, %v2790_v26  ;;  %v10258_v23 = vld [vmem:[%s14313_s5 + $0x6c8] ss:$24 sps:$4 sm:$0xff]  }
 0x3af   :  { %v10585_v42 = vpop.eup %10584  ;;  %v2392_v47 = vmul.f32 %v10583_v39, %v2308_v41  ;;  %v10261_v26 = vld [vmem:[%s14313_s5 + $0x630] ss:$24 sps:$4 sm:$0xff]  }
 0x3b0   :  { %4882 = vmatpush2.bf16.xpose.msra.mxu0 %v10126_v30  ;;  %v2399_v46 = vmul.f32 %v10585_v42, %v2315_v35  ;;  %v10192_v30 = vld [vmem:[%s14313_s5 + $0x5e0] ss:$24 sps:$4 sm:$0xff]   ;;  %v4764_v35 = vpop.f32.mrf.mxu1 }
 0x3b1   :  { %4883 = vmatprep.subr.bf16.mxu0 %v10134_v36  ;;  %v12151_v37 = vpack.c.bf16 %v2398_v44, %v2392_v47  ;;  %v4765_v42 = vadd.f32 %v4764_v35, %v2798_v32  ;;  %v10195_v44 = vld [vmem:[%s14313_s5 + $0x548] ss:$24 sps:$4 sm:$0xff]   ;;  %v10275_v32 = vld [vmem:[%s14313_s5 + $0x8d4] ss:$24 sps:$4 sm:$0xff]  }
 0x3b2   :  { %v12146_v48 = vpack.c.bf16 %v2399_v46, %v2393_v45  ;;  %v10203_v46 = vld [vmem:[%s14313_s5 + $0x51c] ss:$24 sps:$4 sm:$0xff]   ;;  %v10270_v35 = vld [vmem:[%s14313_s5 + $0x668] ss:$24 sps:$4 sm:$0xff]  }
 0x3b4   :  { %4844 = vmatprep.mubr.bf16.mxu1 %v12146_v48 }
 0x3b5   :  { %4845 = vmatmul.mubr.bf16.vlgmr.msra.gmra.mxu1 %v12151_v37 }
 0x3b6   :  { %4899 = vmatpush1.bf16.xpose.msra.mxu1 %v10129_v49  ;;  %4930 = vmatprep.mubr.bf16.mxu1 %v11861_v29  ;;  %v10198_v49 = vld [vmem:[%s14313_s5 + $0x5b0] ss:$24 sps:$4 sm:$0xff]  }
 0x3b7   :  { %4900 = vmatprep.subr.bf16.mxu1 %v10137_v38  ;;  %v10206_v38 = vld [vmem:[%s14313_s5 + $0x584] ss:$24 sps:$4 sm:$0xff]  }
 0x3b8   :  { %4884 = vmatpush2.bf16.xpose.msra.mxu0 %v10132_v43  ;;  %v10201_v43 = vld [vmem:[%s14313_s5 + $0x518] ss:$24 sps:$4 sm:$0xff]  }
 0x3b9   :  { %4885 = vmatprep.subr.bf16.mxu0 %v10140_v50  ;;  %v10209_v50 = vld [vmem:[%s14313_s5 + $0x4ec] ss:$24 sps:$4 sm:$0xff]  }
 0x3be   :  { %4901 = vmatpush1.bf16.xpose.msra.mxu1 %v10135_v51  ;;  %v10204_v51 = vld [vmem:[%s14313_s5 + $0x580] ss:$24 sps:$4 sm:$0xff]  }
 0x3bf   :  { %4902 = vmatprep.subr.bf16.mxu1 %v10143_v52  ;;  %v10212_v52 = vld [vmem:[%s14313_s5 + $0x554] ss:$24 sps:$4 sm:$0xff]  }
 0x3c0   :  { %4886 = vmatpush2.bf16.xpose.msra.mxu0 %v10138_v53  ;;  %v10207_v53 = vld [vmem:[%s14313_s5 + $0x4e8] ss:$24 sps:$4 sm:$0xff]  }
 0x3c1   :  { %4941 = vmatprep.subr.bf16.mxu0 %v10146_v25  ;;  %v10215_v25 = vld [vmem:[%s14313_s5 + $0x4bc] ss:$24 sps:$4 sm:$0xff]  }
 0x3c6   :  { %4903 = vmatpush1.bf16.xpose.msra.mxu1 %v10141_v54  ;;  %v10210_v54 = vld [vmem:[%s14313_s5 + $0x550] ss:$24 sps:$4 sm:$0xff]  }
 0x3c7   :  { %4888 = vmatmul.mubr.bf16.vlgmr.msra.gmra.mxu0 %v11607_v19  ;;  %4904 = vmatprep.subr.bf16.mxu1 %v10149_v55  ;;  %v10218_v55 = vld [vmem:[%s14313_s5 + $0x524] ss:$24 sps:$4 sm:$0xff]  }
 0x3c8   :  { %4942 = vmatpush1.bf16.xpose.msra.mxu0 %v10144_v56  ;;  %4973 = vmatprep.mubr.bf16.mxu0 %v12146_v48  ;;  %v10213_v56 = vld [vmem:[%s14313_s5 + $0x4b8] ss:$24 sps:$4 sm:$0xff]  }
 0x3c9   :  { %4943 = vmatprep.subr.bf16.mxu0 %v10152_v57  ;;  %v10221_v57 = vld [vmem:[%s14313_s5 + $0x48c] ss:$24 sps:$4 sm:$0xff]  }
 0x3ce   :  { %4905 = vmatpush1.bf16.xpose.msra.mxu1 %v10147_v58  ;;  %v10216_v58 = vld [vmem:[%s14313_s5 + $0x520] ss:$24 sps:$4 sm:$0xff]  }
 0x3cf   :  { %4906 = vmatprep.subr.bf16.mxu1 %v10155_v59  ;;  %v10224_v59 = vld [vmem:[%s14313_s5 + $0x4f4] ss:$24 sps:$4 sm:$0xff]  }
 0x3d0   :  { %4944 = vmatpush1.bf16.xpose.msra.mxu0 %v10150_v60  ;;  %v10219_v60 = vld [vmem:[%s14313_s5 + $0x488] ss:$24 sps:$4 sm:$0xff]  }
 0x3d1   :  { %4945 = vmatprep.subr.bf16.mxu0 %v10158_v61  ;;  %v10227_v61 = vld [vmem:[%s14313_s5 + $0x754] ss:$24 sps:$4 sm:$0xff]  }
 0x3d6   :  { %4907 = vmatpush1.bf16.xpose.msra.mxu1 %v10153_v62  ;;  %v10222_v62 = vld [vmem:[%s14313_s5 + $0x4f0] ss:$24 sps:$4 sm:$0xff]  }
 0x3d7   :  { %4908 = vmatprep.subr.bf16.mxu1 %v10161_v63  ;;  %v10230_v63 = vld [vmem:[%s14313_s5 + $0x4c4] ss:$24 sps:$4 sm:$0xff]  }
 0x3d8   :  { %4946 = vmatpush1.bf16.xpose.msra.mxu0 %v10156_v0  ;;  %v10225_v0 = vld [vmem:[%s14313_s5 + $0x750] ss:$24 sps:$4 sm:$0xff]  }
 0x3d9   :  { %4947 = vmatprep.subr.bf16.mxu0 %v10164_v21  ;;  %v10233_v21 = vld [vmem:[%s14313_s5 + $0x724] ss:$24 sps:$4 sm:$0xff]  }
 0x3de   :  { %4909 = vmatpush1.bf16.xpose.msra.mxu1 %v10159_v22  ;;  %v10228_v22 = vld [vmem:[%s14313_s5 + $0x4c0] ss:$24 sps:$4 sm:$0xff]  }
 0x3df   :  { %4910 = vmatprep.subr.bf16.mxu1 %v10167_v1  ;;  %v10236_v1 = vld [vmem:[%s14313_s5 + $0x494] ss:$24 sps:$4 sm:$0xff]  }
 0x3e0   :  { %4948 = vmatpush1.bf16.xpose.msra.mxu0 %v10162_v2  ;;  %v10231_v2 = vld [vmem:[%s14313_s5 + $0x720] ss:$24 sps:$4 sm:$0xff]  }
 0x3e1   :  { %4949 = vmatprep.subr.bf16.mxu0 %v10170_v33  ;;  %v10239_v33 = vld [vmem:[%s14313_s5 + $0x6f4] ss:$24 sps:$4 sm:$0xff]  }
 0x3e6   :  { %4911 = vmatpush1.bf16.xpose.msra.mxu1 %v10165_v34  ;;  %v10234_v34 = vld [vmem:[%s14313_s5 + $0x490] ss:$24 sps:$4 sm:$0xff]  }
 0x3e7   :  { %4912 = vmatprep.subr.bf16.mxu1 %v10173_v3  ;;  %v10242_v3 = vld [vmem:[%s14313_s5 + $0x75c] ss:$24 sps:$4 sm:$0xff]  }
 0x3e8   :  { %4950 = vmatpush1.bf16.xpose.msra.mxu0 %v10168_v4  ;;  %v10237_v4 = vld [vmem:[%s14313_s5 + $0x6f0] ss:$24 sps:$4 sm:$0xff]  }
 0x3e9   :  { %4951 = vmatprep.subr.bf16.mxu0 %v10176_v5  ;;  %v10245_v5 = vld [vmem:[%s14313_s5 + $0x6c4] ss:$24 sps:$4 sm:$0xff]  }
 0x3ee   :  { %4913 = vmatpush1.bf16.xpose.msra.mxu1 %v10171_v7  ;;  %v10240_v7 = vld [vmem:[%s14313_s5 + $0x758] ss:$24 sps:$4 sm:$0xff]  }
 0x3ef   :  { %4914 = vmatprep.subr.bf16.mxu1 %v10179_v8  ;;  %v10248_v8 = vld [vmem:[%s14313_s5 + $0x72c] ss:$24 sps:$4 sm:$0xff]  }
 0x3f0   :  { %4952 = vmatpush1.bf16.xpose.msra.mxu0 %v10174_v9  ;;  %v10243_v9 = vld [vmem:[%s14313_s5 + $0x6c0] ss:$24 sps:$4 sm:$0xff]  }
 0x3f1   :  { %4953 = vmatprep.subr.bf16.mxu0 %v10182_v10  ;;  %v10251_v10 = vld [vmem:[%s14313_s5 + $0x694] ss:$24 sps:$4 sm:$0xff]  }
 0x3f6   :  { %4915 = vmatpush2.bf16.xpose.msra.mxu1 %v10177_v11  ;;  %v10246_v11 = vld [vmem:[%s14313_s5 + $0x728] ss:$24 sps:$4 sm:$0xff]  }
 0x3f7   :  { %4916 = vmatprep.subr.bf16.mxu1 %v10185_v12  ;;  %v10254_v12 = vld [vmem:[%s14313_s5 + $0x6fc] ss:$24 sps:$4 sm:$0xff]  }
 0x3f8   :  { %4954 = vmatpush1.bf16.xpose.msra.mxu0 %v10180_v13  ;;  %v10249_v13 = vld [vmem:[%s14313_s5 + $0x690] ss:$24 sps:$4 sm:$0xff]  }
 0x3f9   :  { %4955 = vmatprep.subr.bf16.mxu0 %v10188_v14  ;;  %v10257_v14 = vld [vmem:[%s14313_s5 + $0x664] ss:$24 sps:$4 sm:$0xff]  }
 0x3fe   :  { %4917 = vmatpush2.bf16.xpose.msra.mxu1 %v10183_v15  ;;  %v10252_v15 = vld [vmem:[%s14313_s5 + $0x6f8] ss:$24 sps:$4 sm:$0xff]  }
 0x3ff   :  { %4918 = vmatprep.subr.bf16.mxu1 %v10191_v16  ;;  %v10260_v16 = vld [vmem:[%s14313_s5 + $0x6cc] ss:$24 sps:$4 sm:$0xff]  }
 0x400   :  { %4956 = vmatpush1.bf16.xpose.msra.mxu0 %v10186_v17  ;;  %v10255_v17 = vld [vmem:[%s14313_s5 + $0x660] ss:$24 sps:$4 sm:$0xff]  }
 0x401   :  { %4957 = vmatprep.subr.bf16.mxu0 %v10194_v18  ;;  %v10263_v18 = vld [vmem:[%s14313_s5 + $0x634] ss:$24 sps:$4 sm:$0xff]  }
 0x406   :  { %4919 = vmatpush2.bf16.xpose.msra.mxu1 %v10189_v24  ;;  %v10266_v24 = vld [vmem:[%s14313_s5 + $0x69c] ss:$24 sps:$4 sm:$0xff]  }
 0x407   :  { %v4803_v36 = vpop.f32.mrf.mxu0  ;;  %4920 = vmatprep.subr.bf16.mxu1 %v10197_v28  ;;  %v10269_v28 = vld [vmem:[%s14313_s5 + $0x604] ss:$24 sps:$4 sm:$0xff]  }
 0x408   :  { %v12295_v39 = vadd.f32 %v4803_v36, %v4761_v40  ;;  %4958 = vmatpush2.bf16.xpose.msra.mxu0 %v10192_v30  ;;  %v10264_v30 = vld [vmem:[%s14313_s5 + $0x698] ss:$24 sps:$4 sm:$0xff]   ;;  %v10278_v36 = vld [vmem:[%s14313_s5 + $0x63c] ss:$24 sps:$4 sm:$0xff]  }
 0x409   :  { %v12297_v41 = vpop.f32.mrf.mxu0  ;;  %4959 = vmatprep.subr.bf16.mxu0 %v10200_v31  ;;  %v10272_v31 = vld [vmem:[%s14313_s5 + $0x66c] ss:$24 sps:$4 sm:$0xff]   ;;  %v10267_v40 = vld [vmem:[%s14313_s5 + $0x600] ss:$24 sps:$4 sm:$0xff]  }
 0x40b   :  { %v4807_v45 = vpop.f32.mrf.mxu0 }
 0x40c   :  { %v12305_v47 = vadd.f32 %v4807_v45, %v4765_v42  ;;  %v10273_v42 = vld [vmem:[%s14313_s5 + $0x8d0] ss:$24 sps:$4 sm:$0xff]   ;;  %v10281_v45 = vld [vmem:[%s14313_s5 + $0x8a4] ss:$24 sps:$4 sm:$0xff]  }
 0x40e   :  { %4921 = vmatpush2.bf16.xpose.msra.mxu1 %v10195_v44  ;;  %v12464_v44 = vpop.f32.mrf.mxu1 }
 0x40f   :  { %4922 = vmatprep.subr.bf16.mxu1 %v10203_v46  ;;  %v10276_v46 = vld [vmem:[%s14313_s5 + $0x638] ss:$24 sps:$4 sm:$0xff]  }
 0x410   :  { %4960 = vmatpush2.bf16.xpose.msra.mxu0 %v10198_v49 }
 0x411   :  { %4961 = vmatprep.subr.bf16.mxu0 %v10206_v38  ;;  %v10284_v38 = vld [vmem:[%s14313_s5 + $0x60c] ss:$24 sps:$4 sm:$0xff]  }
 0x416   :  { %4923 = vmatpush2.bf16.xpose.msra.mxu1 %v10201_v43 }
 0x417   :  { %4924 = vmatprep.subr.bf16.mxu1 %v10209_v50 }
 0x418   :  { %4962 = vmatpush2.bf16.xpose.msra.mxu0 %v10204_v51 }
 0x419   :  { %4963 = vmatprep.subr.bf16.mxu0 %v10212_v52 }
 0x41e   :  { %4925 = vmatpush2.bf16.xpose.msra.mxu1 %v10207_v53  ;;  %v10279_v53 = vld [vmem:[%s14313_s5 + $0x8a0] ss:$24 sps:$4 sm:$0xff]  }
 0x41f   :  { %4926 = vmatprep.subr.bf16.mxu1 %v10215_v25  ;;  %v10287_v25 = vld [vmem:[%s14313_s5 + $0x874] ss:$24 sps:$4 sm:$0xff]  }
 0x420   :  { %4964 = vmatpush2.bf16.xpose.msra.mxu0 %v10210_v54 }
 0x421   :  { %4965 = vmatprep.subr.bf16.mxu0 %v10218_v55 }
 0x426   :  { %4927 = vmatpush2.bf16.xpose.msra.mxu1 %v10213_v56  ;;  %v10290_v56 = vld [vmem:[%s14313_s5 + $0x8dc] ss:$24 sps:$4 sm:$0xff]  }
 0x427   :  { %4928 = vmatprep.subr.bf16.mxu1 %v10221_v57 }
 0x428   :  { %4966 = vmatpush2.bf16.xpose.msra.mxu0 %v10216_v58  ;;  %v10293_v58 = vld [vmem:[%s14313_s5 + $0x844] ss:$24 sps:$4 sm:$0xff]  }
 0x429   :  { %4967 = vmatprep.subr.bf16.mxu0 %v10224_v59  ;;  %v10288_v59 = vld [vmem:[%s14313_s5 + $0x8d8] ss:$24 sps:$4 sm:$0xff]  }
 0x42e   :  { %4929 = vmatpush2.bf16.xpose.msra.mxu1 %v10219_v60  ;;  %v10296_v60 = vld [vmem:[%s14313_s5 + $0x8ac] ss:$24 sps:$4 sm:$0xff]  }
 0x42f   :  { %4984 = vmatprep.subr.bf16.mxu1 %v10227_v61  ;;  %v10291_v61 = vld [vmem:[%s14313_s5 + $0x840] ss:$24 sps:$4 sm:$0xff]  }
 0x430   :  { %4968 = vmatpush2.bf16.xpose.msra.mxu0 %v10222_v62  ;;  %v10299_v62 = vld [vmem:[%s14313_s5 + $0x814] ss:$24 sps:$4 sm:$0xff]  }
 0x431   :  { %4969 = vmatprep.subr.bf16.mxu0 %v10230_v63  ;;  %v10294_v63 = vld [vmem:[%s14313_s5 + $0x8a8] ss:$24 sps:$4 sm:$0xff]  }
 0x435   :  { %4931 = vmatmul.mubr.bf16.vlgmr.msra.gmra.mxu1 %v11819_v6 }
 0x436   :  { %4985 = vmatpush1.bf16.xpose.msra.mxu1 %v10225_v0  ;;  %5016 = vmatprep.mubr.bf16.mxu1 %v11653_v20  ;;  %v10302_v0 = vld [vmem:[%s14313_s5 + $0x87c] ss:$24 sps:$4 sm:$0xff]  }
 0x437   :  { %4986 = vmatprep.subr.bf16.mxu1 %v10233_v21  ;;  %v10297_v21 = vld [vmem:[%s14313_s5 + $0x810] ss:$24 sps:$4 sm:$0xff]  }
 0x438   :  { %4970 = vmatpush2.bf16.xpose.msra.mxu0 %v10228_v22  ;;  %v10305_v22 = vld [vmem:[%s14313_s5 + $0x7e4] ss:$24 sps:$4 sm:$0xff]  }
 0x439   :  { %4971 = vmatprep.subr.bf16.mxu0 %v10236_v1  ;;  %v10300_v1 = vld [vmem:[%s14313_s5 + $0x878] ss:$24 sps:$4 sm:$0xff]  }
 0x43e   :  { %4987 = vmatpush1.bf16.xpose.msra.mxu1 %v10231_v2  ;;  %v10308_v2 = vld [vmem:[%s14313_s5 + $0x84c] ss:$24 sps:$4 sm:$0xff]  }
 0x43f   :  { %4988 = vmatprep.subr.bf16.mxu1 %v10239_v33  ;;  %v10303_v33 = vld [vmem:[%s14313_s5 + $0x7e0] ss:$24 sps:$4 sm:$0xff]  }
 0x440   :  { %4972 = vmatpush2.bf16.xpose.msra.mxu0 %v10234_v34  ;;  %v10311_v34 = vld [vmem:[%s14313_s5 + $0x7b4] ss:$24 sps:$4 sm:$0xff]  }
 0x441   :  { %5027 = vmatprep.subr.bf16.mxu0 %v10242_v3  ;;  %v10306_v3 = vld [vmem:[%s14313_s5 + $0x848] ss:$24 sps:$4 sm:$0xff]  }
 0x446   :  { %4989 = vmatpush1.bf16.xpose.msra.mxu1 %v10237_v4  ;;  %v10314_v4 = vld [vmem:[%s14313_s5 + $0x81c] ss:$24 sps:$4 sm:$0xff]  }
 0x447   :  { %4974 = vmatmul.mubr.bf16.vlgmr.msra.gmra.mxu0 %v12151_v37  ;;  %4990 = vmatprep.subr.bf16.mxu1 %v10245_v5  ;;  %v10309_v5 = vld [vmem:[%s14313_s5 + $0x7b0] ss:$24 sps:$4 sm:$0xff]  }
 0x448   :  { %5028 = vmatpush1.bf16.xpose.msra.mxu0 %v10240_v7  ;;  %5059 = vmatprep.mubr.bf16.mxu0 %v11861_v29  ;;  %v10317_v7 = vld [vmem:[%s14313_s5 + $0x784] ss:$24 sps:$4 sm:$0xff]  }
 0x449   :  { %5029 = vmatprep.subr.bf16.mxu0 %v10248_v8  ;;  %v10312_v8 = vld [vmem:[%s14313_s5 + $0x818] ss:$24 sps:$4 sm:$0xff]  }
 0x44e   :  { %4991 = vmatpush1.bf16.xpose.msra.mxu1 %v10243_v9  ;;  %v10320_v9 = vld [vmem:[%s14313_s5 + $0x7ec] ss:$24 sps:$4 sm:$0xff]  }
 0x44f   :  { %4992 = vmatprep.subr.bf16.mxu1 %v10251_v10  ;;  %v10315_v10 = vld [vmem:[%s14313_s5 + $0x780] ss:$24 sps:$4 sm:$0xff]  }
 0x450   :  { %5030 = vmatpush1.bf16.xpose.msra.mxu0 %v10246_v11  ;;  %v10323_v11 = vld [vmem:[%s14313_s5 + $0x764] ss:$24 sps:$4 sm:$0xff]  }
 0x451   :  { %5031 = vmatprep.subr.bf16.mxu0 %v10254_v12  ;;  %v10318_v12 = vld [vmem:[%s14313_s5 + $0x7e8] ss:$24 sps:$4 sm:$0xff]  }
 0x456   :  { %4993 = vmatpush1.bf16.xpose.msra.mxu1 %v10249_v13  ;;  %v10326_v13 = vld [vmem:[%s14313_s5 + $0x7bc] ss:$24 sps:$4 sm:$0xff]  }
 0x457   :  { %4994 = vmatprep.subr.bf16.mxu1 %v10257_v14  ;;  %v10321_v14 = vld [vmem:[%s14313_s5 + $0x760] ss:$24 sps:$4 sm:$0xff]  }
 0x458   :  { %5032 = vmatpush1.bf16.xpose.msra.mxu0 %v10252_v15  ;;  %v10329_v15 = vld [vmem:[%s14313_s5 + $0x734] ss:$24 sps:$4 sm:$0xff]  }
 0x459   :  { %5033 = vmatprep.subr.bf16.mxu0 %v10260_v16  ;;  %v10324_v16 = vld [vmem:[%s14313_s5 + $0x7b8] ss:$24 sps:$4 sm:$0xff]  }
 0x45e   :  { %4995 = vmatpush1.bf16.xpose.msra.mxu1 %v10255_v17  ;;  %v10332_v17 = vld [vmem:[%s14313_s5 + $0x78c] ss:$24 sps:$4 sm:$0xff]  }
 0x45f   :  { %4996 = vmatprep.subr.bf16.mxu1 %v10263_v18  ;;  %v10327_v18 = vld [vmem:[%s14313_s5 + $0x730] ss:$24 sps:$4 sm:$0xff]  }
 0x460   :  { %5034 = vmatpush1.bf16.xpose.msra.mxu0 %v10258_v23  ;;  %v10335_v23 = vld [vmem:[%s14313_s5 + $0x704] ss:$24 sps:$4 sm:$0xff]  }
 0x461   :  { %5035 = vmatprep.subr.bf16.mxu0 %v10266_v24  ;;  %v10330_v24 = vld [vmem:[%s14313_s5 + $0x788] ss:$24 sps:$4 sm:$0xff]  }
 0x466   :  { %4997 = vmatpush1.bf16.xpose.msra.mxu1 %v10261_v26  ;;  %v10338_v26 = vld [vmem:[%s14313_s5 + $0xa54] ss:$24 sps:$4 sm:$0xff]  }
 0x467   :  { %4998 = vmatprep.subr.bf16.mxu1 %v10269_v28  ;;  %v10333_v28 = vld [vmem:[%s14313_s5 + $0x700] ss:$24 sps:$4 sm:$0xff]  }
 0x468   :  { %5036 = vmatpush1.bf16.xpose.msra.mxu0 %v10264_v30  ;;  %v10341_v30 = vld [vmem:[%s14313_s5 + $0x6d4] ss:$24 sps:$4 sm:$0xff]  }
 0x469   :  { %5037 = vmatprep.subr.bf16.mxu0 %v10272_v31  ;;  %v10336_v31 = vld [vmem:[%s14313_s5 + $0xa50] ss:$24 sps:$4 sm:$0xff]  }
 0x46e   :  { %4999 = vmatpush1.bf16.xpose.msra.mxu1 %v10267_v40  ;;  %v10344_v40 = vld [vmem:[%s14313_s5 + $0xa24] ss:$24 sps:$4 sm:$0xff]  }
 0x46f   :  { %5000 = vmatprep.subr.bf16.mxu1 %v10275_v32  ;;  %v10339_v32 = vld [vmem:[%s14313_s5 + $0x6d0] ss:$24 sps:$4 sm:$0xff]  }
 0x470   :  { %5038 = vmatpush1.bf16.xpose.msra.mxu0 %v10270_v35  ;;  %v10347_v35 = vld [vmem:[%s14313_s5 + $0x6a4] ss:$24 sps:$4 sm:$0xff]  }
 0x471   :  { %5039 = vmatprep.subr.bf16.mxu0 %v10278_v36  ;;  %v10342_v36 = vld [vmem:[%s14313_s5 + $0xa20] ss:$24 sps:$4 sm:$0xff]  }
 0x475   :  { %v4846_v49 = vpop.f32.mrf.mxu1 }
 0x476   :  { %v4847_v43 = vadd.f32 %v4846_v49, %v12295_v39  ;;  %5001 = vmatpush2.bf16.xpose.msra.mxu1 %v10273_v42  ;;  %v10282_v39 = vld [vmem:[%s14313_s5 + $0x608] ss:$24 sps:$4 sm:$0xff]   ;;  %v10350_v42 = vld [vmem:[%s14313_s5 + $0x9f4] ss:$24 sps:$4 sm:$0xff]   ;;  %v10356_v49 = vld [vmem:[%s14313_s5 + $0x9c4] ss:$24 sps:$4 sm:$0xff]  }
 0x477   :  { %v12476_v50 = vpop.f32.mrf.mxu1  ;;  %5002 = vmatprep.subr.bf16.mxu1 %v10281_v45  ;;  %v10353_v45 = vld [vmem:[%s14313_s5 + $0x674] ss:$24 sps:$4 sm:$0xff]  }
 0x478   :  { %5040 = vmatpush1.bf16.xpose.msra.mxu0 %v10276_v46  ;;  %v5242_v54 = vmax.f32 %v4847_v43, 0.0  ;;  %v10348_v46 = vld [vmem:[%s14313_s5 + $0x9f0] ss:$24 sps:$4 sm:$0xff]   ;;  %v10359_v43 = vld [vmem:[%s14313_s5 + $0x644] ss:$24 sps:$4 sm:$0xff]  }
 0x479   :  { %v4850_v51 = vpop.f32.mrf.mxu1  ;;  %5041 = vmatprep.subr.bf16.mxu0 %v10284_v38  ;;  %v10351_v38 = vld [vmem:[%s14313_s5 + $0x670] ss:$24 sps:$4 sm:$0xff]  }
 0x47a   :  { %v4851_v52 = vadd.f32 %v4850_v51, %v12305_v47  ;;  %v10285_v47 = vld [vmem:[%s14313_s5 + $0x870] ss:$24 sps:$4 sm:$0xff]   ;;  %v10354_v51 = vld [vmem:[%s14313_s5 + $0x9c0] ss:$24 sps:$4 sm:$0xff]  }
 0x47c   :  { %v5250_v55 = vmax.f32 %v4851_v52, 0.0  ;;  %v10362_v52 = vld [vmem:[%s14313_s5 + $0x994] ss:$24 sps:$4 sm:$0xff]  }
 0x47e   :  { %v12491_v57 = vpack.c.bf16 %v5250_v55, %v5242_v54  ;;  %5003 = vmatpush2.bf16.xpose.msra.mxu1 %v10279_v53  ;;  %v10357_v53 = vld [vmem:[%s14313_s5 + $0x640] ss:$24 sps:$4 sm:$0xff]   ;;  %v10360_v54 = vld [vmem:[%s14313_s5 + $0x990] ss:$24 sps:$4 sm:$0xff]   ;;  %v10368_v55 = vld [vmem:[%s14313_s5 + $0x964] ss:$24 sps:$4 sm:$0xff]  }
 0x47f   :  { %5004 = vmatprep.subr.bf16.mxu1 %v10287_v25  ;;  %v10365_v25 = vld [vmem:[%s14313_s5 + $0x614] ss:$24 sps:$4 sm:$0xff]  }
 0x480   :  { %5042 = vmatpush1.bf16.xpose.msra.mxu0 %v10282_v39  ;;  %v10363_v39 = vld [vmem:[%s14313_s5 + $0x610] ss:$24 sps:$4 sm:$0xff]  }
 0x481   :  { %5043 = vmatprep.subr.bf16.mxu0 %v10290_v56  ;;  %v12656_v56 = vpop.f32.mrf.mxu0 }
 0x486   :  { %5005 = vmatpush2.bf16.xpose.msra.mxu1 %v10285_v47  ;;  %v10371_v47 = vld [vmem:[%s14313_s5 + $0x8e4] ss:$24 sps:$4 sm:$0xff]  }
 0x487   :  { %5006 = vmatprep.subr.bf16.mxu1 %v10293_v58  ;;  %v10366_v58 = vld [vmem:[%s14313_s5 + $0x960] ss:$24 sps:$4 sm:$0xff]  }
 0x488   :  { %5044 = vmatpush2.bf16.xpose.msra.mxu0 %v10288_v59  ;;  %v4889_v59 = vpop.f32.mrf.mxu0 }
 0x489   :  { %5045 = vmatprep.subr.bf16.mxu0 %v10296_v60  ;;  %v10374_v60 = vld [vmem:[%s14313_s5 + $0x934] ss:$24 sps:$4 sm:$0xff]  }
 0x48e   :  { %5007 = vmatpush2.bf16.xpose.msra.mxu1 %v10291_v61  ;;  %v2792_v61 = vld [vmem:[%s14315_s3 + $0x10] sm:$0xff] }
 0x48f   :  { %5008 = vmatprep.subr.bf16.mxu1 %v10299_v62  ;;  %v12670_v62 = vpop.f32.mrf.mxu0 }
 0x490   :  { %5046 = vmatpush2.bf16.xpose.msra.mxu0 %v10294_v63  ;;  %v10369_v63 = vld [vmem:[%s14313_s5 + $0x8e0] ss:$24 sps:$4 sm:$0xff]  }
 0x491   :  { %5047 = vmatprep.subr.bf16.mxu0 %v10302_v0  ;;  %v12675_v0 = vpop.f32.mrf.mxu1 }
 0x496   :  { %5009 = vmatpush2.bf16.xpose.msra.mxu1 %v10297_v21  ;;  %v10377_v21 = vld [vmem:[%s14313_s5 + $0x8b4] ss:$24 sps:$4 sm:$0xff]  }
 0x497   :  { %5010 = vmatprep.subr.bf16.mxu1 %v10305_v22  ;;  %v4890_v22 = vadd.f32 %v4889_v59, %v2792_v61  ;;  %v10414_v59 = vld [vmem:[%s14313_s5 + $0xae0] ss:$24 sps:$4 sm:$0xff]  }
 0x498   :  { %5048 = vmatpush2.bf16.xpose.msra.mxu0 %v10300_v1  ;;  %v10372_v1 = vld [vmem:[%s14313_s5 + $0x930] ss:$24 sps:$4 sm:$0xff]  }
 0x499   :  { %5049 = vmatprep.subr.bf16.mxu0 %v10308_v2  ;;  %v2800_v2 = vld [vmem:[%s14315_s3 + $0x50] sm:$0xff] }
 0x49a   :  { %v10417_v61 = vld [vmem:[%s14313_s5 + $0xa58] ss:$24 sps:$4 sm:$0xff]  }
 0x49e   :  { %5011 = vmatpush2.bf16.xpose.msra.mxu1 %v10303_v33  ;;  %v4893_v33 = vpop.f32.mrf.mxu0 }
 0x49f   :  { %5012 = vmatprep.subr.bf16.mxu1 %v10311_v34 }
 0x4a0   :  { %5050 = vmatpush2.bf16.xpose.msra.mxu0 %v10306_v3  ;;  %v10380_v3 = vld [vmem:[%s14313_s5 + $0x904] ss:$24 sps:$4 sm:$0xff]  }
 0x4a1   :  { %5051 = vmatprep.subr.bf16.mxu0 %v10314_v4 }
 0x4a6   :  { %5013 = vmatpush2.bf16.xpose.msra.mxu1 %v10309_v5 }
 0x4a7   :  { %5014 = vmatprep.subr.bf16.mxu1 %v10317_v7  ;;  %v4894_v7 = vadd.f32 %v4893_v33, %v2800_v2  ;;  %v10431_v2 = vld [vmem:[%s14313_s5 + $0x9fc] ss:$24 sps:$4 sm:$0xff]   ;;  %v10426_v33 = vld [vmem:[%s14313_s5 + $0xa80] ss:$24 sps:$4 sm:$0xff]  }
 0x4a8   :  { %5052 = vmatpush2.bf16.xpose.msra.mxu0 %v10312_v8 }
 0x4a9   :  { %5053 = vmatprep.subr.bf16.mxu0 %v10320_v9 }
 0x4ae   :  { %5015 = vmatpush2.bf16.xpose.msra.mxu1 %v10315_v10  ;;  %v10375_v10 = vld [vmem:[%s14313_s5 + $0x8b0] ss:$24 sps:$4 sm:$0xff]  }
 0x4af   :  { %5070 = vmatprep.subr.bf16.mxu1 %v10323_v11  ;;  %v10383_v11 = vld [vmem:[%s14313_s5 + $0x884] ss:$24 sps:$4 sm:$0xff]  }
 0x4b0   :  { %5054 = vmatpush2.bf16.xpose.msra.mxu0 %v10318_v12  ;;  %v10378_v12 = vld [vmem:[%s14313_s5 + $0x900] ss:$24 sps:$4 sm:$0xff]  }
 0x4b1   :  { %5055 = vmatprep.subr.bf16.mxu0 %v10326_v13  ;;  %v10386_v13 = vld [vmem:[%s14313_s5 + $0xbd4] ss:$24 sps:$4 sm:$0xff]  }
 0x4b5   :  { %5017 = vmatmul.mubr.bf16.vlgmr.msra.gmra.mxu1 %v11607_v19 }
 0x4b6   :  { %5071 = vmatpush1.bf16.xpose.msra.mxu1 %v10321_v14  ;;  %5102 = vmatprep.mubr.bf16.mxu1 %v12146_v48  ;;  %v10381_v14 = vld [vmem:[%s14313_s5 + $0x880] ss:$24 sps:$4 sm:$0xff]  }
 0x4b7   :  { %5072 = vmatprep.subr.bf16.mxu1 %v10329_v15  ;;  %v10389_v15 = vld [vmem:[%s14313_s5 + $0x854] ss:$24 sps:$4 sm:$0xff]  }
 0x4b8   :  { %5056 = vmatpush2.bf16.xpose.msra.mxu0 %v10324_v16  ;;  %v10384_v16 = vld [vmem:[%s14313_s5 + $0xbd0] ss:$24 sps:$4 sm:$0xff]  }
 0x4b9   :  { %5057 = vmatprep.subr.bf16.mxu0 %v10332_v17  ;;  %v12712_v17 = vpop.f32.mrf.mxu0 }
 0x4be   :  { %5073 = vmatpush1.bf16.xpose.msra.mxu1 %v10327_v18  ;;  %v10392_v18 = vld [vmem:[%s14313_s5 + $0xba4] ss:$24 sps:$4 sm:$0xff]  }
 0x4bf   :  { %5074 = vmatprep.subr.bf16.mxu1 %v10335_v23 }
 0x4c0   :  { %5058 = vmatpush2.bf16.xpose.msra.mxu0 %v10330_v24 }
 0x4c1   :  { %5113 = vmatprep.subr.bf16.mxu0 %v10338_v26 }
 0x4c6   :  { %5075 = vmatpush1.bf16.xpose.msra.mxu1 %v10333_v28  ;;  %v10387_v28 = vld [vmem:[%s14313_s5 + $0x850] ss:$24 sps:$4 sm:$0xff]  }
 0x4c7   :  { %5060 = vmatmul.mubr.bf16.vlgmr.msra.gmra.mxu0 %v11819_v6  ;;  %5076 = vmatprep.subr.bf16.mxu1 %v10341_v30 }
 0x4c8   :  { %5114 = vmatpush1.bf16.xpose.msra.mxu0 %v10336_v31  ;;  %5145 = vmatprep.mubr.bf16.mxu0 %v11653_v20  ;;  %v10345_v20 = vld [vmem:[%s14313_s5 + $0x6a0] ss:$24 sps:$4 sm:$0xff]   ;;  %v10395_v31 = vld [vmem:[%s14313_s5 + $0x824] ss:$24 sps:$4 sm:$0xff]  }
 0x4c9   :  { %5115 = vmatprep.subr.bf16.mxu0 %v10344_v40 }
 0x4ce   :  { %5077 = vmatpush1.bf16.xpose.msra.mxu1 %v10339_v32  ;;  %v10390_v32 = vld [vmem:[%s14313_s5 + $0xba0] ss:$24 sps:$4 sm:$0xff]  }
 0x4cf   :  { %5078 = vmatprep.subr.bf16.mxu1 %v10347_v35  ;;  %v10398_v35 = vld [vmem:[%s14313_s5 + $0xb74] ss:$24 sps:$4 sm:$0xff]  }
 0x4d0   :  { %5116 = vmatpush1.bf16.xpose.msra.mxu0 %v10342_v36 }
 0x4d1   :  { %5117 = vmatprep.subr.bf16.mxu0 %v10350_v42 }
 0x4d6   :  { %5079 = vmatpush1.bf16.xpose.msra.mxu1 %v10345_v20 }
 0x4d7   :  { %5080 = vmatprep.subr.bf16.mxu1 %v10353_v45  ;;  %v10393_v45 = vld [vmem:[%s14313_s5 + $0x820] ss:$24 sps:$4 sm:$0xff]  }
 0x4d8   :  { %5118 = vmatpush1.bf16.xpose.msra.mxu0 %v10348_v46  ;;  %v10401_v46 = vld [vmem:[%s14313_s5 + $0x7f4] ss:$24 sps:$4 sm:$0xff]  }
 0x4d9   :  { %5119 = vmatprep.subr.bf16.mxu0 %v10356_v49  ;;  %v10396_v49 = vld [vmem:[%s14313_s5 + $0xb70] ss:$24 sps:$4 sm:$0xff]  }
 0x4de   :  { %5081 = vmatpush1.bf16.xpose.msra.mxu1 %v10351_v38  ;;  %v10404_v38 = vld [vmem:[%s14313_s5 + $0xb44] ss:$24 sps:$4 sm:$0xff]  }
 0x4df   :  { %5082 = vmatprep.subr.bf16.mxu1 %v10359_v43  ;;  %v10399_v43 = vld [vmem:[%s14313_s5 + $0x7f0] ss:$24 sps:$4 sm:$0xff]  }
 0x4e0   :  { %5120 = vmatpush1.bf16.xpose.msra.mxu0 %v10354_v51  ;;  %v10407_v51 = vld [vmem:[%s14313_s5 + $0x7c4] ss:$24 sps:$4 sm:$0xff]  }
 0x4e1   :  { %5121 = vmatprep.subr.bf16.mxu0 %v10362_v52  ;;  %v10402_v52 = vld [vmem:[%s14313_s5 + $0xb40] ss:$24 sps:$4 sm:$0xff]  }
 0x4e6   :  { %5083 = vmatpush1.bf16.xpose.msra.mxu1 %v10357_v53  ;;  %v10410_v53 = vld [vmem:[%s14313_s5 + $0xb14] ss:$24 sps:$4 sm:$0xff]  }
 0x4e7   :  { %5084 = vmatprep.subr.bf16.mxu1 %v10365_v25  ;;  %v10405_v25 = vld [vmem:[%s14313_s5 + $0x7c0] ss:$24 sps:$4 sm:$0xff]  }
 0x4e8   :  { %5122 = vmatpush1.bf16.xpose.msra.mxu0 %v10360_v54  ;;  %v10413_v54 = vld [vmem:[%s14313_s5 + $0x794] ss:$24 sps:$4 sm:$0xff]  }
 0x4e9   :  { %5123 = vmatprep.subr.bf16.mxu0 %v10368_v55  ;;  %v10408_v55 = vld [vmem:[%s14313_s5 + $0xb10] ss:$24 sps:$4 sm:$0xff]  }
 0x4ee   :  { %5085 = vmatpush1.bf16.xpose.msra.mxu1 %v10363_v39  ;;  %v10416_v39 = vld [vmem:[%s14313_s5 + $0xae4] ss:$24 sps:$4 sm:$0xff]  }
 0x4ef   :  { %5086 = vmatprep.subr.bf16.mxu1 %v10371_v47  ;;  %v10411_v47 = vld [vmem:[%s14313_s5 + $0x790] ss:$24 sps:$4 sm:$0xff]  }
 0x4f0   :  { %5124 = vmatpush1.bf16.xpose.msra.mxu0 %v10366_v58  ;;  %v10419_v58 = vld [vmem:[%s14313_s5 + $0xa5c] ss:$24 sps:$4 sm:$0xff]  }
 0x4f1   :  { %5125 = vmatprep.subr.bf16.mxu0 %v10374_v60  ;;  %v10422_v60 = vld [vmem:[%s14313_s5 + $0xab4] ss:$24 sps:$4 sm:$0xff]  }
 0x4f5   :  { %v4932_v34 = vpop.f32.mrf.mxu1 }
 0x4f6   :  { %v4933_v4 = vadd.f32 %v4932_v34, %v4890_v22  ;;  %5087 = vmatpush2.bf16.xpose.msra.mxu1 %v10369_v63  ;;  %v10425_v63 = vld [vmem:[%s14313_s5 + $0xa2c] ss:$24 sps:$4 sm:$0xff]  }
 0x4f7   :  { %v12689_v5 = vpop.f32.mrf.mxu1  ;;  %5088 = vmatprep.subr.bf16.mxu1 %v10377_v21  ;;  %v10420_v21 = vld [vmem:[%s14313_s5 + $0xab0] ss:$24 sps:$4 sm:$0xff]   ;;  %v10428_v22 = vld [vmem:[%s14313_s5 + $0xa84] ss:$24 sps:$4 sm:$0xff]  }
 0x4f8   :  { %5126 = vmatpush1.bf16.xpose.msra.mxu0 %v10372_v1  ;;  %v10423_v1 = vld [vmem:[%s14313_s5 + $0xa28] ss:$24 sps:$4 sm:$0xff]   ;;  %v10434_v34 = vld [vmem:[%s14313_s5 + $0xa64] ss:$24 sps:$4 sm:$0xff]  }
 0x4f9   :  { %v4936_v8 = vpop.f32.mrf.mxu1  ;;  %5127 = vmatprep.subr.bf16.mxu0 %v10380_v3  ;;  %v10437_v3 = vld [vmem:[%s14313_s5 + $0x9cc] ss:$24 sps:$4 sm:$0xff]  }
 0x4fa   :  { %v4937_v9 = vadd.f32 %v4936_v8, %v4894_v7  ;;  %v10440_v7 = vld [vmem:[%s14313_s5 + $0xa34] ss:$24 sps:$4 sm:$0xff]   ;;  %v10435_v8 = vld [vmem:[%s14313_s5 + $0x9c8] ss:$24 sps:$4 sm:$0xff]  }
 0x4fe   :  { %5089 = vmatpush2.bf16.xpose.msra.mxu1 %v10375_v10  ;;  %v10438_v10 = vld [vmem:[%s14313_s5 + $0xa30] ss:$24 sps:$4 sm:$0xff]  }
 0x4ff   :  { %5090 = vmatprep.subr.bf16.mxu1 %v10383_v11  ;;  %v10449_v11 = vld [vmem:[%s14313_s5 + $0x96c] ss:$24 sps:$4 sm:$0xff]  }
 0x500   :  { %5128 = vmatpush1.bf16.xpose.msra.mxu0 %v10378_v12  ;;  %v10444_v12 = vld [vmem:[%s14313_s5 + $0xa00] ss:$24 sps:$4 sm:$0xff]  }
 0x501   :  { %5129 = vmatprep.subr.bf16.mxu0 %v10386_v13  ;;  %v10452_v13 = vld [vmem:[%s14313_s5 + $0x9d4] ss:$24 sps:$4 sm:$0xff]  }
 0x506   :  { %5091 = vmatpush2.bf16.xpose.msra.mxu1 %v10381_v14  ;;  %v10447_v14 = vld [vmem:[%s14313_s5 + $0x968] ss:$24 sps:$4 sm:$0xff]  }
 0x507   :  { %v4975_v23 = vpop.f32.mrf.mxu0  ;;  %5092 = vmatprep.subr.bf16.mxu1 %v10389_v15  ;;  %v10455_v15 = vld [vmem:[%s14313_s5 + $0x93c] ss:$24 sps:$4 sm:$0xff]  }
 0x508   :  { %v4976_v24 = vadd.f32 %v4975_v23, %v4933_v4  ;;  %5130 = vmatpush2.bf16.xpose.msra.mxu0 %v10384_v16  ;;  %v10432_v4 = vld [vmem:[%s14313_s5 + $0xa60] ss:$24 sps:$4 sm:$0xff]   ;;  %v10450_v16 = vld [vmem:[%s14313_s5 + $0x9d0] ss:$24 sps:$4 sm:$0xff]  }
 0x509   :  { %v12717_v26 = vpop.f32.mrf.mxu0  ;;  %5131 = vmatprep.subr.bf16.mxu0 %v10392_v18  ;;  %v10458_v18 = vld [vmem:[%s14313_s5 + $0x9a4] ss:$24 sps:$4 sm:$0xff]   ;;  %v10453_v23 = vld [vmem:[%s14313_s5 + $0x938] ss:$24 sps:$4 sm:$0xff]  }
 0x50a   :  { %v5244_v36 = vmax.f32 %v4976_v24, 0.0  ;;  %v10461_v24 = vld [vmem:[%s14313_s5 + $0x90c] ss:$24 sps:$4 sm:$0xff]  }
 0x50b   :  { %v4979_v30 = vpop.f32.mrf.mxu0 }
 0x50c   :  { %v4980_v40 = vadd.f32 %v4979_v30, %v4937_v9  ;;  %v10443_v9 = vld [vmem:[%s14313_s5 + $0x99c] ss:$24 sps:$4 sm:$0xff]  }
 0x50d   :  { %v10464_v30 = vld [vmem:[%s14313_s5 + $0x974] ss:$24 sps:$4 sm:$0xff]  }
 0x50e   :  { %v5252_v42 = vmax.f32 %v4980_v40, 0.0  ;;  %5093 = vmatpush2.bf16.xpose.msra.mxu1 %v10387_v28  ;;  %v10456_v28 = vld [vmem:[%s14313_s5 + $0x9a0] ss:$24 sps:$4 sm:$0xff]   ;;  %v10467_v40 = vld [vmem:[%s14313_s5 + $0xbdc] ss:$24 sps:$4 sm:$0xff]  }
 0x50f   :  { %5094 = vmatprep.subr.bf16.mxu1 %v10395_v31  ;;  %v10459_v31 = vld [vmem:[%s14313_s5 + $0x908] ss:$24 sps:$4 sm:$0xff]  }
 0x510   :  { %v12731_v20 = vpack.c.bf16 %v5252_v42, %v5244_v36  ;;  %5132 = vmatpush2.bf16.xpose.msra.mxu0 %v10390_v32  ;;  %v10462_v32 = vld [vmem:[%s14313_s5 + $0x970] ss:$24 sps:$4 sm:$0xff]   ;;  %v10473_v42 = vld [vmem:[%s14313_s5 + $0xbac] ss:$24 sps:$4 sm:$0xff]  }
 0x511   :  { %5133 = vmatprep.subr.bf16.mxu0 %v10398_v35  ;;  %v10470_v35 = vld [vmem:[%s14313_s5 + $0x944] ss:$24 sps:$4 sm:$0xff]   ;;  %v10465_v36 = vld [vmem:[%s14313_s5 + $0xbd8] ss:$24 sps:$4 sm:$0xff]  }
 0x516   :  { %5095 = vmatpush2.bf16.xpose.msra.mxu1 %v10393_v45  ;;  %v10468_v45 = vld [vmem:[%s14313_s5 + $0x940] ss:$24 sps:$4 sm:$0xff]  }
 0x517   :  { %5096 = vmatprep.subr.bf16.mxu1 %v10401_v46  ;;  %v10476_v46 = vld [vmem:[%s14313_s5 + $0x914] ss:$24 sps:$4 sm:$0xff]  }
 0x518   :  { %5134 = vmatpush2.bf16.xpose.msra.mxu0 %v10396_v49  ;;  %v10471_v49 = vld [vmem:[%s14313_s5 + $0xba8] ss:$24 sps:$4 sm:$0xff]  }
 0x519   :  { %5135 = vmatprep.subr.bf16.mxu0 %v10404_v38  ;;  %v10479_v38 = vld [vmem:[%s14313_s5 + $0xb7c] ss:$24 sps:$4 sm:$0xff]  }
 0x51e   :  { %5097 = vmatpush2.bf16.xpose.msra.mxu1 %v10399_v43  ;;  %v10474_v43 = vld [vmem:[%s14313_s5 + $0x910] ss:$24 sps:$4 sm:$0xff]  }
 0x51f   :  { %5098 = vmatprep.subr.bf16.mxu1 %v10407_v51  ;;  %v12902_v51 = vpop.f32.mrf.mxu1 }
 0x520   :  { %5136 = vmatpush2.bf16.xpose.msra.mxu0 %v10402_v52  ;;  %v10482_v52 = vld [vmem:[%s14313_s5 + $0xbe4] ss:$24 sps:$4 sm:$0xff]  }
 0x521   :  { %5137 = vmatprep.subr.bf16.mxu0 %v10410_v53 }
 0x526   :  { %5099 = vmatpush2.bf16.xpose.msra.mxu1 %v10405_v25  ;;  %v10477_v25 = vld [vmem:[%s14313_s5 + $0xb78] ss:$24 sps:$4 sm:$0xff]  }
 0x527   :  { %5100 = vmatprep.subr.bf16.mxu1 %v10413_v54  ;;  %v2794_v54 = vld [vmem:[%s14315_s3 + $0x20] sm:$0xff] }
 0x528   :  { %5138 = vmatpush2.bf16.xpose.msra.mxu0 %v10408_v55 }
 0x529   :  { %5139 = vmatprep.subr.bf16.mxu0 %v10416_v39  ;;  %v10485_v39 = vld [vmem:[%s14313_s5 + $0xb4c] ss:$24 sps:$4 sm:$0xff]  }
 0x52e   :  { %5101 = vmatpush2.bf16.xpose.msra.mxu1 %v10411_v47  ;;  %v10480_v47 = vld [vmem:[%s14313_s5 + $0xbe0] ss:$24 sps:$4 sm:$0xff]  }
 0x52f   :  { %5156 = vmatprep.subr.bf16.mxu1 %v10419_v58  ;;  %v12921_v58 = vpop.f32.mrf.mxu0 }
 0x530   :  { %5140 = vmatpush2.bf16.xpose.msra.mxu0 %v10414_v59  ;;  %v10488_v59 = vld [vmem:[%s14313_s5 + $0xbb4] ss:$24 sps:$4 sm:$0xff]  }
 0x531   :  { %5141 = vmatprep.subr.bf16.mxu0 %v10422_v60 }
 0x535   :  { %5103 = vmatmul.mubr.bf16.vlgmr.msra.gmra.mxu1 %v12151_v37 }
 0x536   :  { %5157 = vmatpush1.bf16.xpose.msra.mxu1 %v10417_v61  ;;  %5188 = vmatprep.mubr.bf16.mxu1 %v11861_v29  ;;  %v10429_v29 = vld [vmem:[%s14313_s5 + $0x9f8] ss:$24 sps:$4 sm:$0xff]   ;;  %v2802_v61 = vld [vmem:[%s14315_s3 + $0x60] sm:$0xff] }
 0x537   :  { %5158 = vmatprep.subr.bf16.mxu1 %v10425_v63 }
 0x538   :  { %5142 = vmatpush2.bf16.xpose.msra.mxu0 %v10420_v21 }
 0x539   :  { %5143 = vmatprep.subr.bf16.mxu0 %v10428_v22 }
 0x53e   :  { %5159 = vmatpush1.bf16.xpose.msra.mxu1 %v10423_v1 }
 0x53f   :  { %5160 = vmatprep.subr.bf16.mxu1 %v10431_v2 }
 0x540   :  { %5144 = vmatpush2.bf16.xpose.msra.mxu0 %v10426_v33  ;;  %v10483_v33 = vld [vmem:[%s14313_s5 + $0xb48] ss:$24 sps:$4 sm:$0xff]  }
 0x541   :  { %5199 = vmatprep.subr.bf16.mxu0 %v10434_v34 }
 0x546   :  { %5161 = vmatpush1.bf16.xpose.msra.mxu1 %v10429_v29  ;;  %v10491_v29 = vld [vmem:[%s14313_s5 + $0xb1c] ss:$24 sps:$4 sm:$0xff]  }
 0x547   :  { %5146 = vmatmul.mubr.bf16.vlgmr.msra.gmra.mxu0 %v11607_v19  ;;  %5162 = vmatprep.subr.bf16.mxu1 %v10437_v3  ;;  %v10446_v19 = vld [vmem:[%s14313_s5 + $0xa04] ss:$24 sps:$4 sm:$0xff]  }
 0x548   :  { %5200 = vmatpush1.bf16.xpose.msra.mxu0 %v10432_v4  ;;  %5231 = vmatprep.mubr.bf16.mxu0 %v12146_v48  ;;  %v10441_v48 = vld [vmem:[%s14313_s5 + $0x998] ss:$24 sps:$4 sm:$0xff]  }
 0x549   :  { %5201 = vmatprep.subr.bf16.mxu0 %v10440_v7  ;;  %v10486_v4 = vld [vmem:[%s14313_s5 + $0xbb0] ss:$24 sps:$4 sm:$0xff]   ;;  %v10494_v7 = vld [vmem:[%s14313_s5 + $0xb84] ss:$24 sps:$4 sm:$0xff]  }
 0x54e   :  { %5163 = vmatpush1.bf16.xpose.msra.mxu1 %v10435_v8  ;;  %v10489_v8 = vld [vmem:[%s14313_s5 + $0xb18] ss:$24 sps:$4 sm:$0xff]  }
 0x54f   :  { %5164 = vmatprep.subr.bf16.mxu1 %v10443_v9  ;;  %v10497_v9 = vld [vmem:[%s14313_s5 + $0xaec] ss:$24 sps:$4 sm:$0xff]  }
 0x550   :  { %5202 = vmatpush1.bf16.xpose.msra.mxu0 %v10438_v10  ;;  %v10492_v10 = vld [vmem:[%s14313_s5 + $0xb80] ss:$24 sps:$4 sm:$0xff]  }
 0x551   :  { %5203 = vmatprep.subr.bf16.mxu0 %v10446_v19  ;;  %v10500_v19 = vld [vmem:[%s14313_s5 + $0xb54] ss:$24 sps:$4 sm:$0xff]  }
 0x556   :  { %5165 = vmatpush1.bf16.xpose.msra.mxu1 %v10441_v48  ;;  %v10495_v48 = vld [vmem:[%s14313_s5 + $0xae8] ss:$24 sps:$4 sm:$0xff]  }
 0x557   :  { %5166 = vmatprep.subr.bf16.mxu1 %v10449_v11  ;;  %v10503_v11 = vld [vmem:[%s14313_s5 + $0xabc] ss:$24 sps:$4 sm:$0xff]  }
 0x558   :  { %5204 = vmatpush1.bf16.xpose.msra.mxu0 %v10444_v12  ;;  %v10498_v12 = vld [vmem:[%s14313_s5 + $0xb50] ss:$24 sps:$4 sm:$0xff]  }
 0x559   :  { %5205 = vmatprep.subr.bf16.mxu0 %v10452_v13  ;;  %v10506_v13 = vld [vmem:[%s14313_s5 + $0xb24] ss:$24 sps:$4 sm:$0xff]  }
 0x55e   :  { %5167 = vmatpush1.bf16.xpose.msra.mxu1 %v10447_v14  ;;  %v10501_v14 = vld [vmem:[%s14313_s5 + $0xab8] ss:$24 sps:$4 sm:$0xff]  }
 0x55f   :  { %5168 = vmatprep.subr.bf16.mxu1 %v10455_v15  ;;  %v10509_v15 = vld [vmem:[%s14313_s5 + $0xa8c] ss:$24 sps:$4 sm:$0xff]  }
 0x560   :  { %5206 = vmatpush1.bf16.xpose.msra.mxu0 %v10450_v16  ;;  %v10504_v16 = vld [vmem:[%s14313_s5 + $0xb20] ss:$24 sps:$4 sm:$0xff]  }
 0x561   :  { %5207 = vmatprep.subr.bf16.mxu0 %v10458_v18  ;;  %v2799_v18 = vld [vmem:[%s14315_s3 + $0x48] sm:$0xff] }
 0x566   :  { %5169 = vmatpush1.bf16.xpose.msra.mxu1 %v10453_v23  ;;  %v10512_v23 = vld [vmem:[%s14313_s5 + $0xaf4] ss:$24 sps:$4 sm:$0xff]  }
 0x567   :  { %5170 = vmatprep.subr.bf16.mxu1 %v10461_v24  ;;  %v2791_v24 = vld [vmem:[%s14315_s3 + $0x8] sm:$0xff] }
 0x568   :  { %5208 = vmatpush1.bf16.xpose.msra.mxu0 %v10456_v28  ;;  %v4767_v28 = vadd.f32 %v12464_v44, %v2799_v18 }
 0x569   :  { %5209 = vmatprep.subr.bf16.mxu0 %v10464_v30  ;;  %v5314_v30 = vld [vmem:[%s14316_s6 + $0x1c0] sm:$0xff] }
 0x56e   :  { %5171 = vmatpush1.bf16.xpose.msra.mxu1 %v10459_v31  ;;  %v5318_v31 = vld [vmem:[%s14316_s6 + $0x1e0] sm:$0xff] }
 0x56f   :  { %5172 = vmatprep.subr.bf16.mxu1 %v10467_v40  ;;  %v4763_v40 = vadd.f32 %v12281_v27, %v2791_v24  ;;  %v5278_v24 = vld [vmem:[%s14316_s6 + $0xa0] sm:$0xff] }
 0x570   :  { %5210 = vmatpush1.bf16.xpose.msra.mxu0 %v10462_v32  ;;  %v4810_v32 = vadd.f32 %v12656_v56, %v4767_v28 }
 0x571   :  { %5211 = vmatprep.subr.bf16.mxu0 %v10470_v35  ;;  %v10507_v35 = vld [vmem:[%s14313_s5 + $0xa88] ss:$24 sps:$4 sm:$0xff]   ;;  %v4806_v44 = vadd.f32 %v12297_v41, %v4763_v40 }
 0x572   :  { %v5306_v41 = vld [vmem:[%s14316_s6 + $0x180] sm:$0xff] }
 0x573   :  { %v4849_v27 = vadd.f32 %v12476_v50, %v4806_v44  ;;  %v10513_v50 = vld [vmem:[%s14313_s5 + $0xac0] ss:$24 sps:$4 sm:$0xff]  }
 0x574   :  { %v5270_v44 = vld [vmem:[%s14316_s6 + $0x60] sm:$0xff] }
 0x575   :  { %v5018_v53 = vpop.f32.mrf.mxu1 }
 0x576   :  { %5173 = vmatpush2.bf16.xpose.msra.mxu1 %v10465_v36  ;;  %v5019_v60 = vadd.f32 %v5018_v53, %v2794_v54  ;;  %v9183_v36 = vcombine.high %v5314_v30, %v5318_v31  ;;  %v10518_v53 = vld [vmem:[%s14313_s5 + $0xa94] ss:$24 sps:$4 sm:$0xff]   ;;  %v5298_v54 = vld [vmem:[%s14316_s6 + $0x140] sm:$0xff] }
 0x577   :  { %5174 = vmatprep.subr.bf16.mxu1 %v10473_v42  ;;  %v12913_v55 = vpop.f32.mrf.mxu1  ;;  %v4853_v42 = vadd.f32 %v12675_v0, %v4810_v32  ;;  %v5310_v0 = vld [vmem:[%s14316_s6 + $0x1a0] sm:$0xff] }
 0x578   :  { %5212 = vmatpush1.bf16.xpose.msra.mxu0 %v10468_v45  ;;  %v10510_v45 = vld [vmem:[%s14313_s5 + $0xaf0] ss:$24 sps:$4 sm:$0xff]  }
 0x579   :  { %5213 = vmatprep.subr.bf16.mxu0 %v10476_v46  ;;  %v5022_v63 = vpop.f32.mrf.mxu1  ;;  %v10515_v46 = vld [vmem:[%s14313_s5 + $0xac4] ss:$24 sps:$4 sm:$0xff]   ;;  %v5251_v56 = vmax.f32 %v4853_v42, 0.0 }
 0x57a   :  { %v5023_v2 = vadd.f32 %v5022_v63, %v2802_v61  ;;  %v5319_v61 = vld [vmem:[%s14316_s6 + $0x1e8] sm:$0xff] }
 0x57e   :  { %5175 = vmatpush2.bf16.xpose.msra.mxu1 %v10471_v49  ;;  %v5243_v49 = vmax.f32 %v4849_v27, 0.0 }
 0x57f   :  { %5176 = vmatprep.subr.bf16.mxu1 %v10479_v38  ;;  %v9182_v38 = vcombine.low %v5314_v30, %v5318_v31  ;;  %v5291_v30 = vld [vmem:[%s14316_s6 + $0x108] sm:$0xff] }
 0x580   :  { %5214 = vmatpush1.bf16.xpose.msra.mxu0 %v10474_v43  ;;  %v9175_v43 = vcombine.high %v5306_v41, %v5310_v0  ;;  %v5295_v31 = vld [vmem:[%s14316_s6 + $0x128] sm:$0xff] }
 0x581   :  { %5215 = vmatprep.subr.bf16.mxu0 %v10482_v52  ;;  %v13016_v52 = vpack.c.bf16 %v5251_v56, %v5243_v49  ;;  %v9160_v56 = vcombine.low %v5291_v30, %v5295_v31  ;;  %v5262_v49 = vld [vmem:[%s14316_s6 + $0x20] sm:$0xff] }
 0x586   :  { %5177 = vmatpush2.bf16.xpose.msra.mxu1 %v10477_v25  ;;  %v2801_v25 = vld [vmem:[%s14315_s3 + $0x58] sm:$0xff] }
 0x587   :  { %v5061_v21 = vpop.f32.mrf.mxu0  ;;  %5178 = vmatprep.subr.bf16.mxu1 %v10485_v39  ;;  %v2793_v39 = vld [vmem:[%s14315_s3 + $0x18] sm:$0xff] }
 0x588   :  { %v12929_v22 = vadd.f32 %v5061_v21, %v5019_v60  ;;  %5216 = vmatpush2.bf16.xpose.msra.mxu0 %v10480_v47  ;;  %v4896_v47 = vadd.f32 %v12712_v17, %v2801_v25  ;;  %v5315_v60 = vld [vmem:[%s14316_s6 + $0x1c8] sm:$0xff]  ;;  %v4892_v21 = vadd.f32 %v12670_v62, %v2793_v39  ;;  %v5290_v62 = vld [vmem:[%s14316_s6 + $0x100] sm:$0xff] }
 0x589   :  { %v12931_v1 = vpop.f32.mrf.mxu0  ;;  %5217 = vmatprep.subr.bf16.mxu0 %v10488_v59  ;;  %v9174_v59 = vcombine.low %v5306_v41, %v5310_v0  ;;  %v5258_v0 = vld [vmem:[%s14316_s6] sm:$0xff] }
 0x58a   :  { %v4935_v17 = vadd.f32 %v12689_v5, %v4892_v21  ;;  %v5307_v5 = vld [vmem:[%s14316_s6 + $0x188] sm:$0xff]  ;;  %v5382_v39 = vld [vmem:[%s14316_s6 + $0x3e0] sm:$0xff] }
 0x58b   :  { %v5065_v34 = vpop.f32.mrf.mxu0 }
 0x58c   :  { %v12939_v3 = vadd.f32 %v5065_v34, %v5023_v2  ;;  %v4939_v2 = vadd.f32 %v12902_v51, %v4896_v47  ;;  %v9185_v34 = vcombine.high %v5315_v60, %v5319_v61  ;;  %v5294_v51 = vld [vmem:[%s14316_s6 + $0x120] sm:$0xff]  ;;  %v9126_v47 = vcombine.low %v5258_v0, %v5262_v49 }
 0x58e   :  { %5179 = vmatpush2.bf16.xpose.msra.mxu1 %v10483_v33  ;;  %v10516_v33 = vld [vmem:[%s14313_s5 + $0xa90] ss:$24 sps:$4 sm:$0xff]  }
 0x58f   :  { %5180 = vmatprep.subr.bf16.mxu1 %v10491_v29  ;;  %v4982_v29 = vadd.f32 %v12921_v58, %v4939_v2  ;;  %v9159_v58 = vcombine.high %v5290_v62, %v5294_v51  ;;  %v5370_v2 = vld [vmem:[%s14316_s6 + $0x380] sm:$0xff] }
 0x590   :  { %5218 = vmatpush2.bf16.xpose.msra.mxu0 %v10486_v4  ;;  %v4978_v4 = vadd.f32 %v12717_v26, %v4935_v17  ;;  %v5311_v26 = vld [vmem:[%s14316_s6 + $0x1a8] sm:$0xff] }
 0x591   :  { %5219 = vmatprep.subr.bf16.mxu0 %v10494_v7  ;;  %v5253_v7 = vmax.f32 %v4982_v29, 0.0  ;;  %v5259_v17 = vld [vmem:[%s14316_s6 + $0x8] sm:$0xff] }
 0x592   :  { %v5263_v29 = vld [vmem:[%s14316_s6 + $0x28] sm:$0xff] }
 0x596   :  { %5181 = vmatpush2.bf16.xpose.msra.mxu1 %v10489_v8 }
 0x597   :  { %5182 = vmatprep.subr.bf16.mxu1 %v10497_v9  ;;  %v5245_v9 = vmax.f32 %v4978_v4, 0.0  ;;  %v13141_v4 = vpop.f32.mrf.mxu1 }
 0x598   :  { %5220 = vmatpush2.bf16.xpose.msra.mxu0 %v10492_v10  ;;  %v9184_v10 = vcombine.low %v5315_v60, %v5319_v61  ;;  %v5271_v60 = vld [vmem:[%s14316_s6 + $0x68] sm:$0xff] }
 0x599   :  { %5221 = vmatprep.subr.bf16.mxu0 %v10500_v19  ;;  %v9177_v19 = vcombine.high %v5307_v5, %v5311_v26 }
 0x59e   :  { %5183 = vmatpush2.bf16.xpose.msra.mxu1 %v10495_v48  ;;  %v13065_v48 = vpack.c.bf16 %v5253_v7, %v5245_v9  ;;  %v5366_v9 = vld [vmem:[%s14316_s6 + $0x360] sm:$0xff] }
 0x59f   :  { %5184 = vmatprep.subr.bf16.mxu1 %v10503_v11  ;;  %v5282_v11 = vld [vmem:[%s14316_s6 + $0xc0] sm:$0xff] }
 0x5a0   :  { %5222 = vmatpush2.bf16.xpose.msra.mxu0 %v10498_v12  ;;  %v5286_v12 = vld [vmem:[%s14316_s6 + $0xe0] sm:$0xff] }
 0x5a1   :  { %5223 = vmatprep.subr.bf16.mxu0 %v10506_v13  ;;  %v9158_v13 = vcombine.low %v5290_v62, %v5294_v51  ;;  %v9150_v28 = vcombine.low %v5282_v11, %v5286_v12 }
 0x5a6   :  { %5185 = vmatpush2.bf16.xpose.msra.mxu1 %v10501_v14  ;;  %v5299_v14 = vld [vmem:[%s14316_s6 + $0x148] sm:$0xff] }
 0x5a7   :  { %5186 = vmatprep.subr.bf16.mxu1 %v10509_v15  ;;  %v9151_v15 = vcombine.high %v5282_v11, %v5286_v12  ;;  %v5383_v12 = vld [vmem:[%s14316_s6 + $0x3e8] sm:$0xff] }
 0x5a8   :  { %5224 = vmatpush2.bf16.xpose.msra.mxu0 %v10504_v16  ;;  %v9176_v16 = vcombine.low %v5307_v5, %v5311_v26 }
 0x5a9   :  { %5225 = vmatprep.subr.bf16.mxu0 %v10512_v23  ;;  %v5274_v23 = vld [vmem:[%s14316_s6 + $0x80] sm:$0xff] }
 0x5aa   :  { %v9143_v40 = vcombine.high %v5274_v23, %v5278_v24  ;;  %v9142_v42 = vcombine.low %v5274_v23, %v5278_v24  ;;  %v5358_v23 = vld [vmem:[%s14316_s6 + $0x320] sm:$0xff] }
 0x5ae   :  { %5187 = vmatpush2.bf16.xpose.msra.mxu1 %v10507_v35  ;;  %v9161_v35 = vcombine.high %v5291_v30, %v5295_v31  ;;  %v5375_v30 = vld [vmem:[%s14316_s6 + $0x3a8] sm:$0xff] }
 0x5af   :  { %7602 = vmatprep.subr.bf16.mxu1 %v9183_v36  ;;  %v5266_v36 = vld [vmem:[%s14316_s6 + $0x40] sm:$0xff] }
 0x5b0   :  { %5226 = vmatpush2.bf16.xpose.msra.mxu0 %v10510_v45  ;;  %v5283_v45 = vld [vmem:[%s14316_s6 + $0xc8] sm:$0xff]  ;;  %v9135_v27 = vcombine.high %v5266_v36, %v5270_v44 }
 0x5b1   :  { %5227 = vmatprep.subr.bf16.mxu0 %v10515_v46  ;;  %v5287_v46 = vld [vmem:[%s14316_s6 + $0xe8] sm:$0xff] }
 0x5b2   :  { %v9153_v41 = vcombine.high %v5283_v45, %v5287_v46  ;;  %v9152_v25 = vcombine.low %v5283_v45, %v5287_v46  ;;  %v5367_v45 = vld [vmem:[%s14316_s6 + $0x368] sm:$0xff] }
 0x5b5   :  { %5189 = vmatmul.mubr.bf16.vlgmr.msra.gmra.mxu1 %v11819_v6  ;;  %v5302_v6 = vld [vmem:[%s14316_s6 + $0x160] sm:$0xff] }
 0x5b6   :  { %7603 = vmatpush1.bf16.xpose.msra.mxu1 %v9182_v38  ;;  %7634 = vmatprep.mubr.bf16.mxu1 %v13016_v52  ;;  %v9167_v63 = vcombine.high %v5298_v54, %v5302_v6  ;;  %v9166_v8 = vcombine.low %v5298_v54, %v5302_v6  ;;  %v9134_v38 = vcombine.low %v5266_v36, %v5270_v44  ;;  %v5378_v6 = vld [vmem:[%s14316_s6 + $0x3c0] sm:$0xff] }
 0x5b7   :  { %7604 = vmatprep.subr.bf16.mxu1 %v9175_v43  ;;  %v5275_v43 = vld [vmem:[%s14316_s6 + $0x88] sm:$0xff]  ;;  %v9247_v61 = vcombine.high %v5378_v6, %v5382_v39  ;;  %v5350_v36 = vld [vmem:[%s14316_s6 + $0x2e0] sm:$0xff] }
 0x5b8   :  { %5228 = vmatpush2.bf16.xpose.msra.mxu0 %v10513_v50  ;;  %v5279_v50 = vld [vmem:[%s14316_s6 + $0xa8] sm:$0xff] }
 0x5b9   :  { %5229 = vmatprep.subr.bf16.mxu0 %v10518_v53  ;;  %v9127_v53 = vcombine.high %v5258_v0, %v5262_v49  ;;  %v9145_v54 = vcombine.high %v5275_v43, %v5279_v50  ;;  %v5342_v0 = vld [vmem:[%s14316_s6 + $0x2a0] sm:$0xff] }
 0x5be   :  { %7605 = vmatpush1.bf16.xpose.msra.mxu1 %v9174_v59  ;;  %v5267_v59 = vld [vmem:[%s14316_s6 + $0x48] sm:$0xff] }
 0x5bf   :  { %7606 = vmatprep.subr.bf16.mxu1 %v9167_v63  ;;  %v9144_v63 = vcombine.low %v5275_v43, %v5279_v50  ;;  %v9137_v21 = vcombine.high %v5267_v59, %v5271_v60  ;;  %v9136_v51 = vcombine.low %v5267_v59, %v5271_v60  ;;  %v5359_v43 = vld [vmem:[%s14316_s6 + $0x328] sm:$0xff] }
 0x5c0   :  { %5230 = vmatpush2.bf16.xpose.msra.mxu0 %v10516_v33  ;;  %v5374_v33 = vld [vmem:[%s14316_s6 + $0x3a0] sm:$0xff]  ;;  %v5351_v59 = vld [vmem:[%s14316_s6 + $0x2e8] sm:$0xff] }
 0x5c1   :  { %7645 = vmatprep.subr.bf16.mxu0 %v9185_v34  ;;  %v9246_v34 = vcombine.low %v5378_v6, %v5382_v39  ;;  %v9239_v62 = vcombine.high %v5370_v2, %v5374_v33  ;;  %v9238_v11 = vcombine.low %v5370_v2, %v5374_v33  ;;  %v5334_v6 = vld [vmem:[%s14316_s6 + $0x260] sm:$0xff] }
 0x5c2   :  { %v5326_v2 = vld [vmem:[%s14316_s6 + $0x220] sm:$0xff] }
 0x5c6   :  { %7607 = vmatpush1.bf16.xpose.msra.mxu1 %v9166_v8  ;;  %v9129_v8 = vcombine.high %v5259_v17, %v5263_v29 }
 0x5c7   :  { %5232 = vmatmul.mubr.bf16.vlgmr.msra.gmra.mxu0 %v12151_v37  ;;  %7608 = vmatprep.subr.bf16.mxu1 %v9159_v58  ;;  %v5303_v37 = vld [vmem:[%s14316_s6 + $0x168] sm:$0xff]  ;;  %v5362_v58 = vld [vmem:[%s14316_s6 + $0x340] sm:$0xff] }
 0x5c8   :  { %7646 = vmatpush1.bf16.xpose.msra.mxu0 %v9184_v10  ;;  %7677 = vmatprep.mubr.bf16.mxu0 %v13065_v48  ;;  %v9169_v18 = vcombine.high %v5299_v14, %v5303_v37  ;;  %v9168_v32 = vcombine.low %v5299_v14, %v5303_v37  ;;  %v9230_v24 = vcombine.low %v5362_v58, %v5366_v9 }
 0x5c9   :  { %7647 = vmatprep.subr.bf16.mxu0 %v9177_v19 }
 0x5ce   :  { %7609 = vmatpush1.bf16.xpose.msra.mxu1 %v9158_v13  ;;  %v9231_v13 = vcombine.high %v5362_v58, %v5366_v9  ;;  %v5316_v9 = vld [vmem:[%s14316_s6 + $0x1d0] sm:$0xff] }
 0x5cf   :  { %7610 = vmatprep.subr.bf16.mxu1 %v9151_v15  ;;  %v9128_v15 = vcombine.low %v5259_v17, %v5263_v29  ;;  %v5343_v17 = vld [vmem:[%s14316_s6 + $0x2a8] sm:$0xff] }
 0x5d0   :  { %7648 = vmatpush1.bf16.xpose.msra.mxu0 %v9176_v16 }
 0x5d1   :  { %7649 = vmatprep.subr.bf16.mxu0 %v9169_v18 }
 0x5d6   :  { %7611 = vmatpush1.bf16.xpose.msra.mxu1 %v9150_v28  ;;  %v5371_v28 = vld [vmem:[%s14316_s6 + $0x388] sm:$0xff] }
 0x5d7   :  { %7612 = vmatprep.subr.bf16.mxu1 %v9143_v40 }
 0x5d8   :  { %7650 = vmatpush1.bf16.xpose.msra.mxu0 %v9168_v32  ;;  %v9241_v32 = vcombine.high %v5371_v28, %v5375_v30 }
 0x5d9   :  { %7651 = vmatprep.subr.bf16.mxu0 %v9161_v35  ;;  %v5346_v35 = vld [vmem:[%s14316_s6 + $0x2c0] sm:$0xff] }
 0x5da   :  { %v9215_v46 = vcombine.high %v5346_v35, %v5350_v36  ;;  %v9214_v49 = vcombine.low %v5346_v35, %v5350_v36 }
 0x5de   :  { %7613 = vmatpush1.bf16.xpose.msra.mxu1 %v9142_v42  ;;  %v5363_v42 = vld [vmem:[%s14316_s6 + $0x348] sm:$0xff] }
 0x5df   :  { %7614 = vmatprep.subr.bf16.mxu1 %v9135_v27  ;;  %v9240_v27 = vcombine.low %v5371_v28, %v5375_v30  ;;  %v5312_v28 = vld [vmem:[%s14316_s6 + $0x1b0] sm:$0xff] }
 0x5e0   :  { %7652 = vmatpush1.bf16.xpose.msra.mxu0 %v9160_v56  ;;  %v9233_v56 = vcombine.high %v5363_v42, %v5367_v45 }
 0x5e1   :  { %7653 = vmatprep.subr.bf16.mxu0 %v9153_v41  ;;  %v5338_v41 = vld [vmem:[%s14316_s6 + $0x280] sm:$0xff] }
 0x5e2   :  { %v9207_v50 = vcombine.high %v5338_v41, %v5342_v0  ;;  %v9206_v39 = vcombine.low %v5338_v41, %v5342_v0 }
 0x5e6   :  { %7615 = vmatpush1.bf16.xpose.msra.mxu1 %v9134_v38  ;;  %v5355_v38 = vld [vmem:[%s14316_s6 + $0x308] sm:$0xff] }
 0x5e7   :  { %7616 = vmatprep.subr.bf16.mxu1 %v9127_v53  ;;  %v9232_v53 = vcombine.low %v5363_v42, %v5367_v45  ;;  %v5304_v42 = vld [vmem:[%s14316_s6 + $0x170] sm:$0xff] }
 0x5e8   :  { %7654 = vmatpush1.bf16.xpose.msra.mxu0 %v9152_v25  ;;  %v9225_v25 = vcombine.high %v5355_v38, %v5359_v43 }
 0x5e9   :  { %7655 = vmatprep.subr.bf16.mxu0 %v9145_v54  ;;  %v5330_v54 = vld [vmem:[%s14316_s6 + $0x240] sm:$0xff] }
 0x5ea   :  { %v9199_v60 = vcombine.high %v5330_v54, %v5334_v6  ;;  %v9198_v33 = vcombine.low %v5330_v54, %v5334_v6 }
 0x5ee   :  { %7617 = vmatpush1.bf16.xpose.msra.mxu1 %v9126_v47  ;;  %v5347_v47 = vld [vmem:[%s14316_s6 + $0x2c8] sm:$0xff] }
 0x5ef   :  { %7618 = vmatprep.subr.bf16.mxu1 %v9247_v61  ;;  %v9224_v61 = vcombine.low %v5355_v38, %v5359_v43  ;;  %v5296_v38 = vld [vmem:[%s14316_s6 + $0x130] sm:$0xff] }
 0x5f0   :  { %7656 = vmatpush1.bf16.xpose.msra.mxu0 %v9144_v63  ;;  %v9217_v63 = vcombine.high %v5347_v47, %v5351_v59 }
 0x5f1   :  { %7657 = vmatprep.subr.bf16.mxu0 %v9137_v21  ;;  %v5322_v21 = vld [vmem:[%s14316_s6 + $0x200] sm:$0xff] }
 0x5f2   :  { %v9191_v29 = vcombine.high %v5322_v21, %v5326_v2 }
 0x5f5   :  { %v5104_v7 = vpop.f32.mrf.mxu1 }
 0x5f6   :  { %v5105_v5 = vadd.f32 %v5104_v7, %v12929_v22  ;;  %7619 = vmatpush2.bf16.xpose.msra.mxu1 %v9246_v34  ;;  %v5379_v22 = vld [vmem:[%s14316_s6 + $0x3c8] sm:$0xff] }
 0x5f7   :  { %v13144_v26 = vpop.f32.mrf.mxu1  ;;  %7620 = vmatprep.subr.bf16.mxu1 %v9239_v62  ;;  %v9249_v16 = vcombine.high %v5379_v22, %v5383_v12  ;;  %v9248_v40 = vcombine.low %v5379_v22, %v5383_v12  ;;  %v5339_v34 = vld [vmem:[%s14316_s6 + $0x288] sm:$0xff]  ;;  %v9216_v62 = vcombine.low %v5347_v47, %v5351_v59  ;;  %v9190_v12 = vcombine.low %v5322_v21, %v5326_v2  ;;  %v5288_v47 = vld [vmem:[%s14316_s6 + $0xf0] sm:$0xff] }
 0x5f8   :  { %7658 = vmatpush1.bf16.xpose.msra.mxu0 %v9136_v51  ;;  %v5246_v14 = vmax.f32 %v5105_v5, 0.0  ;;  %v2803_v51 = vld [vmem:[%s14315_s3 + $0x68] sm:$0xff]  ;;  %v9209_v7 = vcombine.high %v5339_v34, %v5343_v17  ;;  %v5067_v5 = vpop.f32.mrf.mxu0 }
 0x5f9   :  { %v5108_v10 = vpop.f32.mrf.mxu1  ;;  %7659 = vmatprep.subr.bf16.mxu0 %v9129_v8  ;;  %v2795_v8 = vld [vmem:[%s14315_s3 + $0x28] sm:$0xff]  ;;  %v5025_v58 = vadd.f32 %v13141_v4, %v2803_v51 }
 0x5fa   :  { %v5109_v19 = vadd.f32 %v5108_v10, %v12939_v3  ;;  %v5354_v3 = vld [vmem:[%s14316_s6 + $0x300] sm:$0xff]  ;;  %v5320_v10 = vld [vmem:[%s14316_s6 + $0x1f0] sm:$0xff]  ;;  %v5335_v4 = vld [vmem:[%s14316_s6 + $0x268] sm:$0xff] }
 0x5fb   :  { %v9223_v31 = vcombine.high %v5354_v3, %v5358_v23  ;;  %v9222_v44 = vcombine.low %v5354_v3, %v5358_v23  ;;  %v5068_v22 = vadd.f32 %v5067_v5, %v5025_v58  ;;  %v5268_v5 = vld [vmem:[%s14316_s6 + $0x50] sm:$0xff] }
 0x5fc   :  { %v5254_v37 = vmax.f32 %v5109_v19, 0.0  ;;  %v5110_v19 = vpop.f32.mrf.mxu1  ;;  %v5272_v58 = vld [vmem:[%s14316_s6 + $0x70] sm:$0xff] }
 0x5fe   :  { %v13159_v18 = vpack.c.bf16 %v5254_v37, %v5246_v14  ;;  %7621 = vmatpush2.bf16.xpose.msra.mxu1 %v9238_v11  ;;  %v5021_v11 = vadd.f32 %v12913_v55, %v2795_v8  ;;  %v9187_v14 = vcombine.high %v5316_v9, %v5320_v10 }
 0x5ff   :  { %7622 = vmatprep.subr.bf16.mxu1 %v9231_v13  ;;  %v5331_v13 = vld [vmem:[%s14316_s6 + $0x248] sm:$0xff] }
 0x600   :  { %7660 = vmatpush1.bf16.xpose.msra.mxu0 %v9128_v15  ;;  %v5064_v37 = vadd.f32 %v12931_v1, %v5021_v11  ;;  %v5111_v15 = vadd.f32 %v5110_v19, %v5068_v22  ;;  %v9201_v3 = vcombine.high %v5331_v13, %v5335_v4  ;;  %v9186_v1 = vcombine.low %v5316_v9, %v5320_v10  ;;  %v5285_v10 = vld [vmem:[%s14316_s6 + $0xd8] sm:$0xff] }
 0x601   :  { %7661 = vmatprep.subr.bf16.mxu0 %v9249_v16  ;;  %v9208_v16 = vcombine.low %v5339_v34, %v5343_v17  ;;  %v9200_v35 = vcombine.low %v5331_v13, %v5335_v4  ;;  %v5280_v34 = vld [vmem:[%s14316_s6 + $0xb0] sm:$0xff]  ;;  %v5289_v19 = vld [vmem:[%s14316_s6 + $0xf8] sm:$0xff]  ;;  %v9139_v11 = vcombine.high %v5268_v5, %v5272_v58 }
 0x602   :  { %v5107_v23 = vadd.f32 %v13144_v26, %v5064_v37  ;;  %v5255_v55 = vmax.f32 %v5111_v15, 0.0  ;;  %v5327_v26 = vld [vmem:[%s14316_s6 + $0x228] sm:$0xff]  ;;  %v5260_v13 = vld [vmem:[%s14316_s6 + $0x10] sm:$0xff]  ;;  %v5277_v37 = vld [vmem:[%s14316_s6 + $0x98] sm:$0xff] }
 0x603   :  { %v5264_v4 = vld [vmem:[%s14316_s6 + $0x30] sm:$0xff]  ;;  %v5281_v15 = vld [vmem:[%s14316_s6 + $0xb8] sm:$0xff] }
 0x604   :  { %v5247_v30 = vmax.f32 %v5107_v23, 0.0  ;;  %v9149_v23 = vcombine.high %v5277_v37, %v5281_v15 }
 0x606   :  { %7623 = vmatpush2.bf16.xpose.msra.mxu1 %v9230_v24  ;;  %v5308_v24 = vld [vmem:[%s14316_s6 + $0x190] sm:$0xff] }
 0x607   :  { %7624 = vmatprep.subr.bf16.mxu1 %v9223_v31  ;;  %v5323_v31 = vld [vmem:[%s14316_s6 + $0x208] sm:$0xff]  ;;  %v9178_v45 = vcombine.low %v5308_v24, %v5312_v28 }
 0x608   :  { %7662 = vmatpush2.bf16.xpose.msra.mxu0 %v9248_v40  ;;  %v9179_v40 = vcombine.high %v5308_v24, %v5312_v28  ;;  %v9193_v36 = vcombine.high %v5323_v31, %v5327_v26  ;;  %v9192_v41 = vcombine.low %v5323_v31, %v5327_v26  ;;  %v5384_v24 = vld [vmem:[%s14316_s6 + $0x3f0] sm:$0xff]  ;;  %v9130_v28 = vcombine.low %v5260_v13, %v5264_v4 }
 0x609   :  { %7663 = vmatprep.subr.bf16.mxu0 %v9241_v32  ;;  %v13255_v32 = vpack.c.bf16 %v5255_v55, %v5247_v30  ;;  %v5380_v55 = vld [vmem:[%s14316_s6 + $0x3d0] sm:$0xff]  ;;  %v5269_v30 = vld [vmem:[%s14316_s6 + $0x58] sm:$0xff]  ;;  %v9148_v26 = vcombine.low %v5277_v37, %v5281_v15 }
 0x60a   :  { %v9251_v31 = vcombine.high %v5380_v55, %v5384_v24 }
 0x60e   :  { %7625 = vmatpush2.bf16.xpose.msra.mxu1 %v9222_v44  ;;  %v5300_v44 = vld [vmem:[%s14316_s6 + $0x150] sm:$0xff] }
 0x60f   :  { %7626 = vmatprep.subr.bf16.mxu1 %v9215_v46  ;;  %v5317_v46 = vld [vmem:[%s14316_s6 + $0x1d8] sm:$0xff]  ;;  %v9170_v43 = vcombine.low %v5300_v44, %v5304_v42 }
 0x610   :  { %7664 = vmatpush2.bf16.xpose.msra.mxu0 %v9240_v27  ;;  %v5321_v27 = vld [vmem:[%s14316_s6 + $0x1f8] sm:$0xff] }
 0x611   :  { %7665 = vmatprep.subr.bf16.mxu0 %v9233_v56  ;;  %v9171_v56 = vcombine.high %v5300_v44, %v5304_v42  ;;  %v9189_v0 = vcombine.high %v5317_v46, %v5321_v27  ;;  %v9188_v54 = vcombine.low %v5317_v46, %v5321_v27  ;;  %v9250_v44 = vcombine.low %v5380_v55, %v5384_v24  ;;  %v5261_v42 = vld [vmem:[%s14316_s6 + $0x18] sm:$0xff] }
 0x616   :  { %7627 = vmatpush2.bf16.xpose.msra.mxu1 %v9214_v49  ;;  %v5292_v49 = vld [vmem:[%s14316_s6 + $0x110] sm:$0xff] }
 0x617   :  { %7628 = vmatprep.subr.bf16.mxu1 %v9207_v50  ;;  %v5309_v50 = vld [vmem:[%s14316_s6 + $0x198] sm:$0xff]  ;;  %v9162_v59 = vcombine.low %v5292_v49, %v5296_v38 }
 0x618   :  { %7666 = vmatpush2.bf16.xpose.msra.mxu0 %v9232_v53  ;;  %v5313_v53 = vld [vmem:[%s14316_s6 + $0x1b8] sm:$0xff] }
 0x619   :  { %7667 = vmatprep.subr.bf16.mxu0 %v9225_v25  ;;  %v9163_v25 = vcombine.high %v5292_v49, %v5296_v38  ;;  %v9181_v6 = vcombine.high %v5309_v50, %v5313_v53  ;;  %v9180_v21 = vcombine.low %v5309_v50, %v5313_v53  ;;  %v13362_v49 = vpop.f32.mrf.mxu0  ;;  %v5385_v50 = vld [vmem:[%s14316_s6 + $0x3f8] sm:$0xff] }
 0x61e   :  { %7629 = vmatpush2.bf16.xpose.msra.mxu1 %v9206_v39  ;;  %v5284_v39 = vld [vmem:[%s14316_s6 + $0xd0] sm:$0xff] }
 0x61f   :  { %7630 = vmatprep.subr.bf16.mxu1 %v9199_v60  ;;  %v5301_v60 = vld [vmem:[%s14316_s6 + $0x158] sm:$0xff]  ;;  %v9154_v17 = vcombine.low %v5284_v39, %v5288_v47 }
 0x620   :  { %7668 = vmatpush2.bf16.xpose.msra.mxu0 %v9224_v61  ;;  %v5305_v61 = vld [vmem:[%s14316_s6 + $0x178] sm:$0xff] }
 0x621   :  { %7669 = vmatprep.subr.bf16.mxu0 %v9217_v63  ;;  %v9155_v63 = vcombine.high %v5284_v39, %v5288_v47  ;;  %v9173_v2 = vcombine.high %v5301_v60, %v5305_v61  ;;  %v5356_v47 = vld [vmem:[%s14316_s6 + $0x310] sm:$0xff] }
 0x626   :  { %7631 = vmatpush2.bf16.xpose.msra.mxu1 %v9198_v33  ;;  %v5276_v33 = vld [vmem:[%s14316_s6 + $0x90] sm:$0xff] }
 0x627   :  { %7632 = vmatprep.subr.bf16.mxu1 %v9191_v29  ;;  %v5293_v29 = vld [vmem:[%s14316_s6 + $0x118] sm:$0xff]  ;;  %v9147_v51 = vcombine.high %v5276_v33, %v5280_v34  ;;  %v9146_v9 = vcombine.low %v5276_v33, %v5280_v34 }
 0x628   :  { %7670 = vmatpush2.bf16.xpose.msra.mxu0 %v9216_v62  ;;  %v5297_v62 = vld [vmem:[%s14316_s6 + $0x138] sm:$0xff] }
 0x629   :  { %7671 = vmatprep.subr.bf16.mxu0 %v9209_v7  ;;  %v9172_v7 = vcombine.low %v5301_v60, %v5305_v61  ;;  %v9165_v8 = vcombine.high %v5293_v29, %v5297_v62  ;;  %v9164_v22 = vcombine.low %v5293_v29, %v5297_v62 }
 0x62e   :  { %7633 = vmatpush2.bf16.xpose.msra.mxu1 %v9190_v12  ;;  %v9157_v12 = vcombine.high %v5285_v10, %v5289_v19 }
 0x62f   :  { %7688 = vmatprep.subr.bf16.mxu1 %v9187_v14  ;;  %v9138_v14 = vcombine.low %v5268_v5, %v5272_v58  ;;  %v5348_v58 = vld [vmem:[%s14316_s6 + $0x2d0] sm:$0xff] }
 0x630   :  { %7672 = vmatpush2.bf16.xpose.msra.mxu0 %v9208_v16  ;;  %v9131_v16 = vcombine.high %v5260_v13, %v5264_v4  ;;  %v5365_v13 = vld [vmem:[%s14316_s6 + $0x358] sm:$0xff] }
 0x631   :  { %7673 = vmatprep.subr.bf16.mxu0 %v9201_v3  ;;  %v9156_v3 = vcombine.low %v5285_v10, %v5289_v19  ;;  %v5369_v4 = vld [vmem:[%s14316_s6 + $0x378] sm:$0xff] }
 0x632   :  { %v9237_v55 = vcombine.high %v5365_v13, %v5369_v4 }
 0x635   :  { %7635 = vmatmul.mubr.bf16.vlgmr.msra.gmra.mxu1 %v12491_v57 }
 0x636   :  { %7689 = vmatpush1.bf16.xpose.msra.mxu1 %v9186_v1  ;;  %7720 = vmatprep.mubr.bf16.mxu1 %v13255_v32  ;;  %v5273_v1 = vld [vmem:[%s14316_s6 + $0x78] sm:$0xff] }
 0x637   :  { %7690 = vmatprep.subr.bf16.mxu1 %v9179_v40  ;;  %v9141_v40 = vcombine.high %v5269_v30, %v5273_v1  ;;  %v9140_v27 = vcombine.low %v5269_v30, %v5273_v1  ;;  %v5340_v1 = vld [vmem:[%s14316_s6 + $0x290] sm:$0xff] }
 0x638   :  { %7674 = vmatpush2.bf16.xpose.msra.mxu0 %v9200_v35  ;;  %v5372_v35 = vld [vmem:[%s14316_s6 + $0x390] sm:$0xff] }
 0x639   :  { %7675 = vmatprep.subr.bf16.mxu0 %v9193_v36  ;;  %v5376_v36 = vld [vmem:[%s14316_s6 + $0x3b0] sm:$0xff] }
 0x63a   :  { %v9243_v46 = vcombine.high %v5372_v35, %v5376_v36  ;;  %v9242_v38 = vcombine.low %v5372_v35, %v5376_v36  ;;  %v5357_v35 = vld [vmem:[%s14316_s6 + $0x318] sm:$0xff] }
 0x63b   :  { %v5361_v36 = vld [vmem:[%s14316_s6 + $0x338] sm:$0xff] }
 0x63e   :  { %7691 = vmatpush1.bf16.xpose.msra.mxu1 %v9178_v45  ;;  %v5265_v45 = vld [vmem:[%s14316_s6 + $0x38] sm:$0xff] }
 0x63f   :  { %7692 = vmatprep.subr.bf16.mxu1 %v9171_v56  ;;  %v9133_v56 = vcombine.high %v5261_v42, %v5265_v45 }
 0x640   :  { %7676 = vmatpush2.bf16.xpose.msra.mxu0 %v9192_v41  ;;  %v5364_v41 = vld [vmem:[%s14316_s6 + $0x350] sm:$0xff] }
 0x641   :  { %7731 = vmatprep.subr.bf16.mxu0 %v9189_v0  ;;  %v5368_v0 = vld [vmem:[%s14316_s6 + $0x370] sm:$0xff] }
 0x642   :  { %v9235_v53 = vcombine.high %v5364_v41, %v5368_v0 }
 0x646   :  { %7693 = vmatpush1.bf16.xpose.msra.mxu1 %v9170_v43  ;;  %v5381_v43 = vld [vmem:[%s14316_s6 + $0x3d8] sm:$0xff] }
 0x647   :  { %7678 = vmatmul.mubr.bf16.vlgmr.msra.gmra.mxu0 %v12731_v20  ;;  %7694 = vmatprep.subr.bf16.mxu1 %v9163_v25  ;;  %v9132_v25 = vcombine.low %v5261_v42, %v5265_v45  ;;  %v9253_v39 = vcombine.high %v5381_v43, %v5385_v50  ;;  %v9252_v34 = vcombine.low %v5381_v43, %v5385_v50 }
 0x648   :  { %7732 = vmatpush1.bf16.xpose.msra.mxu0 %v9188_v54  ;;  %v5149_v54 = vpop.f32.mrf.mxu0  ;;  %v9236_v42 = vcombine.low %v5365_v13, %v5369_v4  ;;  %v9229_v45 = vcombine.high %v5357_v35, %v5361_v36  ;;  %v9228_v43 = vcombine.low %v5357_v35, %v5361_v36  ;;  %v2804_v13 = vld [vmem:[%s14315_s3 + $0x70] sm:$0xff]  ;;  %v5418_v36 = vld [vmem:[%s14316_s6 + $0x500] sm:$0xff] }
 0x649   :  { %7733 = vmatprep.subr.bf16.mxu0 %v9181_v6  ;;  %v2796_v4 = vld [vmem:[%s14315_s3 + $0x30] sm:$0xff] }
 0x64a   :  { %v13378_v60 = vpop.f32.mrf.mxu0 }
 0x64c   :  { %v5153_v29 = vpop.f32.mrf.mxu0 }
 0x64e   :  { %7695 = vmatpush1.bf16.xpose.msra.mxu1 %v9162_v59  ;;  %v5360_v59 = vld [vmem:[%s14316_s6 + $0x330] sm:$0xff] }
 0x64f   :  { %7696 = vmatprep.subr.bf16.mxu1 %v9155_v63  ;;  %v9234_v63 = vcombine.low %v5364_v41, %v5368_v0  ;;  %v9227_v33 = vcombine.high %v5356_v47, %v5360_v59  ;;  %v5349_v41 = vld [vmem:[%s14316_s6 + $0x2d8] sm:$0xff] }
 0x650   :  { %7734 = vmatpush1.bf16.xpose.msra.mxu0 %v9180_v21  ;;  %v5373_v21 = vld [vmem:[%s14316_s6 + $0x398] sm:$0xff] }
 0x651   :  { %7735 = vmatprep.subr.bf16.mxu0 %v9173_v2  ;;  %v5377_v2 = vld [vmem:[%s14316_s6 + $0x3b8] sm:$0xff] }
 0x652   :  { %v5353_v0 = vld [vmem:[%s14316_s6 + $0x2f8] sm:$0xff] }
 0x653   :  { %v9221_v50 = vcombine.high %v5349_v41, %v5353_v0 }
 0x656   :  { %7697 = vmatpush1.bf16.xpose.msra.mxu1 %v9154_v17  ;;  %v2797_v17 = vld [vmem:[%s14315_s3 + $0x38] sm:$0xff] }
 0x657   :  { %7698 = vmatprep.subr.bf16.mxu1 %v9147_v51  ;;  %v9245_v51 = vcombine.high %v5373_v21, %v5377_v2  ;;  %v5150_v5 = vadd.f32 %v5149_v54, %v2797_v17  ;;  %v5337_v17 = vld [vmem:[%s14316_s6 + $0x278] sm:$0xff] }
 0x658   :  { %7736 = vmatpush1.bf16.xpose.msra.mxu0 %v9172_v7  ;;  %v2805_v7 = vld [vmem:[%s14315_s3 + $0x78] sm:$0xff] }
 0x659   :  { %7737 = vmatprep.subr.bf16.mxu0 %v9165_v8 }
 0x65e   :  { %7699 = vmatpush1.bf16.xpose.msra.mxu1 %v9146_v9  ;;  %v5352_v9 = vld [vmem:[%s14316_s6 + $0x2f0] sm:$0xff] }
 0x65f   :  { %7700 = vmatprep.subr.bf16.mxu1 %v9139_v11  ;;  %v5154_v11 = vadd.f32 %v5153_v29, %v2805_v7  ;;  %v9219_v37 = vcombine.high %v5348_v58, %v5352_v9 }
 0x660   :  { %7738 = vmatpush1.bf16.xpose.msra.mxu0 %v9164_v22 }
 0x661   :  { %7739 = vmatprep.subr.bf16.mxu0 %v9157_v12  ;;  %v9226_v12 = vcombine.low %v5356_v47, %v5360_v59  ;;  %v5345_v47 = vld [vmem:[%s14316_s6 + $0x2b8] sm:$0xff] }
 0x666   :  { %7701 = vmatpush1.bf16.xpose.msra.mxu1 %v9138_v14 }
 0x667   :  { %7702 = vmatprep.subr.bf16.mxu1 %v9131_v16 }
 0x668   :  { %7740 = vmatpush1.bf16.xpose.msra.mxu0 %v9156_v3  ;;  %v9244_v3 = vcombine.low %v5373_v21, %v5377_v2  ;;  %v5442_v21 = vld [vmem:[%s14316_s6 + $0x5c0] sm:$0xff] }
 0x669   :  { %7741 = vmatprep.subr.bf16.mxu0 %v9149_v23  ;;  %v5446_v2 = vld [vmem:[%s14316_s6 + $0x5e0] sm:$0xff] }
 0x66a   :  { %v9311_v29 = vcombine.high %v5442_v21, %v5446_v2 }
 0x66e   :  { %7703 = vmatpush1.bf16.xpose.msra.mxu1 %v9130_v28 }
 0x66f   :  { %7704 = vmatprep.subr.bf16.mxu1 %v9251_v31  ;;  %v5344_v31 = vld [vmem:[%s14316_s6 + $0x2b0] sm:$0xff] }
 0x670   :  { %7742 = vmatpush1.bf16.xpose.msra.mxu0 %v9148_v26 }
 0x671   :  { %7743 = vmatprep.subr.bf16.mxu0 %v9141_v40  ;;  %v9218_v40 = vcombine.low %v5348_v58, %v5352_v9  ;;  %v5438_v58 = vld [vmem:[%s14316_s6 + $0x5a0] sm:$0xff]  ;;  %v9310_v9 = vcombine.low %v5442_v21, %v5446_v2 }
 0x675   :  { %v13370_v6 = vpop.f32.mrf.mxu1 }
 0x676   :  { %7705 = vmatpush2.bf16.xpose.msra.mxu1 %v9250_v44  ;;  %v9211_v44 = vcombine.high %v5340_v1, %v5344_v31 }
 0x677   :  { %7706 = vmatprep.subr.bf16.mxu1 %v9243_v46  ;;  %v5192_v61 = vpop.f32.mrf.mxu1  ;;  %v5332_v46 = vld [vmem:[%s14316_s6 + $0x250] sm:$0xff] }
 0x678   :  { %7744 = vmatpush1.bf16.xpose.msra.mxu0 %v9140_v27  ;;  %v5193_v22 = vadd.f32 %v5192_v61, %v5150_v5  ;;  %v5336_v27 = vld [vmem:[%s14316_s6 + $0x270] sm:$0xff]  ;;  %v9220_v61 = vcombine.low %v5349_v41, %v5353_v0  ;;  %v5434_v5 = vld [vmem:[%s14316_s6 + $0x580] sm:$0xff] }
 0x679   :  { %7745 = vmatprep.subr.bf16.mxu0 %v9133_v56  ;;  %v13389_v62 = vpop.f32.mrf.mxu1  ;;  %v9210_v56 = vcombine.low %v5340_v1, %v5344_v31  ;;  %v9202_v54 = vcombine.low %v5332_v46, %v5336_v27  ;;  %v5414_v41 = vld [vmem:[%s14316_s6 + $0x4e0] sm:$0xff] }
 0x67b   :  { %v5196_v10 = vpop.f32.mrf.mxu1 }
 0x67c   :  { %v5197_v15 = vadd.f32 %v5196_v10, %v5154_v11  ;;  %v5325_v10 = vld [vmem:[%s14316_s6 + $0x218] sm:$0xff]  ;;  %v9303_v11 = vcombine.high %v5434_v5, %v5438_v58 }
 0x67e   :  { %7707 = vmatpush2.bf16.xpose.msra.mxu1 %v9242_v38  ;;  %v9203_v38 = vcombine.high %v5332_v46, %v5336_v27 }
 0x67f   :  { %7708 = vmatprep.subr.bf16.mxu1 %v9235_v53  ;;  %v5324_v53 = vld [vmem:[%s14316_s6 + $0x210] sm:$0xff] }
 0x680   :  { %7746 = vmatpush1.bf16.xpose.msra.mxu0 %v9132_v25  ;;  %v5328_v25 = vld [vmem:[%s14316_s6 + $0x230] sm:$0xff] }
 0x681   :  { %7747 = vmatprep.subr.bf16.mxu0 %v9253_v39  ;;  %v5341_v39 = vld [vmem:[%s14316_s6 + $0x298] sm:$0xff]  ;;  %v9195_v59 = vcombine.high %v5324_v53, %v5328_v25 }
 0x686   :  { %7709 = vmatpush2.bf16.xpose.msra.mxu1 %v9234_v63  ;;  %v9213_v63 = vcombine.high %v5341_v39, %v5345_v47 }
 0x687   :  { %v13394_v8 = vpop.f32.mrf.mxu0  ;;  %7710 = vmatprep.subr.bf16.mxu1 %v9227_v33  ;;  %v9194_v33 = vcombine.low %v5324_v53, %v5328_v25 }
 0x688   :  { %7748 = vmatpush2.bf16.xpose.msra.mxu0 %v9252_v34  ;;  %v5333_v34 = vld [vmem:[%s14316_s6 + $0x258] sm:$0xff] }
 0x689   :  { %v5235_v19 = vpop.f32.mrf.mxu0  ;;  %7749 = vmatprep.subr.bf16.mxu0 %v9245_v51  ;;  %v9212_v51 = vcombine.low %v5341_v39, %v5345_v47  ;;  %v9205_v7 = vcombine.high %v5333_v34, %v5337_v17  ;;  %v5406_v39 = vld [vmem:[%s14316_s6 + $0x4a0] sm:$0xff] }
 0x68a   :  { %v5236_v16 = vadd.f32 %v5235_v19, %v5193_v22  ;;  %v5329_v19 = vld [vmem:[%s14316_s6 + $0x238] sm:$0xff]  ;;  %v9204_v22 = vcombine.low %v5333_v34, %v5337_v17  ;;  %v5398_v34 = vld [vmem:[%s14316_s6 + $0x460] sm:$0xff] }
 0x68b   :  { %v13408_v14 = vpop.f32.mrf.mxu0  ;;  %v9196_v1 = vcombine.low %v5325_v10, %v5329_v19 }
 0x68c   :  { %v5249_v28 = vmax.f32 %v5236_v16, 0.0  ;;  %v5152_v16 = vadd.f32 %v13378_v60, %v2804_v13 }
 0x68d   :  { %v5239_v23 = vpop.f32.mrf.mxu0 }
 0x68e   :  { %v5240_v24 = vadd.f32 %v5239_v23, %v5197_v15  ;;  %7711 = vmatpush2.bf16.xpose.msra.mxu1 %v9226_v12  ;;  %v9197_v12 = vcombine.high %v5325_v10, %v5329_v19  ;;  %v5430_v15 = vld [vmem:[%s14316_s6 + $0x560] sm:$0xff]  ;;  %v5443_v23 = vld [vmem:[%s14316_s6 + $0x5c8] sm:$0xff] }
 0x68f   :  { %7712 = vmatprep.subr.bf16.mxu1 %v9219_v37  ;;  %v5426_v37 = vld [vmem:[%s14316_s6 + $0x540] sm:$0xff] }
 0x690   :  { %v5257_v30 = vmax.f32 %v5240_v24, 0.0  ;;  %7750 = vmatpush2.bf16.xpose.msra.mxu0 %v9244_v3  ;;  %v9302_v3 = vcombine.low %v5434_v5, %v5438_v58  ;;  %v5148_v24 = vadd.f32 %v13362_v49, %v2796_v4  ;;  %v5422_v49 = vld [vmem:[%s14316_s6 + $0x520] sm:$0xff] }
 0x691   :  { %7751 = vmatprep.subr.bf16.mxu0 %v9237_v55  ;;  %v5447_v55 = vld [vmem:[%s14316_s6 + $0x5e8] sm:$0xff]  ;;  %v9286_v0 = vcombine.low %v5418_v36, %v5422_v49  ;;  %v5390_v10 = vld [vmem:[%s14316_s6 + $0x420] sm:$0xff] }
 0x692   :  { %v13416_v26 = vpack.c.bf16 %v5257_v30, %v5249_v28  ;;  %v5195_v28 = vadd.f32 %v13389_v62, %v5152_v16  ;;  %v9295_v30 = vcombine.high %v5426_v37, %v5430_v15  ;;  %v5191_v31 = vadd.f32 %v13370_v6, %v5148_v24  ;;  %v5435_v6 = vld [vmem:[%s14316_s6 + $0x588] sm:$0xff] }
 0x694   :  { %7763 = vmatprep.mubr.bf16.mxu0 %v13416_v26  ;;  %v5238_v60 = vadd.f32 %v13408_v14, %v5195_v28  ;;  %v5234_v35 = vadd.f32 %v13394_v8, %v5191_v31  ;;  %v5439_v8 = vld [vmem:[%s14316_s6 + $0x5a8] sm:$0xff] }
 0x695   :  { %v9305_v27 = vcombine.high %v5435_v6, %v5439_v8  ;;  %v9304_v53 = vcombine.low %v5435_v6, %v5439_v8  ;;  %v5507_v8 = vld [vmem:[%s14316_s6 + $0x7c8] sm:$0xff] }
 0x696   :  { %7713 = vmatpush2.bf16.xpose.msra.mxu1 %v9218_v40  ;;  %v9313_v40 = vcombine.high %v5443_v23, %v5447_v55  ;;  %v5256_v62 = vmax.f32 %v5238_v60, 0.0  ;;  %v5248_v14 = vmax.f32 %v5234_v35, 0.0  ;;  %v5387_v60 = vld [vmem:[%s14316_s6 + $0x408] sm:$0xff] }
 0x697   :  { %7714 = vmatprep.subr.bf16.mxu1 %v9211_v44  ;;  %v9294_v44 = vcombine.low %v5426_v37, %v5430_v15  ;;  %v5506_v37 = vld [vmem:[%s14316_s6 + $0x7c0] sm:$0xff] }
 0x698   :  { %7752 = vmatpush2.bf16.xpose.msra.mxu0 %v9236_v42  ;;  %v9287_v42 = vcombine.high %v5418_v36, %v5422_v49  ;;  %v13511_v46 = vpack.c.bf16 %v5256_v62, %v5248_v14  ;;  %v5510_v15 = vld [vmem:[%s14316_s6 + $0x7e0] sm:$0xff]  ;;  %v5511_v14 = vld [vmem:[%s14316_s6 + $0x7e8] sm:$0xff] }
 0x699   :  { %7753 = vmatprep.subr.bf16.mxu0 %v9229_v45  ;;  %v9312_v45 = vcombine.low %v5443_v23, %v5447_v55  ;;  %v5399_v23 = vld [vmem:[%s14316_s6 + $0x468] sm:$0xff]  ;;  %v9375_v55 = vcombine.high %v5506_v37, %v5510_v15  ;;  %v9374_v31 = vcombine.low %v5506_v37, %v5510_v15  ;;  %v5490_v62 = vld [vmem:[%s14316_s6 + $0x740] sm:$0xff] }
 0x69a   :  { %v5450_v37 = vld [vmem:[%s14316_s6 + $0x600] sm:$0xff] }
 0x69b   :  { %v5454_v15 = vld [vmem:[%s14316_s6 + $0x620] sm:$0xff] }
 0x69e   :  { %7715 = vmatpush2.bf16.xpose.msra.mxu1 %v9210_v56  ;;  %v5410_v56 = vld [vmem:[%s14316_s6 + $0x4c0] sm:$0xff] }
 0x69f   :  { %7716 = vmatprep.subr.bf16.mxu1 %v9203_v38  ;;  %v5427_v38 = vld [vmem:[%s14316_s6 + $0x548] sm:$0xff]  ;;  %v9278_v47 = vcombine.low %v5410_v56, %v5414_v41 }
 0x6a0   :  { %7754 = vmatpush2.bf16.xpose.msra.mxu0 %v9228_v43  ;;  %v5431_v43 = vld [vmem:[%s14316_s6 + $0x568] sm:$0xff] }
 0x6a1   :  { %7755 = vmatprep.subr.bf16.mxu0 %v9221_v50  ;;  %v9279_v50 = vcombine.high %v5410_v56, %v5414_v41  ;;  %v9297_v25 = vcombine.high %v5427_v38, %v5431_v43  ;;  %v9296_v21 = vcombine.low %v5427_v38, %v5431_v43  ;;  %v5482_v56 = vld [vmem:[%s14316_s6 + $0x700] sm:$0xff]  ;;  %v5499_v38 = vld [vmem:[%s14316_s6 + $0x788] sm:$0xff] }
 0x6a2   :  { %v5486_v41 = vld [vmem:[%s14316_s6 + $0x720] sm:$0xff]  ;;  %v5503_v43 = vld [vmem:[%s14316_s6 + $0x7a8] sm:$0xff] }
 0x6a6   :  { %7717 = vmatpush2.bf16.xpose.msra.mxu1 %v9202_v54  ;;  %v5402_v54 = vld [vmem:[%s14316_s6 + $0x480] sm:$0xff] }
 0x6a7   :  { %7718 = vmatprep.subr.bf16.mxu1 %v9195_v59  ;;  %v5419_v59 = vld [vmem:[%s14316_s6 + $0x508] sm:$0xff]  ;;  %v9270_v17 = vcombine.low %v5402_v54, %v5406_v39 }
 0x6a8   :  { %7756 = vmatpush2.bf16.xpose.msra.mxu0 %v9220_v61  ;;  %v5423_v61 = vld [vmem:[%s14316_s6 + $0x528] sm:$0xff] }
 0x6a9   :  { %7757 = vmatprep.subr.bf16.mxu0 %v9213_v63  ;;  %v9271_v63 = vcombine.high %v5402_v54, %v5406_v39  ;;  %v9289_v2 = vcombine.high %v5419_v59, %v5423_v61  ;;  %v9288_v5 = vcombine.low %v5419_v59, %v5423_v61  ;;  %v5474_v54 = vld [vmem:[%s14316_s6 + $0x6c0] sm:$0xff]  ;;  %v5491_v59 = vld [vmem:[%s14316_s6 + $0x748] sm:$0xff] }
 0x6aa   :  { %v5478_v39 = vld [vmem:[%s14316_s6 + $0x6e0] sm:$0xff]  ;;  %v5495_v61 = vld [vmem:[%s14316_s6 + $0x768] sm:$0xff] }
 0x6ae   :  { %7719 = vmatpush2.bf16.xpose.msra.mxu1 %v9194_v33  ;;  %v5394_v33 = vld [vmem:[%s14316_s6 + $0x440] sm:$0xff] }
 0x6af   :  { %7774 = vmatprep.subr.bf16.mxu1 %v9311_v29  ;;  %v5411_v29 = vld [vmem:[%s14316_s6 + $0x4c8] sm:$0xff]  ;;  %v9262_v19 = vcombine.low %v5394_v33, %v5398_v34 }
 0x6b0   :  { %7758 = vmatpush2.bf16.xpose.msra.mxu0 %v9212_v51  ;;  %v5415_v51 = vld [vmem:[%s14316_s6 + $0x4e8] sm:$0xff] }
 0x6b1   :  { %7759 = vmatprep.subr.bf16.mxu0 %v9205_v7  ;;  %v9263_v7 = vcombine.high %v5394_v33, %v5398_v34  ;;  %v9281_v58 = vcombine.high %v5411_v29, %v5415_v51  ;;  %v9280_v13 = vcombine.low %v5411_v29, %v5415_v51  ;;  %v5466_v33 = vld [vmem:[%s14316_s6 + $0x680] sm:$0xff]  ;;  %v5483_v29 = vld [vmem:[%s14316_s6 + $0x708] sm:$0xff] }
 0x6b2   :  { %v5470_v34 = vld [vmem:[%s14316_s6 + $0x6a0] sm:$0xff]  ;;  %v5487_v51 = vld [vmem:[%s14316_s6 + $0x728] sm:$0xff] }
 0x6b5   :  { %7721 = vmatmul.mubr.bf16.vlgmr.msra.gmra.mxu1 %v13159_v18 }
 0x6b6   :  { %7775 = vmatpush1.bf16.xpose.msra.mxu1 %v9310_v9  ;;  %7806 = vmatprep.mubr.bf16.mxu1 %v13016_v52  ;;  %v5386_v9 = vld [vmem:[%s14316_s6 + $0x400] sm:$0xff] }
 0x6b7   :  { %7776 = vmatprep.subr.bf16.mxu1 %v9303_v11  ;;  %v5403_v11 = vld [vmem:[%s14316_s6 + $0x488] sm:$0xff]  ;;  %v9254_v16 = vcombine.low %v5386_v9, %v5390_v10 }
 0x6b8   :  { %7760 = vmatpush2.bf16.xpose.msra.mxu0 %v9204_v22  ;;  %v5407_v22 = vld [vmem:[%s14316_s6 + $0x4a8] sm:$0xff] }
 0x6b9   :  { %7761 = vmatprep.subr.bf16.mxu0 %v9197_v12  ;;  %v9255_v12 = vcombine.high %v5386_v9, %v5390_v10  ;;  %v9273_v4 = vcombine.high %v5403_v11, %v5407_v22  ;;  %v9272_v24 = vcombine.low %v5403_v11, %v5407_v22  ;;  %v5458_v9 = vld [vmem:[%s14316_s6 + $0x640] sm:$0xff]  ;;  %v5475_v11 = vld [vmem:[%s14316_s6 + $0x6c8] sm:$0xff] }
 0x6ba   :  { %v5462_v10 = vld [vmem:[%s14316_s6 + $0x660] sm:$0xff]  ;;  %v5479_v22 = vld [vmem:[%s14316_s6 + $0x6e8] sm:$0xff] }
 0x6be   :  { %7777 = vmatpush1.bf16.xpose.msra.mxu1 %v9302_v3  ;;  %v5395_v3 = vld [vmem:[%s14316_s6 + $0x448] sm:$0xff] }
 0x6bf   :  { %7778 = vmatprep.subr.bf16.mxu1 %v9295_v30  ;;  %v9265_v28 = vcombine.high %v5395_v3, %v5399_v23  ;;  %v5498_v30 = vld [vmem:[%s14316_s6 + $0x780] sm:$0xff]  ;;  %v9264_v36 = vcombine.low %v5395_v3, %v5399_v23  ;;  %v5467_v3 = vld [vmem:[%s14316_s6 + $0x688] sm:$0xff] }
 0x6c0   :  { %7762 = vmatpush2.bf16.xpose.msra.mxu0 %v9196_v1  ;;  %v5502_v1 = vld [vmem:[%s14316_s6 + $0x7a0] sm:$0xff]  ;;  %v5471_v23 = vld [vmem:[%s14316_s6 + $0x6a8] sm:$0xff] }
 0x6c1   :  { %7817 = vmatprep.subr.bf16.mxu0 %v9313_v40  ;;  %v5391_v40 = vld [vmem:[%s14316_s6 + $0x428] sm:$0xff]  ;;  %v9367_v35 = vcombine.high %v5498_v30, %v5502_v1  ;;  %v9366_v6 = vcombine.low %v5498_v30, %v5502_v1  ;;  %v5444_v30 = vld [vmem:[%s14316_s6 + $0x5d0] sm:$0xff] }
 0x6c2   :  { %v9257_v49 = vcombine.high %v5387_v60, %v5391_v40  ;;  %v5448_v1 = vld [vmem:[%s14316_s6 + $0x5f0] sm:$0xff] }
 0x6c6   :  { %7779 = vmatpush1.bf16.xpose.msra.mxu1 %v9294_v44  ;;  %v5494_v44 = vld [vmem:[%s14316_s6 + $0x760] sm:$0xff] }
 0x6c7   :  { %7764 = vmatmul.mubr.bf16.vlgmr.msra.gmra.mxu0 %v13511_v46  ;;  %7780 = vmatprep.subr.bf16.mxu1 %v9287_v42  ;;  %v9359_v42 = vcombine.high %v5490_v62, %v5494_v44 }
 0x6c8   :  { %7818 = vmatpush1.bf16.xpose.msra.mxu0 %v9312_v45  ;;  %7849 = vmatprep.mubr.bf16.mxu0 %v13065_v48  ;;  %v9256_v45 = vcombine.low %v5387_v60, %v5391_v40  ;;  %v5459_v60 = vld [vmem:[%s14316_s6 + $0x648] sm:$0xff] }
 0x6c9   :  { %7819 = vmatprep.subr.bf16.mxu0 %v9305_v27  ;;  %v9377_v27 = vcombine.high %v5507_v8, %v5511_v14  ;;  %v5463_v40 = vld [vmem:[%s14316_s6 + $0x668] sm:$0xff] }
 0x6ce   :  { %7781 = vmatpush1.bf16.xpose.msra.mxu1 %v9286_v0  ;;  %v9358_v0 = vcombine.low %v5490_v62, %v5494_v44  ;;  %v5436_v62 = vld [vmem:[%s14316_s6 + $0x590] sm:$0xff] }
 0x6cf   :  { %7782 = vmatprep.subr.bf16.mxu1 %v9279_v50  ;;  %v9351_v50 = vcombine.high %v5482_v56, %v5486_v41  ;;  %v5440_v44 = vld [vmem:[%s14316_s6 + $0x5b0] sm:$0xff] }
 0x6d0   :  { %7820 = vmatpush1.bf16.xpose.msra.mxu0 %v9304_v53  ;;  %v9376_v53 = vcombine.low %v5507_v8, %v5511_v14  ;;  %v5451_v8 = vld [vmem:[%s14316_s6 + $0x608] sm:$0xff] }
 0x6d1   :  { %7821 = vmatprep.subr.bf16.mxu0 %v9297_v25  ;;  %v9369_v25 = vcombine.high %v5499_v38, %v5503_v43  ;;  %v5455_v14 = vld [vmem:[%s14316_s6 + $0x628] sm:$0xff] }
 0x6d6   :  { %7783 = vmatpush1.bf16.xpose.msra.mxu1 %v9278_v47  ;;  %v9350_v47 = vcombine.low %v5482_v56, %v5486_v41  ;;  %v5428_v56 = vld [vmem:[%s14316_s6 + $0x550] sm:$0xff] }
 0x6d7   :  { %7784 = vmatprep.subr.bf16.mxu1 %v9271_v63  ;;  %v9343_v63 = vcombine.high %v5474_v54, %v5478_v39  ;;  %v5432_v41 = vld [vmem:[%s14316_s6 + $0x570] sm:$0xff] }
 0x6d8   :  { %7822 = vmatpush1.bf16.xpose.msra.mxu0 %v9296_v21  ;;  %v9368_v21 = vcombine.low %v5499_v38, %v5503_v43  ;;  %v5445_v38 = vld [vmem:[%s14316_s6 + $0x5d8] sm:$0xff] }
 0x6d9   :  { %7823 = vmatprep.subr.bf16.mxu0 %v9289_v2  ;;  %v9361_v2 = vcombine.high %v5491_v59, %v5495_v61  ;;  %v5449_v43 = vld [vmem:[%s14316_s6 + $0x5f8] sm:$0xff] }
 0x6de   :  { %7785 = vmatpush1.bf16.xpose.msra.mxu1 %v9270_v17  ;;  %v9342_v17 = vcombine.low %v5474_v54, %v5478_v39  ;;  %v5420_v54 = vld [vmem:[%s14316_s6 + $0x510] sm:$0xff] }
 0x6df   :  { %7786 = vmatprep.subr.bf16.mxu1 %v9263_v7  ;;  %v9335_v7 = vcombine.high %v5466_v33, %v5470_v34  ;;  %v5424_v39 = vld [vmem:[%s14316_s6 + $0x530] sm:$0xff] }
 0x6e0   :  { %7824 = vmatpush1.bf16.xpose.msra.mxu0 %v9288_v5  ;;  %v9360_v5 = vcombine.low %v5491_v59, %v5495_v61  ;;  %v5437_v59 = vld [vmem:[%s14316_s6 + $0x598] sm:$0xff] }
 0x6e1   :  { %7825 = vmatprep.subr.bf16.mxu0 %v9281_v58  ;;  %v9353_v58 = vcombine.high %v5483_v29, %v5487_v51  ;;  %v5441_v61 = vld [vmem:[%s14316_s6 + $0x5b8] sm:$0xff] }
 0x6e6   :  { %7787 = vmatpush1.bf16.xpose.msra.mxu1 %v9262_v19  ;;  %v9334_v19 = vcombine.low %v5466_v33, %v5470_v34  ;;  %v5412_v33 = vld [vmem:[%s14316_s6 + $0x4d0] sm:$0xff] }
 0x6e7   :  { %7788 = vmatprep.subr.bf16.mxu1 %v9255_v12  ;;  %v9327_v12 = vcombine.high %v5458_v9, %v5462_v10  ;;  %v5416_v34 = vld [vmem:[%s14316_s6 + $0x4f0] sm:$0xff] }
 0x6e8   :  { %7826 = vmatpush1.bf16.xpose.msra.mxu0 %v9280_v13  ;;  %v9352_v13 = vcombine.low %v5483_v29, %v5487_v51  ;;  %v5429_v29 = vld [vmem:[%s14316_s6 + $0x558] sm:$0xff] }
 0x6e9   :  { %7827 = vmatprep.subr.bf16.mxu0 %v9273_v4  ;;  %v9345_v4 = vcombine.high %v5475_v11, %v5479_v22  ;;  %v5433_v51 = vld [vmem:[%s14316_s6 + $0x578] sm:$0xff] }
 0x6ee   :  { %7789 = vmatpush1.bf16.xpose.msra.mxu1 %v9254_v16  ;;  %v9326_v16 = vcombine.low %v5458_v9, %v5462_v10  ;;  %v5404_v9 = vld [vmem:[%s14316_s6 + $0x490] sm:$0xff] }
 0x6ef   :  { %7790 = vmatprep.subr.bf16.mxu1 %v9375_v55  ;;  %v9319_v55 = vcombine.high %v5450_v37, %v5454_v15  ;;  %v5408_v10 = vld [vmem:[%s14316_s6 + $0x4b0] sm:$0xff] }
 0x6f0   :  { %7828 = vmatpush1.bf16.xpose.msra.mxu0 %v9272_v24  ;;  %v9344_v24 = vcombine.low %v5475_v11, %v5479_v22  ;;  %v5421_v11 = vld [vmem:[%s14316_s6 + $0x518] sm:$0xff] }
 0x6f1   :  { %7829 = vmatprep.subr.bf16.mxu0 %v9265_v28  ;;  %v9337_v28 = vcombine.high %v5467_v3, %v5471_v23  ;;  %v5425_v22 = vld [vmem:[%s14316_s6 + $0x538] sm:$0xff] }
 0x6f6   :  { %7791 = vmatpush2.bf16.xpose.msra.mxu1 %v9374_v31  ;;  %v9318_v31 = vcombine.low %v5450_v37, %v5454_v15  ;;  %v5396_v37 = vld [vmem:[%s14316_s6 + $0x450] sm:$0xff] }
 0x6f7   :  { %7792 = vmatprep.subr.bf16.mxu1 %v9367_v35  ;;  %v9315_v35 = vcombine.high %v5444_v30, %v5448_v1  ;;  %v5400_v15 = vld [vmem:[%s14316_s6 + $0x470] sm:$0xff] }
 0x6f8   :  { %7830 = vmatpush1.bf16.xpose.msra.mxu0 %v9264_v36  ;;  %v9336_v36 = vcombine.low %v5467_v3, %v5471_v23  ;;  %v5413_v3 = vld [vmem:[%s14316_s6 + $0x4d8] sm:$0xff] }
 0x6f9   :  { %7831 = vmatprep.subr.bf16.mxu0 %v9257_v49  ;;  %v9329_v49 = vcombine.high %v5459_v60, %v5463_v40  ;;  %v5417_v23 = vld [vmem:[%s14316_s6 + $0x4f8] sm:$0xff] }
 0x6fe   :  { %7793 = vmatpush2.bf16.xpose.msra.mxu1 %v9366_v6  ;;  %v9314_v6 = vcombine.low %v5444_v30, %v5448_v1  ;;  %v5388_v30 = vld [vmem:[%s14316_s6 + $0x410] sm:$0xff] }
 0x6ff   :  { %7794 = vmatprep.subr.bf16.mxu1 %v9359_v42  ;;  %v9307_v42 = vcombine.high %v5436_v62, %v5440_v44  ;;  %v5392_v1 = vld [vmem:[%s14316_s6 + $0x430] sm:$0xff] }
 0x700   :  { %7832 = vmatpush1.bf16.xpose.msra.mxu0 %v9256_v45  ;;  %v9328_v45 = vcombine.low %v5459_v60, %v5463_v40  ;;  %v5405_v60 = vld [vmem:[%s14316_s6 + $0x498] sm:$0xff] }
 0x701   :  { %7833 = vmatprep.subr.bf16.mxu0 %v9377_v27  ;;  %v9321_v27 = vcombine.high %v5451_v8, %v5455_v14  ;;  %v5409_v40 = vld [vmem:[%s14316_s6 + $0x4b8] sm:$0xff] }
 0x706   :  { %7795 = vmatpush2.bf16.xpose.msra.mxu1 %v9358_v0  ;;  %v9306_v0 = vcombine.low %v5436_v62, %v5440_v44  ;;  %v5508_v62 = vld [vmem:[%s14316_s6 + $0x7d0] sm:$0xff] }
 0x707   :  { %7796 = vmatprep.subr.bf16.mxu1 %v9351_v50  ;;  %v9299_v50 = vcombine.high %v5428_v56, %v5432_v41  ;;  %v5512_v44 = vld [vmem:[%s14316_s6 + $0x7f0] sm:$0xff] }
 0x708   :  { %7834 = vmatpush2.bf16.xpose.msra.mxu0 %v9376_v53  ;;  %v9320_v53 = vcombine.low %v5451_v8, %v5455_v14  ;;  %v5397_v8 = vld [vmem:[%s14316_s6 + $0x458] sm:$0xff] }
 0x709   :  { %7835 = vmatprep.subr.bf16.mxu0 %v9369_v25  ;;  %v9317_v25 = vcombine.high %v5445_v38, %v5449_v43  ;;  %v5401_v14 = vld [vmem:[%s14316_s6 + $0x478] sm:$0xff] }
 0x70e   :  { %7797 = vmatpush2.bf16.xpose.msra.mxu1 %v9350_v47  ;;  %v9298_v47 = vcombine.low %v5428_v56, %v5432_v41  ;;  %v5500_v56 = vld [vmem:[%s14316_s6 + $0x790] sm:$0xff] }
 0x70f   :  { %7798 = vmatprep.subr.bf16.mxu1 %v9343_v63  ;;  %v9291_v63 = vcombine.high %v5420_v54, %v5424_v39  ;;  %v5504_v41 = vld [vmem:[%s14316_s6 + $0x7b0] sm:$0xff] }
 0x710   :  { %7836 = vmatpush2.bf16.xpose.msra.mxu0 %v9368_v21  ;;  %v9316_v21 = vcombine.low %v5445_v38, %v5449_v43  ;;  %v5389_v38 = vld [vmem:[%s14316_s6 + $0x418] sm:$0xff] }
 0x711   :  { %7837 = vmatprep.subr.bf16.mxu0 %v9361_v2  ;;  %v9309_v2 = vcombine.high %v5437_v59, %v5441_v61  ;;  %v5393_v43 = vld [vmem:[%s14316_s6 + $0x438] sm:$0xff] }
 0x716   :  { %7799 = vmatpush2.bf16.xpose.msra.mxu1 %v9342_v17  ;;  %v9290_v17 = vcombine.low %v5420_v54, %v5424_v39  ;;  %v5492_v54 = vld [vmem:[%s14316_s6 + $0x750] sm:$0xff] }
 0x717   :  { %7800 = vmatprep.subr.bf16.mxu1 %v9335_v7  ;;  %v9283_v7 = vcombine.high %v5412_v33, %v5416_v34  ;;  %v5496_v39 = vld [vmem:[%s14316_s6 + $0x770] sm:$0xff] }
 0x718   :  { %7838 = vmatpush2.bf16.xpose.msra.mxu0 %v9360_v5  ;;  %v9308_v5 = vcombine.low %v5437_v59, %v5441_v61  ;;  %v5509_v59 = vld [vmem:[%s14316_s6 + $0x7d8] sm:$0xff] }
 0x719   :  { %7839 = vmatprep.subr.bf16.mxu0 %v9353_v58  ;;  %v9301_v58 = vcombine.high %v5429_v29, %v5433_v51  ;;  %v5513_v61 = vld [vmem:[%s14316_s6 + $0x7f8] sm:$0xff] }
 0x71e   :  { %7801 = vmatpush2.bf16.xpose.msra.mxu1 %v9334_v19  ;;  %v9282_v19 = vcombine.low %v5412_v33, %v5416_v34  ;;  %v5484_v33 = vld [vmem:[%s14316_s6 + $0x710] sm:$0xff] }
 0x71f   :  { %7802 = vmatprep.subr.bf16.mxu1 %v9327_v12  ;;  %v9275_v12 = vcombine.high %v5404_v9, %v5408_v10  ;;  %v5488_v34 = vld [vmem:[%s14316_s6 + $0x730] sm:$0xff] }
 0x720   :  { %7840 = vmatpush2.bf16.xpose.msra.mxu0 %v9352_v13  ;;  %v9300_v13 = vcombine.low %v5429_v29, %v5433_v51  ;;  %v5501_v29 = vld [vmem:[%s14316_s6 + $0x798] sm:$0xff] }
 0x721   :  { %7841 = vmatprep.subr.bf16.mxu0 %v9345_v4  ;;  %v9293_v4 = vcombine.high %v5421_v11, %v5425_v22  ;;  %v5505_v51 = vld [vmem:[%s14316_s6 + $0x7b8] sm:$0xff] }
 0x726   :  { %7803 = vmatpush2.bf16.xpose.msra.mxu1 %v9326_v16  ;;  %v9274_v16 = vcombine.low %v5404_v9, %v5408_v10  ;;  %v5476_v9 = vld [vmem:[%s14316_s6 + $0x6d0] sm:$0xff] }
 0x727   :  { %7804 = vmatprep.subr.bf16.mxu1 %v9319_v55  ;;  %v9267_v55 = vcombine.high %v5396_v37, %v5400_v15  ;;  %v5480_v10 = vld [vmem:[%s14316_s6 + $0x6f0] sm:$0xff] }
 0x728   :  { %7842 = vmatpush2.bf16.xpose.msra.mxu0 %v9344_v24  ;;  %v9292_v24 = vcombine.low %v5421_v11, %v5425_v22  ;;  %v5493_v11 = vld [vmem:[%s14316_s6 + $0x758] sm:$0xff] }
 0x729   :  { %7843 = vmatprep.subr.bf16.mxu0 %v9337_v28  ;;  %v9285_v28 = vcombine.high %v5413_v3, %v5417_v23  ;;  %v5497_v22 = vld [vmem:[%s14316_s6 + $0x778] sm:$0xff] }
 0x72e   :  { %7805 = vmatpush2.bf16.xpose.msra.mxu1 %v9318_v31  ;;  %v9266_v31 = vcombine.low %v5396_v37, %v5400_v15  ;;  %v5468_v37 = vld [vmem:[%s14316_s6 + $0x690] sm:$0xff] }
 0x72f   :  { %7860 = vmatprep.subr.bf16.mxu1 %v9315_v35  ;;  %v9259_v35 = vcombine.high %v5388_v30, %v5392_v1  ;;  %v5472_v15 = vld [vmem:[%s14316_s6 + $0x6b0] sm:$0xff] }
 0x730   :  { %7844 = vmatpush2.bf16.xpose.msra.mxu0 %v9336_v36  ;;  %v9284_v36 = vcombine.low %v5413_v3, %v5417_v23  ;;  %v5485_v3 = vld [vmem:[%s14316_s6 + $0x718] sm:$0xff] }
 0x731   :  { %7845 = vmatprep.subr.bf16.mxu0 %v9329_v49  ;;  %v9277_v49 = vcombine.high %v5405_v60, %v5409_v40  ;;  %v5489_v23 = vld [vmem:[%s14316_s6 + $0x738] sm:$0xff] }
 0x735   :  { %7807 = vmatmul.mubr.bf16.vlgmr.msra.gmra.mxu1 %v12491_v57 }
 0x736   :  { %7861 = vmatpush1.bf16.xpose.msra.mxu1 %v9314_v6  ;;  %7892 = vmatprep.mubr.bf16.mxu1 %v13255_v32  ;;  %v9258_v6 = vcombine.low %v5388_v30, %v5392_v1  ;;  %v5460_v30 = vld [vmem:[%s14316_s6 + $0x650] sm:$0xff] }
 0x737   :  { %7862 = vmatprep.subr.bf16.mxu1 %v9307_v42  ;;  %v9379_v42 = vcombine.high %v5508_v62, %v5512_v44  ;;  %v5464_v1 = vld [vmem:[%s14316_s6 + $0x670] sm:$0xff] }
 0x738   :  { %7846 = vmatpush2.bf16.xpose.msra.mxu0 %v9328_v45  ;;  %v9276_v45 = vcombine.low %v5405_v60, %v5409_v40  ;;  %v5477_v60 = vld [vmem:[%s14316_s6 + $0x6d8] sm:$0xff] }
 0x739   :  { %7847 = vmatprep.subr.bf16.mxu0 %v9321_v27  ;;  %v9269_v27 = vcombine.high %v5397_v8, %v5401_v14  ;;  %v5481_v40 = vld [vmem:[%s14316_s6 + $0x6f8] sm:$0xff] }
 0x73e   :  { %7863 = vmatpush1.bf16.xpose.msra.mxu1 %v9306_v0  ;;  %v9378_v0 = vcombine.low %v5508_v62, %v5512_v44  ;;  %v5452_v62 = vld [vmem:[%s14316_s6 + $0x610] sm:$0xff] }
 0x73f   :  { %7864 = vmatprep.subr.bf16.mxu1 %v9299_v50  ;;  %v9371_v50 = vcombine.high %v5500_v56, %v5504_v41  ;;  %v5456_v44 = vld [vmem:[%s14316_s6 + $0x630] sm:$0xff] }
 0x740   :  { %7848 = vmatpush2.bf16.xpose.msra.mxu0 %v9320_v53  ;;  %v9268_v53 = vcombine.low %v5397_v8, %v5401_v14  ;;  %v5469_v8 = vld [vmem:[%s14316_s6 + $0x698] sm:$0xff] }
 0x741   :  { %7903 = vmatprep.subr.bf16.mxu0 %v9317_v25  ;;  %v9261_v25 = vcombine.high %v5389_v38, %v5393_v43  ;;  %v5473_v14 = vld [vmem:[%s14316_s6 + $0x6b8] sm:$0xff] }
 0x746   :  { %7865 = vmatpush1.bf16.xpose.msra.mxu1 %v9298_v47  ;;  %v9370_v47 = vcombine.low %v5500_v56, %v5504_v41  ;;  %v5570_v56 = vld [vmem:[%s14316_s6 + $0x9c0] sm:$0xff] }
 0x747   :  { %7850 = vmatmul.mubr.bf16.vlgmr.msra.gmra.mxu0 %v12731_v20  ;;  %7866 = vmatprep.subr.bf16.mxu1 %v9291_v63  ;;  %v9363_v63 = vcombine.high %v5492_v54, %v5496_v39  ;;  %v5574_v41 = vld [vmem:[%s14316_s6 + $0x9e0] sm:$0xff] }
 0x748   :  { %7904 = vmatpush1.bf16.xpose.msra.mxu0 %v9316_v21  ;;  %7935 = vmatprep.mubr.bf16.mxu0 %v13416_v26  ;;  %v9260_v21 = vcombine.low %v5389_v38, %v5393_v43  ;;  %v5461_v38 = vld [vmem:[%s14316_s6 + $0x658] sm:$0xff] }
 0x749   :  { %7905 = vmatprep.subr.bf16.mxu0 %v9309_v2  ;;  %v9381_v2 = vcombine.high %v5509_v59, %v5513_v61  ;;  %v5465_v43 = vld [vmem:[%s14316_s6 + $0x678] sm:$0xff] }
 0x74e   :  { %7867 = vmatpush1.bf16.xpose.msra.mxu1 %v9290_v17  ;;  %v9362_v17 = vcombine.low %v5492_v54, %v5496_v39  ;;  %v5562_v54 = vld [vmem:[%s14316_s6 + $0x980] sm:$0xff] }
 0x74f   :  { %7868 = vmatprep.subr.bf16.mxu1 %v9283_v7  ;;  %v9355_v7 = vcombine.high %v5484_v33, %v5488_v34  ;;  %v5566_v39 = vld [vmem:[%s14316_s6 + $0x9a0] sm:$0xff] }
 0x750   :  { %7906 = vmatpush1.bf16.xpose.msra.mxu0 %v9308_v5  ;;  %v9380_v5 = vcombine.low %v5509_v59, %v5513_v61  ;;  %v5453_v59 = vld [vmem:[%s14316_s6 + $0x618] sm:$0xff] }
 0x751   :  { %7907 = vmatprep.subr.bf16.mxu0 %v9301_v58  ;;  %v9373_v58 = vcombine.high %v5501_v29, %v5505_v51  ;;  %v5457_v61 = vld [vmem:[%s14316_s6 + $0x638] sm:$0xff] }
 0x756   :  { %7869 = vmatpush1.bf16.xpose.msra.mxu1 %v9282_v19  ;;  %v9354_v19 = vcombine.low %v5484_v33, %v5488_v34  ;;  %v5554_v33 = vld [vmem:[%s14316_s6 + $0x940] sm:$0xff] }
 0x757   :  { %7870 = vmatprep.subr.bf16.mxu1 %v9275_v12  ;;  %v9347_v12 = vcombine.high %v5476_v9, %v5480_v10  ;;  %v5558_v34 = vld [vmem:[%s14316_s6 + $0x960] sm:$0xff] }
 0x758   :  { %7908 = vmatpush1.bf16.xpose.msra.mxu0 %v9300_v13  ;;  %v9372_v13 = vcombine.low %v5501_v29, %v5505_v51  ;;  %v5571_v29 = vld [vmem:[%s14316_s6 + $0x9c8] sm:$0xff]  ;;  %v9423_v51 = vcombine.high %v5554_v33, %v5558_v34 }
 0x759   :  { %7909 = vmatprep.subr.bf16.mxu0 %v9293_v4  ;;  %v9365_v4 = vcombine.high %v5493_v11, %v5497_v22 }
 0x75e   :  { %7871 = vmatpush1.bf16.xpose.msra.mxu1 %v9274_v16  ;;  %v9346_v16 = vcombine.low %v5476_v9, %v5480_v10  ;;  %v5550_v9 = vld [vmem:[%s14316_s6 + $0x920] sm:$0xff]  ;;  %v9422_v10 = vcombine.low %v5554_v33, %v5558_v34  ;;  %v5515_v34 = vld [vmem:[%s14316_s6 + $0x808] sm:$0xff] }
 0x75f   :  { %7872 = vmatprep.subr.bf16.mxu1 %v9267_v55  ;;  %v9339_v55 = vcombine.high %v5468_v37, %v5472_v15 }
 0x760   :  { %7910 = vmatpush1.bf16.xpose.msra.mxu0 %v9292_v24  ;;  %v9364_v24 = vcombine.low %v5493_v11, %v5497_v22  ;;  %v5567_v11 = vld [vmem:[%s14316_s6 + $0x9a8] sm:$0xff] }
 0x761   :  { %7911 = vmatprep.subr.bf16.mxu0 %v9285_v28  ;;  %v9357_v28 = vcombine.high %v5485_v3, %v5489_v23 }
 0x766   :  { %7873 = vmatpush1.bf16.xpose.msra.mxu1 %v9266_v31  ;;  %v9338_v31 = vcombine.low %v5468_v37, %v5472_v15  ;;  %v5542_v37 = vld [vmem:[%s14316_s6 + $0x8e0] sm:$0xff] }
 0x767   :  { %7874 = vmatprep.subr.bf16.mxu1 %v9259_v35  ;;  %v9331_v35 = vcombine.high %v5460_v30, %v5464_v1 }
 0x768   :  { %7912 = vmatpush1.bf16.xpose.msra.mxu0 %v9284_v36  ;;  %v9356_v36 = vcombine.low %v5485_v3, %v5489_v23  ;;  %v5559_v3 = vld [vmem:[%s14316_s6 + $0x968] sm:$0xff] }
 0x769   :  { %7913 = vmatprep.subr.bf16.mxu0 %v9277_v49  ;;  %v9349_v49 = vcombine.high %v5477_v60, %v5481_v40 }
 0x76e   :  { %7875 = vmatpush1.bf16.xpose.msra.mxu1 %v9258_v6  ;;  %v9330_v6 = vcombine.low %v5460_v30, %v5464_v1  ;;  %v5547_v1 = vld [vmem:[%s14316_s6 + $0x908] sm:$0xff] }
 0x76f   :  { %7876 = vmatprep.subr.bf16.mxu1 %v9379_v42  ;;  %v9323_v42 = vcombine.high %v5452_v62, %v5456_v44 }
 0x770   :  { %7914 = vmatpush1.bf16.xpose.msra.mxu0 %v9276_v45  ;;  %v9348_v45 = vcombine.low %v5477_v60, %v5481_v40 }
 0x771   :  { %7915 = vmatprep.subr.bf16.mxu0 %v9269_v27  ;;  %v9341_v27 = vcombine.high %v5469_v8, %v5473_v14 }
 0x776   :  { %7877 = vmatpush2.bf16.xpose.msra.mxu1 %v9378_v0  ;;  %v9322_v0 = vcombine.low %v5452_v62, %v5456_v44  ;;  %v5539_v44 = vld [vmem:[%s14316_s6 + $0x8c8] sm:$0xff] }
 0x777   :  { %7878 = vmatprep.subr.bf16.mxu1 %v9371_v50  ;;  %v9439_v50 = vcombine.high %v5570_v56, %v5574_v41 }
 0x778   :  { %7916 = vmatpush1.bf16.xpose.msra.mxu0 %v9268_v53  ;;  %v9340_v53 = vcombine.low %v5469_v8, %v5473_v14 }
 0x779   :  { %7917 = vmatprep.subr.bf16.mxu0 %v9261_v25  ;;  %v9333_v25 = vcombine.high %v5461_v38, %v5465_v43 }
 0x77e   :  { %7879 = vmatpush2.bf16.xpose.msra.mxu1 %v9370_v47  ;;  %v9438_v47 = vcombine.low %v5570_v56, %v5574_v41  ;;  %v5531_v41 = vld [vmem:[%s14316_s6 + $0x888] sm:$0xff] }
 0x77f   :  { %7880 = vmatprep.subr.bf16.mxu1 %v9363_v63  ;;  %v9431_v63 = vcombine.high %v5562_v54, %v5566_v39 }
 0x780   :  { %7918 = vmatpush1.bf16.xpose.msra.mxu0 %v9260_v21  ;;  %v9332_v21 = vcombine.low %v5461_v38, %v5465_v43 }
 0x781   :  { %7919 = vmatprep.subr.bf16.mxu0 %v9381_v2  ;;  %v9325_v2 = vcombine.high %v5453_v59, %v5457_v61 }
 0x786   :  { %7881 = vmatpush2.bf16.xpose.msra.mxu1 %v9362_v17  ;;  %v9430_v17 = vcombine.low %v5562_v54, %v5566_v39  ;;  %v5523_v39 = vld [vmem:[%s14316_s6 + $0x848] sm:$0xff] }
 0x787   :  { %7882 = vmatprep.subr.bf16.mxu1 %v9355_v7  ;;  %v9324_v7 = vcombine.low %v5453_v59, %v5457_v61 }
 0x788   :  { %7920 = vmatpush2.bf16.xpose.msra.mxu0 %v9380_v5 }
 0x789   :  { %7921 = vmatprep.subr.bf16.mxu0 %v9373_v58  ;;  %v5546_v58 = vld [vmem:[%s14316_s6 + $0x900] sm:$0xff] }
 0x78a   :  { %v9415_v22 = vcombine.high %v5546_v58, %v5550_v9  ;;  %v9414_v15 = vcombine.low %v5546_v58, %v5550_v9  ;;  %v5635_v9 = vld [vmem:[%s14316_s6 + $0xbc8] sm:$0xff] }
 0x78e   :  { %7883 = vmatpush2.bf16.xpose.msra.mxu1 %v9354_v19  ;;  %v5563_v19 = vld [vmem:[%s14316_s6 + $0x988] sm:$0xff] }
 0x78f   :  { %7884 = vmatprep.subr.bf16.mxu1 %v9347_v12 }
 0x790   :  { %7922 = vmatpush2.bf16.xpose.msra.mxu0 %v9372_v13  ;;  %v9433_v13 = vcombine.high %v5563_v19, %v5567_v11 }
 0x791   :  { %7923 = vmatprep.subr.bf16.mxu0 %v9365_v4  ;;  %v5538_v4 = vld [vmem:[%s14316_s6 + $0x8c0] sm:$0xff] }
 0x792   :  { %v9407_v23 = vcombine.high %v5538_v4, %v5542_v37  ;;  %v9406_v30 = vcombine.low %v5538_v4, %v5542_v37  ;;  %v5627_v37 = vld [vmem:[%s14316_s6 + $0xb88] sm:$0xff] }
 0x796   :  { %7885 = vmatpush2.bf16.xpose.msra.mxu1 %v9346_v16  ;;  %v5555_v16 = vld [vmem:[%s14316_s6 + $0x948] sm:$0xff] }
 0x797   :  { %7886 = vmatprep.subr.bf16.mxu1 %v9339_v55  ;;  %v9425_v55 = vcombine.high %v5555_v16, %v5559_v3  ;;  %v9424_v40 = vcombine.low %v5555_v16, %v5559_v3 }
 0x798   :  { %7924 = vmatpush2.bf16.xpose.msra.mxu0 %v9364_v24  ;;  %v5530_v24 = vld [vmem:[%s14316_s6 + $0x880] sm:$0xff] }
 0x799   :  { %7925 = vmatprep.subr.bf16.mxu0 %v9357_v28  ;;  %v5534_v28 = vld [vmem:[%s14316_s6 + $0x8a0] sm:$0xff] }
 0x79a   :  { %v9399_v60 = vcombine.high %v5530_v24, %v5534_v28  ;;  %v9398_v62 = vcombine.low %v5530_v24, %v5534_v28  ;;  %v5619_v28 = vld [vmem:[%s14316_s6 + $0xb48] sm:$0xff] }
 0x79e   :  { %7887 = vmatpush2.bf16.xpose.msra.mxu1 %v9338_v31  ;;  %v5551_v31 = vld [vmem:[%s14316_s6 + $0x928] sm:$0xff] }
 0x79f   :  { %7888 = vmatprep.subr.bf16.mxu1 %v9331_v35  ;;  %v9417_v35 = vcombine.high %v5547_v1, %v5551_v31  ;;  %v9416_v14 = vcombine.low %v5547_v1, %v5551_v31 }
 0x7a0   :  { %7926 = vmatpush2.bf16.xpose.msra.mxu0 %v9356_v36  ;;  %v5522_v36 = vld [vmem:[%s14316_s6 + $0x840] sm:$0xff] }
 0x7a1   :  { %7927 = vmatprep.subr.bf16.mxu0 %v9349_v49  ;;  %v5526_v49 = vld [vmem:[%s14316_s6 + $0x860] sm:$0xff] }
 0x7a2   :  { %v9391_v8 = vcombine.high %v5522_v36, %v5526_v49  ;;  %v9390_v56 = vcombine.low %v5522_v36, %v5526_v49  ;;  %v5611_v49 = vld [vmem:[%s14316_s6 + $0xb08] sm:$0xff] }
 0x7a6   :  { %7889 = vmatpush2.bf16.xpose.msra.mxu1 %v9330_v6  ;;  %v5543_v6 = vld [vmem:[%s14316_s6 + $0x8e8] sm:$0xff] }
 0x7a7   :  { %7890 = vmatprep.subr.bf16.mxu1 %v9323_v42  ;;  %v9409_v42 = vcombine.high %v5539_v44, %v5543_v6  ;;  %v9408_v43 = vcombine.low %v5539_v44, %v5543_v6 }
 0x7a8   :  { %7928 = vmatpush2.bf16.xpose.msra.mxu0 %v9348_v45  ;;  %v5514_v45 = vld [vmem:[%s14316_s6 + $0x800] sm:$0xff] }
 0x7a9   :  { %7929 = vmatprep.subr.bf16.mxu0 %v9341_v27  ;;  %v5518_v27 = vld [vmem:[%s14316_s6 + $0x820] sm:$0xff] }
 0x7aa   :  { %v9383_v38 = vcombine.high %v5514_v45, %v5518_v27  ;;  %v9382_v54 = vcombine.low %v5514_v45, %v5518_v27  ;;  %v5603_v27 = vld [vmem:[%s14316_s6 + $0xac8] sm:$0xff] }
 0x7ae   :  { %7891 = vmatpush2.bf16.xpose.msra.mxu1 %v9322_v0  ;;  %v5535_v0 = vld [vmem:[%s14316_s6 + $0x8a8] sm:$0xff] }
 0x7af   :  { %7946 = vmatprep.subr.bf16.mxu1 %v9439_v50  ;;  %v9401_v50 = vcombine.high %v5531_v41, %v5535_v0  ;;  %v9400_v61 = vcombine.low %v5531_v41, %v5535_v0 }
 0x7b0   :  { %7930 = vmatpush2.bf16.xpose.msra.mxu0 %v9340_v53  ;;  %v5634_v53 = vld [vmem:[%s14316_s6 + $0xbc0] sm:$0xff] }
 0x7b1   :  { %7931 = vmatprep.subr.bf16.mxu0 %v9333_v25  ;;  %v5638_v25 = vld [vmem:[%s14316_s6 + $0xbe0] sm:$0xff] }
 0x7b2   :  { %v9503_v59 = vcombine.high %v5634_v53, %v5638_v25  ;;  %v9502_v33 = vcombine.low %v5634_v53, %v5638_v25  ;;  %v5595_v25 = vld [vmem:[%s14316_s6 + $0xa88] sm:$0xff] }
 0x7b5   :  { %7893 = vmatmul.mubr.bf16.vlgmr.msra.gmra.mxu1 %v13159_v18 }
 0x7b6   :  { %7947 = vmatpush1.bf16.xpose.msra.mxu1 %v9438_v47  ;;  %7978 = vmatprep.mubr.bf16.mxu1 %v13016_v52  ;;  %v5575_v52 = vld [vmem:[%s14316_s6 + $0x9e8] sm:$0xff] }
 0x7b7   :  { %7948 = vmatprep.subr.bf16.mxu1 %v9431_v63  ;;  %v9441_v5 = vcombine.high %v5571_v29, %v5575_v52  ;;  %v9440_v12 = vcombine.low %v5571_v29, %v5575_v52  ;;  %v5527_v47 = vld [vmem:[%s14316_s6 + $0x868] sm:$0xff] }
 0x7b8   :  { %7932 = vmatpush2.bf16.xpose.msra.mxu0 %v9332_v21  ;;  %v9393_v63 = vcombine.high %v5523_v39, %v5527_v47  ;;  %v5626_v21 = vld [vmem:[%s14316_s6 + $0xb80] sm:$0xff]  ;;  %v9392_v52 = vcombine.low %v5523_v39, %v5527_v47 }
 0x7b9   :  { %7933 = vmatprep.subr.bf16.mxu0 %v9325_v2  ;;  %v5630_v2 = vld [vmem:[%s14316_s6 + $0xba0] sm:$0xff] }
 0x7ba   :  { %v9495_v29 = vcombine.high %v5626_v21, %v5630_v2  ;;  %v9494_v58 = vcombine.low %v5626_v21, %v5630_v2  ;;  %v5587_v2 = vld [vmem:[%s14316_s6 + $0xa48] sm:$0xff] }
 0x7be   :  { %7949 = vmatpush1.bf16.xpose.msra.mxu1 %v9430_v17  ;;  %v5519_v17 = vld [vmem:[%s14316_s6 + $0x828] sm:$0xff] }
 0x7bf   :  { %7950 = vmatprep.subr.bf16.mxu1 %v9423_v51  ;;  %v9385_v51 = vcombine.high %v5515_v34, %v5519_v17 }
 0x7c0   :  { %7934 = vmatpush2.bf16.xpose.msra.mxu0 %v9324_v7  ;;  %v5618_v7 = vld [vmem:[%s14316_s6 + $0xb40] sm:$0xff] }
 0x7c1   :  { %7989 = vmatprep.subr.bf16.mxu0 %v9441_v5  ;;  %v5622_v5 = vld [vmem:[%s14316_s6 + $0xb60] sm:$0xff] }
 0x7c2   :  { %v9486_v4 = vcombine.low %v5618_v7, %v5622_v5 }
 0x7c6   :  { %7951 = vmatpush1.bf16.xpose.msra.mxu1 %v9422_v10  ;;  %v5639_v10 = vld [vmem:[%s14316_s6 + $0xbe8] sm:$0xff] }
 0x7c7   :  { %7936 = vmatmul.mubr.bf16.vlgmr.msra.gmra.mxu0 %v13511_v46  ;;  %7952 = vmatprep.subr.bf16.mxu1 %v9415_v22  ;;  %v9505_v22 = vcombine.high %v5635_v9, %v5639_v10  ;;  %v9504_v3 = vcombine.low %v5635_v9, %v5639_v10 }
 0x7c8   :  { %7990 = vmatpush1.bf16.xpose.msra.mxu0 %v9440_v12  ;;  %8021 = vmatprep.mubr.bf16.mxu0 %v13065_v48  ;;  %v9432_v48 = vcombine.low %v5563_v19, %v5567_v11  ;;  %v9487_v19 = vcombine.high %v5618_v7, %v5622_v5  ;;  %v9384_v11 = vcombine.low %v5515_v34, %v5519_v17  ;;  %v5610_v12 = vld [vmem:[%s14316_s6 + $0xb00] sm:$0xff]  ;;  %v5579_v5 = vld [vmem:[%s14316_s6 + $0xa08] sm:$0xff] }
 0x7c9   :  { %7991 = vmatprep.subr.bf16.mxu0 %v9433_v13  ;;  %v5614_v13 = vld [vmem:[%s14316_s6 + $0xb20] sm:$0xff] }
 0x7ca   :  { %v9479_v16 = vcombine.high %v5610_v12, %v5614_v13  ;;  %v9478_v24 = vcombine.low %v5610_v12, %v5614_v13 }
 0x7ce   :  { %7953 = vmatpush1.bf16.xpose.msra.mxu1 %v9414_v15  ;;  %v5631_v15 = vld [vmem:[%s14316_s6 + $0xba8] sm:$0xff] }
 0x7cf   :  { %7954 = vmatprep.subr.bf16.mxu1 %v9407_v23  ;;  %v9497_v23 = vcombine.high %v5627_v37, %v5631_v15  ;;  %v9496_v31 = vcombine.low %v5627_v37, %v5631_v15  ;;  %v5548_v15 = vld [vmem:[%s14316_s6 + $0x910] sm:$0xff] }
 0x7d0   :  { %7992 = vmatpush1.bf16.xpose.msra.mxu0 %v9432_v48  ;;  %v5602_v48 = vld [vmem:[%s14316_s6 + $0xac0] sm:$0xff] }
 0x7d1   :  { %7993 = vmatprep.subr.bf16.mxu0 %v9425_v55  ;;  %v5606_v55 = vld [vmem:[%s14316_s6 + $0xae0] sm:$0xff] }
 0x7d2   :  { %v9471_v1 = vcombine.high %v5602_v48, %v5606_v55  ;;  %v9470_v36 = vcombine.low %v5602_v48, %v5606_v55  ;;  %v5569_v48 = vld [vmem:[%s14316_s6 + $0x9b8] sm:$0xff] }
 0x7d6   :  { %7955 = vmatpush1.bf16.xpose.msra.mxu1 %v9406_v30  ;;  %v5623_v30 = vld [vmem:[%s14316_s6 + $0xb68] sm:$0xff] }
 0x7d7   :  { %7956 = vmatprep.subr.bf16.mxu1 %v9399_v60  ;;  %v9489_v60 = vcombine.high %v5619_v28, %v5623_v30  ;;  %v9488_v6 = vcombine.low %v5619_v28, %v5623_v30  ;;  %v5540_v30 = vld [vmem:[%s14316_s6 + $0x8d0] sm:$0xff] }
 0x7d8   :  { %7994 = vmatpush1.bf16.xpose.msra.mxu0 %v9424_v40  ;;  %v5594_v40 = vld [vmem:[%s14316_s6 + $0xa80] sm:$0xff] }
 0x7d9   :  { %7995 = vmatprep.subr.bf16.mxu0 %v9417_v35  ;;  %v5598_v35 = vld [vmem:[%s14316_s6 + $0xaa0] sm:$0xff] }
 0x7da   :  { %v9463_v44 = vcombine.high %v5594_v40, %v5598_v35  ;;  %v9462_v45 = vcombine.low %v5594_v40, %v5598_v35 }
 0x7de   :  { %7957 = vmatpush1.bf16.xpose.msra.mxu1 %v9398_v62  ;;  %v5615_v62 = vld [vmem:[%s14316_s6 + $0xb28] sm:$0xff] }
 0x7df   :  { %7958 = vmatprep.subr.bf16.mxu1 %v9391_v8  ;;  %v9481_v8 = vcombine.high %v5611_v49, %v5615_v62  ;;  %v9480_v0 = vcombine.low %v5611_v49, %v5615_v62  ;;  %v5536_v49 = vld [vmem:[%s14316_s6 + $0x8b0] sm:$0xff] }
 0x7e0   :  { %7996 = vmatpush1.bf16.xpose.msra.mxu0 %v9416_v14  ;;  %v5586_v14 = vld [vmem:[%s14316_s6 + $0xa40] sm:$0xff] }
 0x7e1   :  { %7997 = vmatprep.subr.bf16.mxu0 %v9409_v42  ;;  %v5590_v42 = vld [vmem:[%s14316_s6 + $0xa60] sm:$0xff] }
 0x7e2   :  { %v9455_v41 = vcombine.high %v5586_v14, %v5590_v42  ;;  %v9454_v53 = vcombine.low %v5586_v14, %v5590_v42 }
 0x7e6   :  { %7959 = vmatpush1.bf16.xpose.msra.mxu1 %v9390_v56  ;;  %v5607_v56 = vld [vmem:[%s14316_s6 + $0xae8] sm:$0xff] }
 0x7e7   :  { %7960 = vmatprep.subr.bf16.mxu1 %v9383_v38  ;;  %v9473_v38 = vcombine.high %v5603_v27, %v5607_v56  ;;  %v9472_v47 = vcombine.low %v5603_v27, %v5607_v56  ;;  %v5528_v27 = vld [vmem:[%s14316_s6 + $0x870] sm:$0xff] }
 0x7e8   :  { %7998 = vmatpush1.bf16.xpose.msra.mxu0 %v9408_v43  ;;  %v5578_v43 = vld [vmem:[%s14316_s6 + $0xa00] sm:$0xff] }
 0x7e9   :  { %7999 = vmatprep.subr.bf16.mxu0 %v9401_v50  ;;  %v5582_v50 = vld [vmem:[%s14316_s6 + $0xa20] sm:$0xff] }
 0x7ea   :  { %v9447_v39 = vcombine.high %v5578_v43, %v5582_v50  ;;  %v9446_v21 = vcombine.low %v5578_v43, %v5582_v50 }
 0x7ee   :  { %7961 = vmatpush1.bf16.xpose.msra.mxu1 %v9382_v54  ;;  %v5599_v54 = vld [vmem:[%s14316_s6 + $0xaa8] sm:$0xff] }
 0x7ef   :  { %7962 = vmatprep.subr.bf16.mxu1 %v9503_v59  ;;  %v9465_v59 = vcombine.high %v5595_v25, %v5599_v54  ;;  %v9464_v17 = vcombine.low %v5595_v25, %v5599_v54  ;;  %v5520_v25 = vld [vmem:[%s14316_s6 + $0x830] sm:$0xff] }
 0x7f0   :  { %8000 = vmatpush1.bf16.xpose.msra.mxu0 %v9400_v61  ;;  %v5572_v61 = vld [vmem:[%s14316_s6 + $0x9d0] sm:$0xff] }
 0x7f1   :  { %8001 = vmatprep.subr.bf16.mxu0 %v9393_v63  ;;  %v5576_v63 = vld [vmem:[%s14316_s6 + $0x9f0] sm:$0xff] }
 0x7f2   :  { %v9443_v34 = vcombine.high %v5572_v61, %v5576_v63  ;;  %v9442_v7 = vcombine.low %v5572_v61, %v5576_v63 }
 0x7f6   :  { %7963 = vmatpush2.bf16.xpose.msra.mxu1 %v9502_v33  ;;  %v5591_v33 = vld [vmem:[%s14316_s6 + $0xa68] sm:$0xff] }
 0x7f7   :  { %7964 = vmatprep.subr.bf16.mxu1 %v9495_v29  ;;  %v9457_v29 = vcombine.high %v5587_v2, %v5591_v33  ;;  %v9456_v10 = vcombine.low %v5587_v2, %v5591_v33  ;;  %v5640_v2 = vld [vmem:[%s14316_s6 + $0xbf0] sm:$0xff] }
 0x7f8   :  { %8002 = vmatpush1.bf16.xpose.msra.mxu0 %v9392_v52  ;;  %v5564_v52 = vld [vmem:[%s14316_s6 + $0x990] sm:$0xff] }
 0x7f9   :  { %8003 = vmatprep.subr.bf16.mxu0 %v9385_v51  ;;  %v5568_v51 = vld [vmem:[%s14316_s6 + $0x9b0] sm:$0xff] }
 0x7fa   :  { %v9435_v9 = vcombine.high %v5564_v52, %v5568_v51  ;;  %v9434_v12 = vcombine.low %v5564_v52, %v5568_v51 }
 0x7fe   :  { %7965 = vmatpush2.bf16.xpose.msra.mxu1 %v9494_v58  ;;  %v5583_v58 = vld [vmem:[%s14316_s6 + $0xa28] sm:$0xff] }
 0x7ff   :  { %7966 = vmatprep.subr.bf16.mxu1 %v9487_v19  ;;  %v9449_v19 = vcombine.high %v5579_v5, %v5583_v58 }
 0x800   :  { %8004 = vmatpush1.bf16.xpose.msra.mxu0 %v9384_v11  ;;  %v5556_v11 = vld [vmem:[%s14316_s6 + $0x950] sm:$0xff] }
 0x801   :  { %8005 = vmatprep.subr.bf16.mxu0 %v9505_v22  ;;  %v5560_v22 = vld [vmem:[%s14316_s6 + $0x970] sm:$0xff] }
 0x802   :  { %v9427_v13 = vcombine.high %v5556_v11, %v5560_v22 }
 0x806   :  { %7967 = vmatpush2.bf16.xpose.msra.mxu1 %v9486_v4  ;;  %v9448_v4 = vcombine.low %v5579_v5, %v5583_v58  ;;  %v5632_v5 = vld [vmem:[%s14316_s6 + $0xbb0] sm:$0xff] }
 0x807   :  { %7968 = vmatprep.subr.bf16.mxu1 %v9479_v16  ;;  %v5552_v16 = vld [vmem:[%s14316_s6 + $0x930] sm:$0xff] }
 0x808   :  { %8006 = vmatpush2.bf16.xpose.msra.mxu0 %v9504_v3  ;;  %v9426_v3 = vcombine.low %v5556_v11, %v5560_v22  ;;  %v9419_v55 = vcombine.high %v5548_v15, %v5552_v16 }
 0x809   :  { %8007 = vmatprep.subr.bf16.mxu0 %v9497_v23  ;;  %v5565_v23 = vld [vmem:[%s14316_s6 + $0x998] sm:$0xff] }
 0x80a   :  { %v9437_v28 = vcombine.high %v5565_v23, %v5569_v48 }
 0x80e   :  { %7969 = vmatpush2.bf16.xpose.msra.mxu1 %v9478_v24 }
 0x80f   :  { %7970 = vmatprep.subr.bf16.mxu1 %v9471_v1  ;;  %v5544_v1 = vld [vmem:[%s14316_s6 + $0x8f0] sm:$0xff] }
 0x810   :  { %8008 = vmatpush2.bf16.xpose.msra.mxu0 %v9496_v31  ;;  %v9418_v31 = vcombine.low %v5548_v15, %v5552_v16  ;;  %v9411_v40 = vcombine.high %v5540_v30, %v5544_v1  ;;  %v9410_v62 = vcombine.low %v5540_v30, %v5544_v1 }
 0x811   :  { %8009 = vmatprep.subr.bf16.mxu0 %v9489_v60  ;;  %v5557_v60 = vld [vmem:[%s14316_s6 + $0x958] sm:$0xff] }
 0x816   :  { %7971 = vmatpush2.bf16.xpose.msra.mxu1 %v9470_v36  ;;  %v5532_v36 = vld [vmem:[%s14316_s6 + $0x890] sm:$0xff] }
 0x817   :  { %7972 = vmatprep.subr.bf16.mxu1 %v9463_v44  ;;  %v5549_v44 = vld [vmem:[%s14316_s6 + $0x918] sm:$0xff]  ;;  %v9402_v56 = vcombine.low %v5532_v36, %v5536_v49 }
 0x818   :  { %8010 = vmatpush2.bf16.xpose.msra.mxu0 %v9488_v6  ;;  %v5553_v6 = vld [vmem:[%s14316_s6 + $0x938] sm:$0xff] }
 0x819   :  { %8011 = vmatprep.subr.bf16.mxu0 %v9481_v8  ;;  %v9403_v8 = vcombine.high %v5532_v36, %v5536_v49  ;;  %v9421_v42 = vcombine.high %v5549_v44, %v5553_v6  ;;  %v9420_v43 = vcombine.low %v5549_v44, %v5553_v6  ;;  %v5600_v44 = vld [vmem:[%s14316_s6 + $0xab0] sm:$0xff] }
 0x81e   :  { %7973 = vmatpush2.bf16.xpose.msra.mxu1 %v9462_v45  ;;  %v5524_v45 = vld [vmem:[%s14316_s6 + $0x850] sm:$0xff] }
 0x81f   :  { %7974 = vmatprep.subr.bf16.mxu1 %v9455_v41  ;;  %v5541_v41 = vld [vmem:[%s14316_s6 + $0x8d8] sm:$0xff]  ;;  %v9394_v54 = vcombine.low %v5524_v45, %v5528_v27 }
 0x820   :  { %8012 = vmatpush2.bf16.xpose.msra.mxu0 %v9480_v0  ;;  %v5545_v0 = vld [vmem:[%s14316_s6 + $0x8f8] sm:$0xff] }
 0x821   :  { %8013 = vmatprep.subr.bf16.mxu0 %v9473_v38  ;;  %v9395_v38 = vcombine.high %v5524_v45, %v5528_v27  ;;  %v9413_v50 = vcombine.high %v5541_v41, %v5545_v0  ;;  %v9412_v61 = vcombine.low %v5541_v41, %v5545_v0  ;;  %v5592_v41 = vld [vmem:[%s14316_s6 + $0xa70] sm:$0xff] }
 0x826   :  { %7975 = vmatpush2.bf16.xpose.msra.mxu1 %v9454_v53  ;;  %v5516_v53 = vld [vmem:[%s14316_s6 + $0x810] sm:$0xff] }
 0x827   :  { %7976 = vmatprep.subr.bf16.mxu1 %v9447_v39  ;;  %v5533_v39 = vld [vmem:[%s14316_s6 + $0x898] sm:$0xff]  ;;  %v9386_v33 = vcombine.low %v5516_v53, %v5520_v25 }
 0x828   :  { %8014 = vmatpush2.bf16.xpose.msra.mxu0 %v9472_v47  ;;  %v5537_v47 = vld [vmem:[%s14316_s6 + $0x8b8] sm:$0xff] }
 0x829   :  { %8015 = vmatprep.subr.bf16.mxu0 %v9465_v59  ;;  %v9387_v59 = vcombine.high %v5516_v53, %v5520_v25  ;;  %v9405_v63 = vcombine.high %v5533_v39, %v5537_v47  ;;  %v9404_v52 = vcombine.low %v5533_v39, %v5537_v47  ;;  %v5584_v39 = vld [vmem:[%s14316_s6 + $0xa30] sm:$0xff] }
 0x82e   :  { %7977 = vmatpush2.bf16.xpose.msra.mxu1 %v9446_v21  ;;  %v5636_v21 = vld [vmem:[%s14316_s6 + $0xbd0] sm:$0xff] }
 0x82f   :  { %8032 = vmatprep.subr.bf16.mxu1 %v9443_v34  ;;  %v5525_v34 = vld [vmem:[%s14316_s6 + $0x858] sm:$0xff]  ;;  %v9506_v58 = vcombine.low %v5636_v21, %v5640_v2 }
 0x830   :  { %8016 = vmatpush2.bf16.xpose.msra.mxu0 %v9464_v17  ;;  %v5529_v17 = vld [vmem:[%s14316_s6 + $0x878] sm:$0xff] }
 0x831   :  { %8017 = vmatprep.subr.bf16.mxu0 %v9457_v29  ;;  %v9507_v29 = vcombine.high %v5636_v21, %v5640_v2  ;;  %v9397_v51 = vcombine.high %v5525_v34, %v5529_v17  ;;  %v9396_v11 = vcombine.low %v5525_v34, %v5529_v17  ;;  %v5589_v34 = vld [vmem:[%s14316_s6 + $0xa58] sm:$0xff] }
 0x832   :  { %v5593_v17 = vld [vmem:[%s14316_s6 + $0xa78] sm:$0xff] }
 0x835   :  { %7979 = vmatmul.mubr.bf16.vlgmr.msra.gmra.mxu1 %v12491_v57  ;;  %v5573_v57 = vld [vmem:[%s14316_s6 + $0x9d8] sm:$0xff] }
 0x836   :  { %8033 = vmatpush1.bf16.xpose.msra.mxu1 %v9442_v7  ;;  %8064 = vmatprep.mubr.bf16.mxu1 %v13255_v32  ;;  %v5577_v32 = vld [vmem:[%s14316_s6 + $0x9f8] sm:$0xff]  ;;  %v5628_v7 = vld [vmem:[%s14316_s6 + $0xb90] sm:$0xff] }
 0x837   :  { %8034 = vmatprep.subr.bf16.mxu1 %v9435_v9  ;;  %v9445_v37 = vcombine.high %v5573_v57, %v5577_v32  ;;  %v9444_v24 = vcombine.low %v5573_v57, %v5577_v32  ;;  %v5517_v9 = vld [vmem:[%s14316_s6 + $0x818] sm:$0xff]  ;;  %v5624_v57 = vld [vmem:[%s14316_s6 + $0xb70] sm:$0xff]  ;;  %v9498_v32 = vcombine.low %v5628_v7, %v5632_v5 }
 0x838   :  { %8018 = vmatpush2.bf16.xpose.msra.mxu0 %v9456_v10  ;;  %v5521_v10 = vld [vmem:[%s14316_s6 + $0x838] sm:$0xff] }
 0x839   :  { %8019 = vmatprep.subr.bf16.mxu0 %v9449_v19  ;;  %v9499_v19 = vcombine.high %v5628_v7, %v5632_v5  ;;  %v9389_v22 = vcombine.high %v5517_v9, %v5521_v10  ;;  %v9388_v15 = vcombine.low %v5517_v9, %v5521_v10  ;;  %v5585_v7 = vld [vmem:[%s14316_s6 + $0xa38] sm:$0xff]  ;;  %v9460_v5 = vcombine.low %v5589_v34, %v5593_v17  ;;  %v7636_v10 = vpop.f32.mrf.mxu1 }
 0x83e   :  { %8035 = vmatpush1.bf16.xpose.msra.mxu1 %v9434_v12  ;;  %v5620_v12 = vld [vmem:[%s14316_s6 + $0xb50] sm:$0xff] }
 0x83f   :  { %8036 = vmatprep.subr.bf16.mxu1 %v9427_v13  ;;  %v5637_v13 = vld [vmem:[%s14316_s6 + $0xbd8] sm:$0xff] }
 0x840   :  { %8020 = vmatpush2.bf16.xpose.msra.mxu0 %v9448_v4  ;;  %v5641_v4 = vld [vmem:[%s14316_s6 + $0xbf8] sm:$0xff] }
 0x841   :  { %8075 = vmatprep.subr.bf16.mxu0 %v9445_v37  ;;  %v9491_v37 = vcombine.high %v5620_v12, %v5624_v57  ;;  %v9509_v16 = vcombine.high %v5637_v13, %v5641_v4  ;;  %v9508_v30 = vcombine.low %v5637_v13, %v5641_v4 }
 0x846   :  { %8037 = vmatpush1.bf16.xpose.msra.mxu1 %v9426_v3  ;;  %v5612_v3 = vld [vmem:[%s14316_s6 + $0xb10] sm:$0xff] }
 0x847   :  { %8022 = vmatmul.mubr.bf16.vlgmr.msra.gmra.mxu0 %v12731_v20  ;;  %8038 = vmatprep.subr.bf16.mxu1 %v9419_v55  ;;  %v5561_v20 = vld [vmem:[%s14316_s6 + $0x978] sm:$0xff] }
 0x848   :  { %8076 = vmatpush1.bf16.xpose.msra.mxu0 %v9444_v24  ;;  %8107 = vmatprep.mubr.bf16.mxu0 %v13416_v26  ;;  %v9436_v26 = vcombine.low %v5565_v23, %v5569_v48  ;;  %v9429_v35 = vcombine.high %v5557_v60, %v5561_v20  ;;  %v9428_v14 = vcombine.low %v5557_v60, %v5561_v20  ;;  %v5616_v23 = vld [vmem:[%s14316_s6 + $0xb30] sm:$0xff]  ;;  %v5629_v55 = vld [vmem:[%s14316_s6 + $0xb98] sm:$0xff] }
 0x849   :  { %8077 = vmatprep.subr.bf16.mxu0 %v9437_v28  ;;  %v9490_v48 = vcombine.low %v5620_v12, %v5624_v57  ;;  %v5633_v24 = vld [vmem:[%s14316_s6 + $0xbb8] sm:$0xff]  ;;  %v9483_v28 = vcombine.high %v5612_v3, %v5616_v23  ;;  %v5608_v60 = vld [vmem:[%s14316_s6 + $0xaf0] sm:$0xff]  ;;  %v9482_v20 = vcombine.low %v5612_v3, %v5616_v23 }
 0x84a   :  { %v9501_v1 = vcombine.high %v5629_v55, %v5633_v24  ;;  %v9500_v36 = vcombine.low %v5629_v55, %v5633_v24 }
 0x84e   :  { %8039 = vmatpush1.bf16.xpose.msra.mxu1 %v9418_v31  ;;  %v5604_v31 = vld [vmem:[%s14316_s6 + $0xad0] sm:$0xff] }
 0x84f   :  { %8040 = vmatprep.subr.bf16.mxu1 %v9411_v40  ;;  %v5621_v40 = vld [vmem:[%s14316_s6 + $0xb58] sm:$0xff]  ;;  %v9474_v6 = vcombine.low %v5604_v31, %v5608_v60 }
 0x850   :  { %8078 = vmatpush1.bf16.xpose.msra.mxu0 %v9436_v26  ;;  %v5625_v26 = vld [vmem:[%s14316_s6 + $0xb78] sm:$0xff] }
 0x851   :  { %8079 = vmatprep.subr.bf16.mxu0 %v9429_v35  ;;  %v9475_v35 = vcombine.high %v5604_v31, %v5608_v60  ;;  %v9493_v49 = vcombine.high %v5621_v40, %v5625_v26  ;;  %v9492_v45 = vcombine.low %v5621_v40, %v5625_v26  ;;  %v5652_v40 = vlaneseq }
 0x856   :  { %8041 = vmatpush1.bf16.xpose.msra.mxu1 %v9410_v62  ;;  %v5596_v62 = vld [vmem:[%s14316_s6 + $0xa90] sm:$0xff] }
 0x857   :  { %8042 = vmatprep.subr.bf16.mxu1 %v9403_v8  ;;  %v5613_v8 = vld [vmem:[%s14316_s6 + $0xb18] sm:$0xff]  ;;  %v9466_v0 = vcombine.low %v5596_v62, %v5600_v44 }
 0x858   :  { %8080 = vmatpush1.bf16.xpose.msra.mxu0 %v9428_v14  ;;  %v5617_v14 = vld [vmem:[%s14316_s6 + $0xb38] sm:$0xff] }
 0x859   :  { %8081 = vmatprep.subr.bf16.mxu0 %v9421_v42  ;;  %v9467_v42 = vcombine.high %v5596_v62, %v5600_v44  ;;  %v9485_v27 = vcombine.high %v5613_v8, %v5617_v14  ;;  %v9484_v53 = vcombine.low %v5613_v8, %v5617_v14 }
 0x85e   :  { %8043 = vmatpush1.bf16.xpose.msra.mxu1 %v9402_v56  ;;  %v5588_v56 = vld [vmem:[%s14316_s6 + $0xa50] sm:$0xff] }
 0x85f   :  { %8044 = vmatprep.subr.bf16.mxu1 %v9395_v38  ;;  %v5605_v38 = vld [vmem:[%s14316_s6 + $0xad8] sm:$0xff]  ;;  %v9458_v47 = vcombine.low %v5588_v56, %v5592_v41 }
 0x860   :  { %8082 = vmatpush1.bf16.xpose.msra.mxu0 %v9420_v43  ;;  %v5609_v43 = vld [vmem:[%s14316_s6 + $0xaf8] sm:$0xff] }
 0x861   :  { %8083 = vmatprep.subr.bf16.mxu0 %v9413_v50  ;;  %v9459_v50 = vcombine.high %v5588_v56, %v5592_v41  ;;  %v9477_v25 = vcombine.high %v5605_v38, %v5609_v43  ;;  %v9476_v21 = vcombine.low %v5605_v38, %v5609_v43 }
 0x866   :  { %8045 = vmatpush1.bf16.xpose.msra.mxu1 %v9394_v54  ;;  %v5580_v54 = vld [vmem:[%s14316_s6 + $0xa10] sm:$0xff] }
 0x867   :  { %8046 = vmatprep.subr.bf16.mxu1 %v9387_v59  ;;  %v5597_v59 = vld [vmem:[%s14316_s6 + $0xa98] sm:$0xff] }
 0x868   :  { %8084 = vmatpush1.bf16.xpose.msra.mxu0 %v9412_v61  ;;  %v5601_v61 = vld [vmem:[%s14316_s6 + $0xab8] sm:$0xff] }
 0x869   :  { %8085 = vmatprep.subr.bf16.mxu0 %v9405_v63  ;;  %v9451_v63 = vcombine.high %v5580_v54, %v5584_v39  ;;  %v9469_v2 = vcombine.high %v5597_v59, %v5601_v61 }
 0x86e   :  { %8047 = vmatpush1.bf16.xpose.msra.mxu1 %v9386_v33  ;;  %v9450_v33 = vcombine.low %v5580_v54, %v5584_v39 }
 0x86f   :  { %8048 = vmatprep.subr.bf16.mxu1 %v9507_v29  ;;  %v9468_v29 = vcombine.low %v5597_v59, %v5601_v61 }
 0x870   :  { %8086 = vmatpush1.bf16.xpose.msra.mxu0 %v9404_v52  ;;  %v9461_v52 = vcombine.high %v5589_v34, %v5593_v17 }
 0x871   :  { %8087 = vmatprep.subr.bf16.mxu0 %v9397_v51  ;;  %v5581_v51 = vld [vmem:[%s14316_s6 + $0xa18] sm:$0xff] }
 0x872   :  { %v9452_v9 = vcombine.low %v5581_v51, %v5585_v7 }
 0x876   :  { %8049 = vmatpush2.bf16.xpose.msra.mxu1 %v9506_v58  ;;  %v9453_v58 = vcombine.high %v5581_v51, %v5585_v7 }
 0x877   :  { %8050 = vmatprep.subr.bf16.mxu1 %v9499_v19  ;;  %v7638_v19 = vpop.f32.mrf.mxu1 }
 0x878   :  { %8088 = vmatpush1.bf16.xpose.msra.mxu0 %v9396_v11 }
 0x879   :  { %8089 = vmatprep.subr.bf16.mxu0 %v9389_v22  ;;  %v7640_v11 = vpop.f32.mrf.mxu1  ;;  %v7679_v22 = vpop.f32.mrf.mxu0 }
 0x87b   :  { %v7642_v12 = vpop.f32.mrf.mxu1  ;;  %v7681_v57 = vpop.f32.mrf.mxu0 }
 0x87d   :  { %v7683_v13 = vpop.f32.mrf.mxu0 }
 0x87e   :  { %8051 = vmatpush2.bf16.xpose.msra.mxu1 %v9498_v32  ;;  %v7722_v32 = vpop.f32.mrf.mxu1 }
 0x87f   :  { %8052 = vmatprep.subr.bf16.mxu1 %v9491_v37  ;;  %v7685_v37 = vpop.f32.mrf.mxu0 }
 0x880   :  { %8090 = vmatpush1.bf16.xpose.msra.mxu0 %v9388_v15  ;;  %v7724_v4 = vpop.f32.mrf.mxu1 }
 0x881   :  { %8091 = vmatprep.subr.bf16.mxu0 %v9509_v16 }
 0x882   :  { %v14261_v15 = vpop.f32.mrf.mxu1 }
 0x884   :  { %v7728_v16 = vpop.f32.mrf.mxu1 }
 0x886   :  { %8053 = vmatpush2.bf16.xpose.msra.mxu1 %v9490_v48  ;;  %v7808_v23 = vpop.f32.mrf.mxu1 }
 0x887   :  { %8054 = vmatprep.subr.bf16.mxu1 %v9483_v28 }
 0x888   :  { %8092 = vmatpush2.bf16.xpose.msra.mxu0 %v9508_v30  ;;  %v7810_v55 = vpop.f32.mrf.mxu1 }
 0x889   :  { %8093 = vmatprep.subr.bf16.mxu0 %v9501_v1 }
 0x88a   :  { %v7812_v24 = vpop.f32.mrf.mxu1 }
 0x88c   :  { %v7814_v30 = vpop.f32.mrf.mxu1 }
 0x88e   :  { %8055 = vmatpush2.bf16.xpose.msra.mxu1 %v9482_v20  ;;  %v7894_v31 = vpop.f32.mrf.mxu1 }
 0x88f   :  { %8056 = vmatprep.subr.bf16.mxu1 %v9475_v35 }
 0x890   :  { %8094 = vmatpush2.bf16.xpose.msra.mxu0 %v9500_v36  ;;  %v7896_v20 = vpop.f32.mrf.mxu1 }
 0x891   :  { %8095 = vmatprep.subr.bf16.mxu0 %v9493_v49  ;;  %v5653_v49 = vshrl.u32 %v5652_v40, 7 }
 0x892   :  { %v7898_v35 = vpop.f32.mrf.mxu1 }
 0x893   :  { %v5658_v44 = vsub.s32 1, %v5653_v49  ;;  %v5654_v14 = vsub.s32 0, %v5653_v49  ;;  %v5666_v43 = vsub.s32 3, %v5653_v49  ;;  %v5674_v7 = vsub.s32 5, %v5653_v49 }
 0x894   :  { %v14265_v62 = vpop.f32.mrf.mxu1 }
 0x896   :  { %8057 = vmatpush2.bf16.xpose.msra.mxu1 %v9474_v6 }
 0x897   :  { %8058 = vmatprep.subr.bf16.mxu1 %v9467_v42  ;;  %v5650_v42 = vld [vmem:[%s14317_s7] sm:$0x3f] }
 0x898   :  { %8096 = vmatpush2.bf16.xpose.msra.mxu0 %v9492_v45  ;;  %v5662_v45 = vsub.s32 2, %v5653_v49  ;;  %v5667_v59 = vrot.slane %v5650_v42, %v5666_v43 }
 0x899   :  { %8097 = vmatprep.subr.bf16.mxu0 %v9485_v27  ;;  %v5659_v27 = vrot.slane %v5650_v42, %v5658_v44 }
 0x89a   :  { %v5663_v38 = vrot.slane %v5650_v42, %v5662_v45 }
 0x89e   :  { %8059 = vmatpush2.bf16.xpose.msra.mxu1 %v9466_v0  ;;  %v5655_v0 = vrot.slane %v5650_v42, %v5654_v14 }
 0x89f   :  { %8060 = vmatprep.subr.bf16.mxu1 %v9459_v50  ;;  %v7639_v50 = vadd.f32 %v7638_v19, %v5659_v27 }
 0x8a0   :  { %8098 = vmatpush2.bf16.xpose.msra.mxu0 %v9484_v53  ;;  %v7637_v54 = vadd.f32 %v7636_v10, %v5655_v0 }
 0x8a1   :  { %8099 = vmatprep.subr.bf16.mxu0 %v9477_v25  ;;  %v7682_v39 = vadd.f32 %v7681_v57, %v7639_v50 }
 0x8a6   :  { %8061 = vmatpush2.bf16.xpose.msra.mxu1 %v9458_v47  ;;  %v7809_v47 = vadd.f32 %v7808_v23, %v5663_v38 }
 0x8a7   :  { %8062 = vmatprep.subr.bf16.mxu1 %v9451_v63  ;;  %v7680_v63 = vadd.f32 %v7679_v22, %v7637_v54 }
 0x8a8   :  { %8100 = vmatpush2.bf16.xpose.msra.mxu0 %v9476_v21  ;;  %v7725_v21 = vadd.f32 %v7724_v4, %v7682_v39 }
 0x8a9   :  { %8101 = vmatprep.subr.bf16.mxu0 %v9469_v2  ;;  %v5670_v2 = vsub.s32 4, %v5653_v49  ;;  %v7815_v49 = vadd.f32 %v7814_v30, %v5667_v59 }
 0x8ab   :  { %v5671_v44 = vrot.slane %v5650_v42, %v5670_v2 }
 0x8ae   :  { %8063 = vmatpush2.bf16.xpose.msra.mxu1 %v9450_v33  ;;  %v7643_v33 = vadd.f32 %v7642_v12, %v5659_v27 }
 0x8b0   :  { %8102 = vmatpush2.bf16.xpose.msra.mxu0 %v9468_v29  ;;  %v7641_v29 = vadd.f32 %v7640_v11, %v5655_v0 }
 0x8b1   :  { %8103 = vmatprep.subr.bf16.mxu0 %v9461_v52  ;;  %v7723_v52 = vadd.f32 %v7722_v32, %v7680_v63  ;;  %v5675_v32 = vrot.slane %v5650_v42, %v5674_v7 }
 0x8b2   :  { %v7684_v23 = vadd.f32 %v7683_v13, %v7641_v29 }
 0x8b5   :  { %8065 = vmatmul.mubr.bf16.vlgmr.msra.gmra.mxu1 %v13159_v18  ;;  %v7765_v18 = vpop.f32.mrf.mxu0 }
 0x8b6   :  { %v7766_v40 = vadd.f32 %v7765_v18, %v7723_v52 }
 0x8b7   :  { %v7767_v3 = vpop.f32.mrf.mxu0 }
 0x8b8   :  { %8104 = vmatpush2.bf16.xpose.msra.mxu0 %v9460_v5  ;;  %v14270_v51 = vadd.f32 %v7767_v3, %v7725_v21  ;;  %v7686_v5 = vadd.f32 %v7685_v37, %v7643_v33 }
 0x8b9   :  { %8105 = vmatprep.subr.bf16.mxu0 %v9453_v58  ;;  %v14263_v48 = vpop.f32.mrf.mxu0  ;;  %v7811_v58 = vadd.f32 %v7810_v55, %v5667_v59 }
 0x8ba   :  { %v7729_v22 = vadd.f32 %v7728_v16, %v7686_v5  ;;  %v8118_v11 = vadd.f32 %v14270_v51, %v7766_v40 }
 0x8c0   :  { %8106 = vmatpush2.bf16.xpose.msra.mxu0 %v9452_v9  ;;  %v7813_v9 = vadd.f32 %v7812_v24, %v5663_v38 }
 0x8c7   :  { %8108 = vmatmul.mubr.bf16.vlgmr.msra.gmra.mxu0 %v13511_v46  ;;  %v7771_v46 = vpop.f32.mrf.mxu0 }
 0x8c8   :  { %v7772_v3 = vadd.f32 %v7771_v46, %v7729_v22 }
 0x8c9   :  { %v7851_v28 = vpop.f32.mrf.mxu0 }
 0x8ca   :  { %v7852_v34 = vadd.f32 %v7851_v28, %v7809_v47  ;;  %v7727_v28 = vadd.f32 %v14261_v15, %v7684_v23 }
 0x8cb   :  { %v7853_v1 = vpop.f32.mrf.mxu0 }
 0x8cc   :  { %v7895_v19 = vadd.f32 %v7894_v31, %v7852_v34  ;;  %v7854_v4 = vadd.f32 %v7853_v1, %v7811_v58  ;;  %v7770_v45 = vadd.f32 %v14263_v48, %v7727_v28 }
 0x8cd   :  { %v7855_v60 = vpop.f32.mrf.mxu0 }
 0x8ce   :  { %v7856_v14 = vadd.f32 %v7855_v60, %v7813_v9  ;;  %v7897_v37 = vadd.f32 %v7896_v20, %v7854_v4  ;;  %v8125_v0 = vadd.f32 %v7772_v3, %v7770_v45 }
 0x8cf   :  { %v7857_v26 = vpop.f32.mrf.mxu0 }
 0x8d0   :  { %v7899_v55 = vadd.f32 %v7898_v35, %v7856_v14  ;;  %v7858_v18 = vadd.f32 %v7857_v26, %v7815_v49 }
 0x8d1   :  { %v7937_v36 = vpop.f32.mrf.mxu0 }
 0x8d2   :  { %v7938_v12 = vadd.f32 %v7937_v36, %v7895_v19  ;;  %v7901_v15 = vadd.f32 %v14265_v62, %v7858_v18 }
 0x8d3   :  { %v7939_v6 = vpop.f32.mrf.mxu0 }
 0x8d4   :  { %v8119_v27 = vadd.f32 %v8118_v11, %v7938_v12  ;;  %v7940_v16 = vadd.f32 %v7939_v6, %v7897_v37 }
 0x8d5   :  { %v7941_v56 = vpop.f32.mrf.mxu0 }
 0x8d6   :  { %v7942_v1 = vadd.f32 %v7941_v56, %v7899_v55  ;;  %v8120_v35 = vadd.f32 %v8119_v27, %v7940_v16 }
 0x8d7   :  { %v7943_v53 = vpop.f32.mrf.mxu0 }
 0x8d8   :  { %v8126_v43 = vadd.f32 %v8125_v0, %v7942_v1  ;;  %v7944_v50 = vadd.f32 %v7943_v53, %v7901_v15 }
 0x8da   :  { %v8127_v63 = vadd.f32 %v8126_v43, %v7944_v50 }
 0x8f5   :  { %v7980_v8 = vpop.f32.mrf.mxu1 }
 0x8f6   :  { %v7981_v13 = vadd.f32 %v7980_v8, %v5671_v44 }
 0x8f7   :  { %v7982_v41 = vpop.f32.mrf.mxu1 }
 0x8f8   :  { %v7983_v60 = vadd.f32 %v7982_v41, %v5675_v32 }
 0x8f9   :  { %v7984_v25 = vpop.f32.mrf.mxu1 }
 0x8fa   :  { %v7985_v46 = vadd.f32 %v7984_v25, %v5671_v44 }
 0x8fb   :  { %v7986_v17 = vpop.f32.mrf.mxu1 }
 0x8fc   :  { %v7987_v48 = vadd.f32 %v7986_v17, %v5675_v32 }
 0x907   :  { %v8023_v61 = vpop.f32.mrf.mxu0 }
 0x908   :  { %v8024_v36 = vadd.f32 %v8023_v61, %v7981_v13 }
 0x909   :  { %v8025_v10 = vpop.f32.mrf.mxu0 }
 0x90a   :  { %v8026_v30 = vadd.f32 %v8025_v10, %v7983_v60 }
 0x90b   :  { %v8027_v24 = vpop.f32.mrf.mxu0 }
 0x90c   :  { %v8028_v8 = vadd.f32 %v8027_v24, %v7985_v46  ;;  %v8191_v46 = vld [vmem:[%s14318_s8] sm:$0x77] }
 0x90d   :  { %v8029_v38 = vpop.f32.mrf.mxu0 }
 0x90e   :  { %v8030_v41 = vadd.f32 %v8029_v38, %v7987_v48 }
 0x975   :  { %v8066_v57 = vpop.f32.mrf.mxu1 }
 0x976   :  { %v8067_v20 = vadd.f32 %v8066_v57, %v8024_v36 }
 0x977   :  { %v8068_v31 = vpop.f32.mrf.mxu1 }
 0x978   :  { %v8069_v26 = vadd.f32 %v8068_v31, %v8026_v30  ;;  %v8204_v30 = vcombine.high %v8191_v46, %v8191_v46 }
 0x979   :  { %v8070_v42 = vpop.f32.mrf.mxu1 }
 0x97a   :  { %v8071_v47 = vadd.f32 %v8070_v42, %v8028_v8  ;;  %8240 = vmatprep.subr.mxu1 %v8204_v30 }
 0x97b   :  { %v8072_v6 = vpop.f32.mrf.mxu1  ;;  %8241 = vmatpush1.xpose.msra.mxu1 %v8191_v46 }
 0x97c   :  { %v8073_v21 = vadd.f32 %v8072_v6, %v8030_v41 }
 0x987   :  { %v8109_v54 = vpop.f32.mrf.mxu0 }
 0x988   :  { %v8110_v39 = vadd.f32 %v8109_v54, %v8067_v20  ;;  %v8192_v20 = vld [vmem:[%s14318_s8 + $0x8] sm:$0x77] }
 0x989   :  { %v8111_v56 = vpop.f32.mrf.mxu0 }
 0x98a   :  { %v8121_v59 = vadd.f32 %v8120_v35, %v8110_v39  ;;  %v8112_v61 = vadd.f32 %v8111_v56, %v8069_v26  ;;  %v8205_v35 = vcombine.high %v8192_v20, %v8192_v20 }
 0x98b   :  { %v8113_v62 = vpop.f32.mrf.mxu0 }
 0x98c   :  { %v8114_v25 = vadd.f32 %v8113_v62, %v8071_v47  ;;  %v8122_v2 = vadd.f32 %v8121_v59, %v8112_v61  ;;  %8315 = vmatprep.subr.mxu1 %v8205_v35 }
 0x98d   :  { %v8115_v33 = vpop.f32.mrf.mxu0 }
 0x98e   :  { %v8128_v34 = vadd.f32 %v8127_v63, %v8114_v25  ;;  %v8116_v29 = vadd.f32 %v8115_v33, %v8073_v21  ;;  %8123 = vadd.xlane.f32.xlu0 %v8122_v2 }
 0x990   :  { %v8129_v53 = vadd.f32 %v8128_v34, %v8116_v29 }
 0x992   :  { %8130 = vadd.xlane.f32.xlu1 %v8129_v53 }
 0xa17   :  { %v8124_v17 = vpop.xlane.xlu0 %8123 }
 0xa18   :  { %v8133_v52 = vmul.f32 0.0013020834, %v8124_v17 }
 0xa1a   :  { %v8135_v7 = vsub.f32 %v7766_v40, %v8133_v52  ;;  %v8136_v5 = vsub.f32 %v14270_v51, %v8133_v52  ;;  %v14277_v58 = vsub.f32 %v7938_v12, %v8133_v52  ;;  %v14279_v19 = vsub.f32 %v7940_v16, %v8133_v52 }
 0xa1b   :  { %v8131_v9 = vpop.xlane.xlu1 %8130  ;;  %v14281_v44 = vsub.f32 %v8110_v39, %v8133_v52  ;;  %v8140_v40 = vsub.f32 %v8112_v61, %v8133_v52  ;;  %v8193_v39 = vld [vmem:[%s14318_s8 + $0x10] sm:$0x77] }
 0xa1c   :  { %v8134_v10 = vmul.f32 0.0013020834, %v8131_v9  ;;  %v8147_v57 = vmul.f32 %v8135_v7, %v8135_v7  ;;  %v8148_v23 = vmul.f32 %v8136_v5, %v8136_v5  ;;  %v8149_v22 = vmul.f32 %v14277_v58, %v14277_v58  ;;  %v9510_v9 = vld [vmem:[%s14319_s9] ss:$0 sm:$0xff] }
 0xa1d   :  { %v8150_v51 = vmul.f32 %v14279_v19, %v14279_v19  ;;  %v8151_v55 = vmul.f32 %v14281_v44, %v14281_v44  ;;  %v8152_v27 = vmul.f32 %v8140_v40, %v8140_v40  ;;  %v8206_v47 = vcombine.high %v8193_v39, %v8193_v39 }
 0xa1e   :  { %v8159_v4 = vadd.f32 %v8148_v23, %v8147_v57  ;;  %v8141_v14 = vsub.f32 %v7770_v45, %v8134_v10  ;;  %v8142_v28 = vsub.f32 %v7772_v3, %v8134_v10  ;;  %v8143_v11 = vsub.f32 %v7942_v1, %v8134_v10 }
 0xa1f   :  { %v8144_v32 = vsub.f32 %v7944_v50, %v8134_v10  ;;  %v8145_v31 = vsub.f32 %v8114_v25, %v8134_v10  ;;  %v8146_v45 = vsub.f32 %v8116_v29, %v8134_v10 }
 0xa20   :  { %v8160_v12 = vadd.f32 %v8159_v4, %v8149_v22  ;;  %v8153_v49 = vmul.f32 %v8141_v14, %v8141_v14  ;;  %v8154_v37 = vmul.f32 %v8142_v28, %v8142_v28  ;;  %v8155_v13 = vmul.f32 %v8143_v11, %v8143_v11 }
 0xa21   :  { %v8156_v3 = vmul.f32 %v8144_v32, %v8144_v32  ;;  %v8157_v36 = vmul.f32 %v8145_v31, %v8145_v31  ;;  %v8158_v15 = vmul.f32 %v8146_v45, %v8146_v45 }
 0xa22   :  { %v8161_v24 = vadd.f32 %v8160_v12, %v8150_v51  ;;  %v8166_v18 = vadd.f32 %v8154_v37, %v8153_v49 }
 0xa24   :  { %v8162_v16 = vadd.f32 %v8161_v24, %v8151_v55  ;;  %v8167_v1 = vadd.f32 %v8166_v18, %v8155_v13 }
 0xa26   :  { %v8163_v60 = vadd.f32 %v8162_v16, %v8152_v27  ;;  %v8168_v0 = vadd.f32 %v8167_v1, %v8156_v3 }
 0xa28   :  { %8164 = vadd.xlane.f32.xlu0 %v8163_v60  ;;  %v8169_v38 = vadd.f32 %v8168_v0, %v8157_v36 }
 0xa2a   :  { %v8170_v42 = vadd.f32 %v8169_v38, %v8158_v15 }
 0xa2c   :  { %8171 = vadd.xlane.f32.xlu1 %v8170_v42 }
 0xab1   :  { %v8165_v43 = vpop.xlane.xlu0 %8164 }
 0xab2   :  { %v8173_v50 = vmul.f32 0.0013020834, %v8165_v43 }
 0xab4   :  { %v8175_v54 = vadd.f32 1e-05, %v8173_v50 }
 0xab5   :  { %v8172_v48 = vpop.xlane.xlu1 %8171 }
 0xab6   :  { %10586 = vrsqrt.f32 %v8175_v54  ;;  %v8174_v8 = vmul.f32 0.0013020834, %v8172_v48 }
 0xab8   :  { %v8176_v26 = vadd.f32 1e-05, %v8174_v8 }
 0xaba   :  { %10588 = vrsqrt.f32 %v8176_v26 }
 0xac3   :  { %v10587_v6 = vpop.eup %10586 }
 0xac4   :  { %v8180_v56 = vmul.f32 %v10587_v6, %v8136_v5  ;;  %v8179_v41 = vmul.f32 %v10587_v6, %v8135_v7  ;;  %v8182_v63 = vmul.f32 %v10587_v6, %v14279_v19  ;;  %v8181_v21 = vmul.f32 %v10587_v6, %v14277_v58 }
 0xac5   :  { %v8184_v33 = vmul.f32 %v10587_v6, %v8140_v40  ;;  %v8183_v34 = vmul.f32 %v10587_v6, %v14281_v44 }
 0xac6   :  { %8274 = vmatprep.mubr.f32.mxu1 %v8180_v56 }
 0xac7   :  { %v10589_v59 = vpop.eup %10588  ;;  %8275 = vmatmul.mubr.f32.vlgmr.msra.gmra.mxu1 %v8179_v41 }
 0xac8   :  { %8316 = vmatpush1.xpose.msra.mxu1 %v8192_v20  ;;  %v8186_v61 = vmul.f32 %v10589_v59, %v8142_v28  ;;  %v8185_v62 = vmul.f32 %v10589_v59, %v8141_v14  ;;  %v8188_v25 = vmul.f32 %v10589_v59, %v8144_v32  ;;  %v8187_v2 = vmul.f32 %v10589_v59, %v8143_v11 }
 0xac9   :  { %8390 = vmatprep.subr.mxu1 %v8206_v47  ;;  %v8190_v29 = vmul.f32 %v10589_v59, %v8146_v45  ;;  %v8189_v53 = vmul.f32 %v10589_v59, %v8145_v31 }
 0xaca   :  { %8279 = vmatprep.mubr.f32.mxu1 %v8186_v61 }
 0xacb   :  { %8280 = vmatmul.mubr.f32.gmra.mxu1 %v8185_v62 }
 0xacc   :  { %8349 = vmatprep.mubr.f32.mxu1 %v8182_v63 }
 0xacf   :  { %8350 = vmatmul.mubr.f32.vlgmr.msra.gmra.mxu1 %v8181_v21 }
 0xad0   :  { %8391 = vmatpush1.xpose.msra.mxu1 %v8193_v39  ;;  %8354 = vmatprep.mubr.f32.mxu1 %v8188_v25 }
 0xad3   :  { %8355 = vmatmul.mubr.f32.gmra.mxu1 %v8187_v2 }
 0xad4   :  { %8424 = vmatprep.mubr.f32.mxu1 %v8184_v33 }
 0xad7   :  { %8425 = vmatmul.mubr.f32.vlgmr.msra.gmra.mxu1 %v8183_v34 }
 0xad8   :  { %8429 = vmatprep.mubr.f32.mxu1 %v8190_v29 }
 0xadb   :  { %8430 = vmatmul.mubr.f32.gmra.mxu1 %v8189_v53 }
 0xb87   :  { %v8276_v17 = vpop.f32.mrf.mxu1 }
 0xb88   :  { %v8277_v57 = vadd.f32 %v9510_v9, %v8276_v17 }
 0xb89   :  { %v8278_v52 = vpop.f32.mrf.mxu1 }
 0xb8b   :  { %v8281_v7 = vpop.f32.mrf.mxu1 }
 0xb8c   :  { %v8282_v4 = vadd.f32 %v9510_v9, %v8281_v7 }
 0xb8d   :  { %v8283_v5 = vpop.f32.mrf.mxu1 }
 0xb8f   :  { %v8351_v58 = vpop.f32.mrf.mxu1 }
 0xb90   :  { %v8352_v22 = vadd.f32 %v8351_v58, %v8277_v57 }
 0xb91   :  { %v8353_v19 = vpop.f32.mrf.mxu1 }
 0xb93   :  { %v8356_v10 = vpop.f32.mrf.mxu1 }
 0xb94   :  { %v8357_v11 = vadd.f32 %v8356_v10, %v8282_v4 }
 0xb95   :  { %v8358_v23 = vpop.f32.mrf.mxu1 }
 0xb97   :  { %v8426_v44 = vpop.f32.mrf.mxu1 }
 0xb98   :  { %v8427_v14 = vadd.f32 %v8426_v44, %v8352_v22 }
 0xb99   :  { %v8428_v28 = vpop.f32.mrf.mxu1 }
 0xb9a   :  { %8436 = vst.msk [vmem:[%s14320_s10] sm:$0xff] %vm8435_vm8, %v8427_v14 }
 0xb9b   :  { %v8431_v40 = vpop.f32.mrf.mxu1 }
 0xb9c   :  { %v8432_v51 = vadd.f32 %v8431_v40, %v8357_v11 }
 0xb9d   :  { %v8433_v12 = vpop.f32.mrf.mxu1 }
 0xb9e   :  { %8437 = vst.msk [vmem:[%s14320_s10 + $0x8] sm:$0xff] %vm8435_vm8, %v8432_v51 }

</bundles_post_ra>
